<compile_context>
chip_gen: v5e
topology: v5e:2x2
jax: 0.10.0
libtpu: 0.0.40
codegen_flags: <defaults>
</compile_context>

<pallas_src>
import jax
import jax.numpy as jnp
from jax import lax
from jax.experimental import pallas as pl
from jax.experimental.pallas import tpu as pltpu

BN_EPS = 1e-5
LEAKY_SLOPE = 0.01
PARK_DTYPE = jnp.bfloat16   # dtype of HBM-parked raw conv outputs between passes

# Fixed by the module spec.
K0, C0 = 7, 32     # g0:    Conv1d(1  -> 32,  kernel_size=7, padding=3)
K1, C1 = 5, 64     # conv1: Conv1d(32 -> 64,  kernel_size=5, padding=2)
K2, C2 = 3, 128    # conv2: Conv1d(64 -> 128, kernel_size=3, padding=1)


def _leaky(h):
    return jnp.where(h > 0, h, LEAKY_SLOPE * h)


def _compiler_params(working_set_bytes):
    # Raise the scoped-VMEM cap to fit the tile working set (v5e default is only
    # 16 MiB) while staying under v7x's 64 MiB physical VMEM.
    limit = int(min(56 * 2**20, max(32 * 2**20, 3 * working_set_bytes)))
    return pltpu.CompilerParams(
        dimension_semantics=("parallel",),   # batch tiles are independent -> megacore
        vmem_limit_bytes=limit)


# --------------------------------------------------------------------------------------
# Layer 1: Conv1d(1 -> 32, k=7, p=3)  -> raw conv output (bf16, HBM) + per-tile BN stats.
# --------------------------------------------------------------------------------------
def _layer1_call(x_nl1, w0_ko, b0, *, tile_n):
    n, l, _ = x_nl1.shape
    ntiles = n // tile_n
    pad = (K0 - 1) // 2

    def kernel(x_ref, w_ref, b_ref, z_ref, st_ref):
        # Cin == 1 => contraction depth 7: kept on the VPU as unrolled broadcast-MACs
        # (<1% of the network's MACs; this layer is HBM-bound on reading x anyway).
        # TODO(synk): per review, an (M, 8)@(8, 32) MXU im2col variant would also remove
        # the per-tap lane broadcasts; left on the proven VPU path here.
        w = w_ref[...]                                            # (7, 32) f32
        b = b_ref[...]                                            # (1, 32) f32
        s_sum = jnp.zeros((1, C0), jnp.float32)
        s_sq = jnp.zeros((1, C0), jnp.float32)
        for i in range(tile_n):                                   # static unroll over samples
            x_i = x_ref[i]                                        # (L, 1) f32
            xp = jnp.concatenate(
                [jnp.zeros((pad, 1), jnp.float32), x_i,
                 jnp.zeros((pad, 1), jnp.float32)], axis=0)       # (L+6, 1)
            acc = jnp.zeros((l, C0), jnp.float32)
            for s in range(K0):
                acc = acc + xp[s:s + l, :] * w[s:s + 1, :]        # (L,1)*(1,32) -> (L,32)
            acc = acc + b                                         # conv bias
            s_sum = s_sum + jnp.sum(acc, axis=0, keepdims=True)
            s_sq = s_sq + jnp.sum(acc * acc, axis=0, keepdims=True)
            z_ref[i] = acc.astype(z_ref.dtype)                    # park raw conv output
        st_ref[...] = jnp.concatenate([s_sum, s_sq], axis=0)[None]

    rows = tile_n * l
    work = rows * (4 * 2 + 4 * C0 + 2 * C0 * 2) + 4 * K0 * C0
    flops = 2 * n * l * K0 * C0
    bytes_accessed = (n * l * 4 + n * l * C0 * 2 + ntiles * 2 * C0 * 4
                      + K0 * C0 * 4 + C0 * 4)
    return pl.pallas_call(
        kernel,
        out_shape=(jax.ShapeDtypeStruct((n, l, C0), PARK_DTYPE),
                   jax.ShapeDtypeStruct((ntiles, 2, C0), jnp.float32)),
        grid=(ntiles,),
        in_specs=[pl.BlockSpec((tile_n, l, 1), lambda i: (i, 0, 0)),
                  pl.BlockSpec((K0, C0), lambda i: (0, 0)),
                  pl.BlockSpec((1, C0), lambda i: (0, 0))],
        out_specs=(pl.BlockSpec((tile_n, l, C0), lambda i: (i, 0, 0)),
                   pl.BlockSpec((1, 2, C0), lambda i: (i, 0, 0))),
        compiler_params=_compiler_params(work),
        cost_estimate=pl.CostEstimate(flops=flops, transcendentals=0,
                                      bytes_accessed=bytes_accessed),
    )(x_nl1, w0_ko, b0.reshape(1, C0).astype(jnp.float32))


# --------------------------------------------------------------------------------------
# Layers 2/3: (BN affine of previous layer + LeakyReLU) fused with Conv1d as an im2col
# MXU matmul -> raw conv output (bf16, HBM) + per-tile BN stats.
# --------------------------------------------------------------------------------------
def _bn_act_conv_call(z_prev, w_flat, bias, scale, shift, *, k, cin, cout, tile_n):
    n, l, _ = z_prev.shape
    ntiles = n // tile_n
    pad = (k - 1) // 2

    def kernel(x_ref, w_ref, b_ref, sc_ref, sh_ref, z_ref, st_ref):
        w = w_ref[...]                                            # (K*Cin, Cout) bf16
        b = b_ref[...]                                            # (1, Cout) f32
        sc = sc_ref[...]                                          # (1, Cin) f32
        sh = sh_ref[...]                                          # (1, Cin) f32
        zp = jnp.zeros((pad, cin), jnp.bfloat16)
        s_sum = jnp.zeros((1, cout), jnp.float32)
        s_sq = jnp.zeros((1, cout), jnp.float32)
        for i in range(tile_n):                                   # static unroll over samples
            # Previous layer's training-mode BN (folded affine) + LeakyReLU, in f32.
            h = x_ref[i].astype(jnp.float32) * sc + sh            # (L, Cin)
            h = _leaky(h).astype(jnp.bfloat16)                    # bf16 BEFORE im2col
            # 'same'-padded Conv1d as one deep-contraction MXU matmul (f32 accumulate).
            hp = jnp.concatenate([zp, h, zp], axis=0)             # (L+K-1, Cin) bf16
            cols = jnp.concatenate([hp[s:s + l, :] for s in range(k)],
                                   axis=-1)                       # (L, K*Cin) bf16
            acc = jnp.dot(cols, w, preferred_element_type=jnp.float32) + b
            s_sum = s_sum + jnp.sum(acc, axis=0, keepdims=True)
            s_sq = s_sq + jnp.sum(acc * acc, axis=0, keepdims=True)
            z_ref[i] = acc.astype(z_ref.dtype)                    # park raw conv output
        st_ref[...] = jnp.concatenate([s_sum, s_sq], axis=0)[None]

    rows = tile_n * l
    work = (rows * (2 * cin * 2        # input tile, double-buffered
                    + 2 * cout * 2)    # parked-output tile, double-buffered
            + l * (4 * cin + 2 * cin + 2 * cin + 2 * k * cin + 4 * cout)  # per-sample temps
            + 2 * k * cin * cout)
    flops = 2 * n * l * (k * cin) * cout
    bytes_accessed = (n * l * cin * 2 + n * l * cout * 2 + ntiles * 2 * cout * 4
                      + k * cin * cout * 2 + (2 * cin + 2 * cout) * 4)
    return pl.pallas_call(
        kernel,
        out_shape=(jax.ShapeDtypeStruct((n, l, cout), PARK_DTYPE),
                   jax.ShapeDtypeStruct((ntiles, 2, cout), jnp.float32)),
        grid=(ntiles,),
        in_specs=[pl.BlockSpec((tile_n, l, cin), lambda i: (i, 0, 0)),
                  pl.BlockSpec((k * cin, cout), lambda i: (0, 0)),
                  pl.BlockSpec((1, cout), lambda i: (0, 0)),
                  pl.BlockSpec((1, cin), lambda i: (0, 0)),
                  pl.BlockSpec((1, cin), lambda i: (0, 0))],
        out_specs=(pl.BlockSpec((tile_n, l, cout), lambda i: (i, 0, 0)),
                   pl.BlockSpec((1, 2, cout), lambda i: (i, 0, 0))),
        compiler_params=_compiler_params(work),
        cost_estimate=pl.CostEstimate(flops=flops, transcendentals=0,
                                      bytes_accessed=bytes_accessed),
    )(z_prev, w_flat, bias.reshape(1, cout).astype(jnp.float32), scale, shift)


# --------------------------------------------------------------------------------------
# Final pass: BN affine + LeakyReLU of layer 3, written directly in PyTorch NCL layout.
# --------------------------------------------------------------------------------------
def _bn_act_to_ncl_call(z_last, scale, shift, *, tile_n):
    n, l, c = z_last.shape
    ntiles = n // tile_n
    pad8 = (-l) % 8                          # pad sublanes so the 2-D transpose is tile-aligned

    def kernel(z_ref, sc_ref, sh_ref, o_ref):
        sc = sc_ref[...]
        sh = sh_ref[...]
        for i in range(tile_n):
            h = z_ref[i].astype(jnp.float32) * sc + sh            # (L, 128) f32
            h = _leaky(h)
            if pad8:
                h = jnp.concatenate(
                    [h, jnp.zeros((pad8, c), jnp.float32)], axis=0)
            # Per-sample 2-D XLU transpose -> store the PyTorch (C, L) layout directly
            # (removes the wrapper-side whole-output HBM transpose).
            o_ref[i] = h.T[:, :l]
        # TODO(synk): a bf16 out_shape would halve the dominant store on v5e if the
        # consumer tolerates it; kept f32 to match the PyTorch module's output dtype.

    rows = tile_n * l
    work = rows * (2 * c * 2 + 4 * c * 2) + l * 8 * c
    flops = 3 * n * l * c
    bytes_accessed = n * l * c * 2 + n * l * c * 4 + 2 * c * 4
    return pl.pallas_call(
        kernel,
        out_shape=jax.ShapeDtypeStruct((n, c, l), jnp.float32),
        grid=(ntiles,),
        in_specs=[pl.BlockSpec((tile_n, l, c), lambda i: (i, 0, 0)),
                  pl.BlockSpec((1, c), lambda i: (0, 0)),
                  pl.BlockSpec((1, c), lambda i: (0, 0))],
        out_specs=pl.BlockSpec((tile_n, c, l), lambda i: (i, 0, 0)),
        compiler_params=_compiler_params(work),
        cost_estimate=pl.CostEstimate(flops=flops, transcendentals=0,
                                      bytes_accessed=bytes_accessed),
    )(z_last, scale, shift)


def _bn_affine(stats, gamma, beta, count):
    """Combine per-tile (sum, sum_sq) partials into the training-mode BN affine."""
    s = jnp.sum(stats[:, 0, :], axis=0)
    ss = jnp.sum(stats[:, 1, :], axis=0)
    mean = s / count
    var = jnp.maximum(ss / count - mean * mean, 0.0)   # clamp guards f32 cancellation
    scale = gamma.astype(jnp.float32) * lax.rsqrt(var + BN_EPS)
    shift = beta.astype(jnp.float32) - mean * scale
    return scale.reshape(1, -1), shift.reshape(1, -1)


def gabor_nn_1d_forward(x_ncl, params, *, tile_n=None):
    """Forward pass. x_ncl: (N, 1, L) like PyTorch NCL. Returns (N, 128, L) f32."""
    (w0, b0, g1, be1), (w1, b1, g2, be2), (w2, b2, g3, be3) = params
    n, cin_in, l = x_ncl.shape
    assert cin_in == 1

    # Batch-tile size: target >=512-1024 matmul rows per grid step, shrunk to a divisor
    # of N.  TODO(synk): for small-N / very long-L workloads, an L-tiled variant with a
    # (K-1)-halo would expose more grid parallelism.
    if tile_n is None:
        tile_n = max(1, min(n, 1024 // max(l, 1)))
    tile_n = max(1, min(int(tile_n), n))
    while n % tile_n:
        tile_n -= 1

    count = float(n * l)

    # PyTorch (Cout, Cin, K) -> matmul layouts (row index = k*Cin + cin).
    w0_ko = jnp.transpose(w0, (2, 1, 0)).reshape(K0, C0).astype(jnp.float32)        # (7, 32)
    w1_f = jnp.transpose(w1, (2, 1, 0)).reshape(K1 * C0, C1).astype(jnp.bfloat16)   # (160, 64)
    w2_f = jnp.transpose(w2, (2, 1, 0)).reshape(K2 * C1, C2).astype(jnp.bfloat16)   # (192, 128)

    x_nl1 = x_ncl.reshape(n, l, 1).astype(jnp.float32)   # Cin == 1: NCL -> NL1 is a relabel

    z1, st1 = _layer1_call(x_nl1, w0_ko, b0, tile_n=tile_n)
    sc1, sh1 = _bn_affine(st1, g1, be1, count)

    z2, st2 = _bn_act_conv_call(z1, w1_f, b1, sc1, sh1,
                                k=K1, cin=C0, cout=C1, tile_n=tile_n)
    sc2, sh2 = _bn_affine(st2, g2, be2, count)

    z3, st3 = _bn_act_conv_call(z2, w2_f, b2, sc2, sh2,
                                k=K2, cin=C1, cout=C2, tile_n=tile_n)
    sc3, sh3 = _bn_affine(st3, g3, be3, count)

    # MaxPool1d(kernel_size=1) layers are identities -> elided.
    # TODO(synk): training-mode BatchNorm running_mean/running_var buffer updates are
    # not emitted (they do not affect the forward output).
    return _bn_act_to_ncl_call(z3, sc3, sh3, tile_n=tile_n)


gabor_nn_1d = jax.jit(gabor_nn_1d_forward, static_argnames=("tile_n",))


def init_params(key):
    """Synthetic params matching the module's parameter shapes (PyTorch layouts):
    Conv weight (Cout, Cin, K) + bias with kaiming-uniform-like bounds; BN weight/bias
    randomized (instead of 1/0) to exercise the affine. Arrays only (jit-safe pytree)."""
    cfgs = [(1, C0, K0), (C0, C1, K1), (C1, C2, K2)]
    params = []
    for cin, cout, k in cfgs:
        key, kw, kb, kg, kbe = jax.random.split(key, 5)
        bound = 1.0 / (cin * k) ** 0.5
        w = jax.random.uniform(kw, (cout, cin, k), jnp.float32, -bound, bound)
        b = jax.random.uniform(kb, (cout,), jnp.float32, -bound, bound)
        gamma = jax.random.uniform(kg, (cout,), jnp.float32, 0.5, 1.5)
        beta = jax.random.uniform(kbe, (cout,), jnp.float32, -0.5, 0.5)
        params.append((w, b, gamma, beta))
    return tuple(params)


def reference_forward(x_ncl, params):
    """Pure-JAX reference mirroring the PyTorch math (Conv1d with bias, training-mode
    two-pass BatchNorm, LeakyReLU(0.01), MaxPool1d(1)=identity).  To allow a tight
    comparison it mirrors the kernel's documented precision policy: bf16 MXU operands
    for the Cin>=32 convs and bf16 HBM parking of raw conv outputs; stats,
    normalization and activation math stay f32.  Versus true f32 PyTorch expect
    ~1e-2-level relative differences from those bf16 steps."""
    x = jnp.transpose(x_ncl, (0, 2, 1)).astype(jnp.float32)   # (N, L, Cin)

    def layer(h, w, b, gamma, beta, pad, mxu_bf16):
        k = w.shape[2]
        l = h.shape[1]
        w_kio = jnp.transpose(w, (2, 1, 0)).astype(jnp.float32)   # (K, Cin, Cout)
        hp = jnp.pad(h, ((0, 0), (pad, pad), (0, 0)))
        dt = jnp.bfloat16 if mxu_bf16 else jnp.float32
        prec = None if mxu_bf16 else lax.Precision.HIGHEST
        acc = sum(jnp.einsum("nlc,cd->nld",
                             hp[:, s:s + l, :].astype(dt), w_kio[s].astype(dt),
                             preferred_element_type=jnp.float32, precision=prec)
                  for s in range(k))
        acc = acc + b[None, None, :]
        mean = jnp.mean(acc, axis=(0, 1), keepdims=True)
        var = jnp.mean((acc - mean) ** 2, axis=(0, 1), keepdims=True)
        accq = acc.astype(PARK_DTYPE).astype(jnp.float32)     # mirror bf16 HBM parking
        y = (accq - mean) * lax.rsqrt(var + BN_EPS) * gamma + beta
        return jnp.where(y > 0, y, LEAKY_SLOPE * y)

    (w0, b0, g1, be1), (w1, b1, g2, be2), (w2, b2, g3, be3) = params
    x = layer(x, w0, b0, g1, be1, 3, False)
    x = layer(x, w1, b1, g2, be2, 2, True)
    x = layer(x, w2, b2, g3, be3, 1, True)
    return jnp.transpose(x, (0, 2, 1))


if __name__ == "__main__":
    key = jax.random.PRNGKey(0)
    key, kx = jax.random.split(key)

    # Small shapes consistent with the module: batch=8, in_channels=1, length=99
    # (the module's default sample_length).  tile_n=2 -> a 4-step batch grid, which
    # exercises the cross-tile BatchNorm statistic combination.
    N, L = 8, 99
    x = jax.random.normal(kx, (N, 1, L), jnp.float32)
    params = init_params(key)

    out = jax.block_until_ready(gabor_nn_1d(x, params, tile_n=2))
    assert out.shape == (N, 128, L), out.shape
    assert out.dtype == jnp.float32, out.dtype

    ref = reference_forward(x, params)
    max_err = float(jnp.max(jnp.abs(out - ref)))
    # Tolerance budget: bf16 HBM parking + bf16 MXU operands can give 1-ulp (~4e-3
    # relative) disagreements on intermediates that propagate through one further
    # normalized layer; everything else (stats, affine, activations) is f32.
    assert jnp.allclose(out, ref, atol=5e-2, rtol=5e-2), f"mismatch vs reference: {max_err}"

    print("KERNEL_OK")
</pallas_src>

<mosaic_0001>
module attributes {stable_mosaic.version = 11 : i64} {
  func.func @kernel(%arg0: i32, %arg1: memref<2x99x32xbf16, #tpu.memory_space<vmem>>, %arg2: memref<160x64xbf16, #tpu.memory_space<vmem>>, %arg3: memref<1x64xf32, #tpu.memory_space<vmem>>, %arg4: memref<1x32xf32, #tpu.memory_space<vmem>>, %arg5: memref<1x32xf32, #tpu.memory_space<vmem>>, %arg6: memref<2x99x64xbf16, #tpu.memory_space<vmem>>, %arg7: memref<1x2x64xf32, #tpu.memory_space<vmem>>) attributes {dimension_semantics = [#tpu.dimension_semantics<parallel>], iteration_bounds = array<i64: 4>, scalar_prefetch = 0 : i64, scratch_operands = 0 : i64, tpu.core_type = #tpu.core_type<tc>, window_params = [{transform_indices = @transform_0, window_bounds = array<i64: 2, 99, 32>}, {pipeline_mode = #tpu.pipeline_mode<synchronous>, transform_indices = @transform_1, window_bounds = array<i64: 160, 64>}, {pipeline_mode = #tpu.pipeline_mode<synchronous>, transform_indices = @transform_2, window_bounds = array<i64: 1, 64>}, {pipeline_mode = #tpu.pipeline_mode<synchronous>, transform_indices = @transform_3, window_bounds = array<i64: 1, 32>}, {pipeline_mode = #tpu.pipeline_mode<synchronous>, transform_indices = @transform_4, window_bounds = array<i64: 1, 32>}, {transform_indices = @transform_5, window_bounds = array<i64: 2, 99, 64>}, {transform_indices = @transform_6, window_bounds = array<i64: 1, 2, 64>}]} {
    %c0 = arith.constant 0 : index
    %c0_0 = arith.constant 0 : index
    %0 = vector.load %arg2[%c0, %c0_0] : memref<160x64xbf16, #tpu.memory_space<vmem>>, vector<160x64xbf16>
    %c0_1 = arith.constant 0 : index
    %c0_2 = arith.constant 0 : index
    %1 = vector.load %arg3[%c0_1, %c0_2] : memref<1x64xf32, #tpu.memory_space<vmem>>, vector<1x64xf32>
    %c0_3 = arith.constant 0 : index
    %c0_4 = arith.constant 0 : index
    %2 = vector.load %arg4[%c0_3, %c0_4] : memref<1x32xf32, #tpu.memory_space<vmem>>, vector<1x32xf32>
    %c0_5 = arith.constant 0 : index
    %c0_6 = arith.constant 0 : index
    %3 = vector.load %arg5[%c0_5, %c0_6] : memref<1x32xf32, #tpu.memory_space<vmem>>, vector<1x32xf32>
    %cst = arith.constant 0.000000e+00 : bf16
    %4 = vector.broadcast %cst : bf16 to vector<2x32xbf16>
    %cst_7 = arith.constant 0.000000e+00 : f32
    %5 = vector.broadcast %cst_7 : f32 to vector<1x64xf32>
    %cst_8 = arith.constant 0.000000e+00 : f32
    %6 = vector.broadcast %cst_8 : f32 to vector<1x64xf32>
    %c0_9 = arith.constant 0 : index
    %c0_10 = arith.constant 0 : index
    %c0_11 = arith.constant 0 : index
    %7 = vector.load %arg1[%c0_9, %c0_10, %c0_11] : memref<2x99x32xbf16, #tpu.memory_space<vmem>>, vector<1x99x32xbf16>
    %8 = vector.shape_cast %7 : vector<1x99x32xbf16> to vector<99x32xbf16>
    %9 = arith.extf %8 : vector<99x32xbf16> to vector<99x32xf32>
    %10 = vector.broadcast %2 : vector<1x32xf32> to vector<99x32xf32>
    %11 = arith.mulf %9, %10 : vector<99x32xf32>
    %12 = vector.broadcast %3 : vector<1x32xf32> to vector<99x32xf32>
    %13 = arith.addf %11, %12 : vector<99x32xf32>
    %cst_12 = arith.constant 0.000000e+00 : f32
    %14 = vector.broadcast %cst_12 : f32 to vector<99x32xf32>
    %15 = arith.cmpf ogt, %13, %14 : vector<99x32xf32>
    %cst_13 = arith.constant 0.00999999977 : f32
    %16 = vector.broadcast %cst_13 : f32 to vector<99x32xf32>
    %17 = arith.mulf %16, %13 : vector<99x32xf32>
    %18 = arith.select %15, %13, %17 : vector<99x32xi1>, vector<99x32xf32>
    %19 = arith.truncf %18 : vector<99x32xf32> to vector<99x32xbf16>
    %20 = tpu.concatenate %4, %19, %4 in 0 : vector<2x32xbf16>, vector<99x32xbf16>, vector<2x32xbf16> -> vector<103x32xbf16>
    %21 = vector.extract_strided_slice %20 {offsets = [0, 0], sizes = [99, 32], strides = [1, 1]} : vector<103x32xbf16> to vector<99x32xbf16>
    %22 = vector.extract_strided_slice %20 {offsets = [1, 0], sizes = [99, 32], strides = [1, 1]} : vector<103x32xbf16> to vector<99x32xbf16>
    %23 = vector.extract_strided_slice %20 {offsets = [2, 0], sizes = [99, 32], strides = [1, 1]} : vector<103x32xbf16> to vector<99x32xbf16>
    %24 = vector.extract_strided_slice %20 {offsets = [3, 0], sizes = [99, 32], strides = [1, 1]} : vector<103x32xbf16> to vector<99x32xbf16>
    %25 = vector.extract_strided_slice %20 {offsets = [4, 0], sizes = [99, 32], strides = [1, 1]} : vector<103x32xbf16> to vector<99x32xbf16>
    %26 = tpu.concatenate %21, %22, %23, %24, %25 in 1 : vector<99x32xbf16>, vector<99x32xbf16>, vector<99x32xbf16>, vector<99x32xbf16>, vector<99x32xbf16> -> vector<99x160xbf16>
    %cst_14 = arith.constant dense<0.000000e+00> : vector<99x64xf32>
    %27 = tpu.matmul %26, %0, %cst_14 {dimension_numbers = #tpu.dot_dimension_numbers<[1], [0], [0], [1], [0, 0, 1, 1], [], []>} : vector<99x160xbf16>, vector<160x64xbf16>, vector<99x64xf32> -> vector<99x64xf32>
    %28 = vector.broadcast %1 : vector<1x64xf32> to vector<99x64xf32>
    %29 = arith.addf %27, %28 : vector<99x64xf32>
    %cst_15 = arith.constant dense<0.000000e+00> : vector<64xf32>
    %30 = vector.multi_reduction <add>, %29, %cst_15 [0] : vector<99x64xf32> to vector<64xf32>
    %31 = vector.shape_cast %30 : vector<64xf32> to vector<1x64xf32>
    %32 = arith.addf %5, %31 : vector<1x64xf32>
    %33 = arith.mulf %29, %29 : vector<99x64xf32>
    %cst_16 = arith.constant dense<0.000000e+00> : vector<64xf32>
    %34 = vector.multi_reduction <add>, %33, %cst_16 [0] : vector<99x64xf32> to vector<64xf32>
    %35 = vector.shape_cast %34 : vector<64xf32> to vector<1x64xf32>
    %36 = arith.addf %6, %35 : vector<1x64xf32>
    %37 = arith.truncf %29 : vector<99x64xf32> to vector<99x64xbf16>
    %c0_17 = arith.constant 0 : index
    %c0_18 = arith.constant 0 : index
    %c0_19 = arith.constant 0 : index
    %38 = vector.load %arg6[%c0_17, %c0_18, %c0_19] : memref<2x99x64xbf16, #tpu.memory_space<vmem>>, vector<1x99x64xbf16>
    %39 = vector.shape_cast %38 : vector<1x99x64xbf16> to vector<99x64xbf16>
    %40 = vector.shape_cast %37 : vector<99x64xbf16> to vector<1x99x64xbf16>
    tpu.vector_store %arg6[%c0_17, %c0_18, %c0_19], %40 {strides = array<i32>} : memref<2x99x64xbf16, #tpu.memory_space<vmem>>, vector<1x99x64xbf16>,
    %c1 = arith.constant 1 : index
    %c0_20 = arith.constant 0 : index
    %c0_21 = arith.constant 0 : index
    %41 = vector.load %arg1[%c1, %c0_20, %c0_21] : memref<2x99x32xbf16, #tpu.memory_space<vmem>>, vector<1x99x32xbf16>
    %42 = vector.shape_cast %41 : vector<1x99x32xbf16> to vector<99x32xbf16>
    %43 = arith.extf %42 : vector<99x32xbf16> to vector<99x32xf32>
    %44 = vector.broadcast %2 : vector<1x32xf32> to vector<99x32xf32>
    %45 = arith.mulf %43, %44 : vector<99x32xf32>
    %46 = vector.broadcast %3 : vector<1x32xf32> to vector<99x32xf32>
    %47 = arith.addf %45, %46 : vector<99x32xf32>
    %cst_22 = arith.constant 0.000000e+00 : f32
    %48 = vector.broadcast %cst_22 : f32 to vector<99x32xf32>
    %49 = arith.cmpf ogt, %47, %48 : vector<99x32xf32>
    %cst_23 = arith.constant 0.00999999977 : f32
    %50 = vector.broadcast %cst_23 : f32 to vector<99x32xf32>
    %51 = arith.mulf %50, %47 : vector<99x32xf32>
    %52 = arith.select %49, %47, %51 : vector<99x32xi1>, vector<99x32xf32>
    %53 = arith.truncf %52 : vector<99x32xf32> to vector<99x32xbf16>
    %54 = tpu.concatenate %4, %53, %4 in 0 : vector<2x32xbf16>, vector<99x32xbf16>, vector<2x32xbf16> -> vector<103x32xbf16>
    %55 = vector.extract_strided_slice %54 {offsets = [0, 0], sizes = [99, 32], strides = [1, 1]} : vector<103x32xbf16> to vector<99x32xbf16>
    %56 = vector.extract_strided_slice %54 {offsets = [1, 0], sizes = [99, 32], strides = [1, 1]} : vector<103x32xbf16> to vector<99x32xbf16>
    %57 = vector.extract_strided_slice %54 {offsets = [2, 0], sizes = [99, 32], strides = [1, 1]} : vector<103x32xbf16> to vector<99x32xbf16>
    %58 = vector.extract_strided_slice %54 {offsets = [3, 0], sizes = [99, 32], strides = [1, 1]} : vector<103x32xbf16> to vector<99x32xbf16>
    %59 = vector.extract_strided_slice %54 {offsets = [4, 0], sizes = [99, 32], strides = [1, 1]} : vector<103x32xbf16> to vector<99x32xbf16>
    %60 = tpu.concatenate %55, %56, %57, %58, %59 in 1 : vector<99x32xbf16>, vector<99x32xbf16>, vector<99x32xbf16>, vector<99x32xbf16>, vector<99x32xbf16> -> vector<99x160xbf16>
    %cst_24 = arith.constant dense<0.000000e+00> : vector<99x64xf32>
    %61 = tpu.matmul %60, %0, %cst_24 {dimension_numbers = #tpu.dot_dimension_numbers<[1], [0], [0], [1], [0, 0, 1, 1], [], []>} : vector<99x160xbf16>, vector<160x64xbf16>, vector<99x64xf32> -> vector<99x64xf32>
    %62 = vector.broadcast %1 : vector<1x64xf32> to vector<99x64xf32>
    %63 = arith.addf %61, %62 : vector<99x64xf32>
    %cst_25 = arith.constant dense<0.000000e+00> : vector<64xf32>
    %64 = vector.multi_reduction <add>, %63, %cst_25 [0] : vector<99x64xf32> to vector<64xf32>
    %65 = vector.shape_cast %64 : vector<64xf32> to vector<1x64xf32>
    %66 = arith.addf %32, %65 : vector<1x64xf32>
    %67 = arith.mulf %63, %63 : vector<99x64xf32>
    %cst_26 = arith.constant dense<0.000000e+00> : vector<64xf32>
    %68 = vector.multi_reduction <add>, %67, %cst_26 [0] : vector<99x64xf32> to vector<64xf32>
    %69 = vector.shape_cast %68 : vector<64xf32> to vector<1x64xf32>
    %70 = arith.addf %36, %69 : vector<1x64xf32>
    %71 = arith.truncf %63 : vector<99x64xf32> to vector<99x64xbf16>
    %c1_27 = arith.constant 1 : index
    %c0_28 = arith.constant 0 : index
    %c0_29 = arith.constant 0 : index
    %72 = vector.load %arg6[%c1_27, %c0_28, %c0_29] : memref<2x99x64xbf16, #tpu.memory_space<vmem>>, vector<1x99x64xbf16>
    %73 = vector.shape_cast %72 : vector<1x99x64xbf16> to vector<99x64xbf16>
    %74 = vector.shape_cast %71 : vector<99x64xbf16> to vector<1x99x64xbf16>
    tpu.vector_store %arg6[%c1_27, %c0_28, %c0_29], %74 {strides = array<i32>} : memref<2x99x64xbf16, #tpu.memory_space<vmem>>, vector<1x99x64xbf16>,
    %75 = tpu.concatenate %66, %70 in 0 : vector<1x64xf32>, vector<1x64xf32> -> vector<2x64xf32>
    %76 = vector.shape_cast %75 : vector<2x64xf32> to vector<1x2x64xf32>
    %c0_30 = arith.constant 0 : index
    %c0_31 = arith.constant 0 : index
    %c0_32 = arith.constant 0 : index
    %77 = vector.load %arg7[%c0_30, %c0_31, %c0_32] : memref<1x2x64xf32, #tpu.memory_space<vmem>>, vector<1x2x64xf32>
    tpu.vector_store %arg7[%c0_30, %c0_31, %c0_32], %76 {strides = array<i32>} : memref<1x2x64xf32, #tpu.memory_space<vmem>>, vector<1x2x64xf32>,
    return
  }
  func.func @transform_0(%arg0: i32) -> (i32, i32, i32) {
    %c0_i32 = arith.constant 0 : i32
    %c0_i32_0 = arith.constant 0 : i32
    %c0_i32_1 = arith.constant 0 : i32
    return %arg0, %c0_i32, %c0_i32_0 : i32, i32, i32
  }
  func.func @transform_1(%arg0: i32) -> (i32, i32) {
    %c0_i32 = arith.constant 0 : i32
    %c0_i32_0 = arith.constant 0 : i32
    %c0_i32_1 = arith.constant 0 : i32
    return %c0_i32, %c0_i32_0 : i32, i32
  }
  func.func @transform_2(%arg0: i32) -> (i32, i32) {
    %c0_i32 = arith.constant 0 : i32
    %c0_i32_0 = arith.constant 0 : i32
    %c0_i32_1 = arith.constant 0 : i32
    return %c0_i32, %c0_i32_0 : i32, i32
  }
  func.func @transform_3(%arg0: i32) -> (i32, i32) {
    %c0_i32 = arith.constant 0 : i32
    %c0_i32_0 = arith.constant 0 : i32
    %c0_i32_1 = arith.constant 0 : i32
    return %c0_i32, %c0_i32_0 : i32, i32
  }
  func.func @transform_4(%arg0: i32) -> (i32, i32) {
    %c0_i32 = arith.constant 0 : i32
    %c0_i32_0 = arith.constant 0 : i32
    %c0_i32_1 = arith.constant 0 : i32
    return %c0_i32, %c0_i32_0 : i32, i32
  }
  func.func @transform_5(%arg0: i32) -> (i32, i32, i32) {
    %c0_i32 = arith.constant 0 : i32
    %c0_i32_0 = arith.constant 0 : i32
    %c0_i32_1 = arith.constant 0 : i32
    return %arg0, %c0_i32, %c0_i32_0 : i32, i32, i32
  }
  func.func @transform_6(%arg0: i32) -> (i32, i32, i32) {
    %c0_i32 = arith.constant 0 : i32
    %c0_i32_0 = arith.constant 0 : i32
    %c0_i32_1 = arith.constant 0 : i32
    return %arg0, %c0_i32, %c0_i32_0 : i32, i32, i32
  }
}

module attributes {stable_mosaic.version = 11 : i64} {
  func.func @kernel(%arg0: i32, %arg1: memref<2x99x1xf32, #tpu.memory_space<vmem>>, %arg2: memref<7x32xf32, #tpu.memory_space<vmem>>, %arg3: memref<1x32xf32, #tpu.memory_space<vmem>>, %arg4: memref<2x99x32xbf16, #tpu.memory_space<vmem>>, %arg5: memref<1x2x32xf32, #tpu.memory_space<vmem>>) attributes {dimension_semantics = [#tpu.dimension_semantics<parallel>], iteration_bounds = array<i64: 4>, scalar_prefetch = 0 : i64, scratch_operands = 0 : i64, tpu.core_type = #tpu.core_type<tc>, window_params = [{transform_indices = @transform_0, window_bounds = array<i64: 2, 99, 1>}, {pipeline_mode = #tpu.pipeline_mode<synchronous>, transform_indices = @transform_1, window_bounds = array<i64: 7, 32>}, {pipeline_mode = #tpu.pipeline_mode<synchronous>, transform_indices = @transform_2, window_bounds = array<i64: 1, 32>}, {transform_indices = @transform_3, window_bounds = array<i64: 2, 99, 32>}, {transform_indices = @transform_4, window_bounds = array<i64: 1, 2, 32>}]} {
    %c0 = arith.constant 0 : index
    %c0_0 = arith.constant 0 : index
    %0 = vector.load %arg2[%c0, %c0_0] : memref<7x32xf32, #tpu.memory_space<vmem>>, vector<7x32xf32>
    %c0_1 = arith.constant 0 : index
    %c0_2 = arith.constant 0 : index
    %1 = vector.load %arg3[%c0_1, %c0_2] : memref<1x32xf32, #tpu.memory_space<vmem>>, vector<1x32xf32>
    %cst = arith.constant 0.000000e+00 : f32
    %2 = vector.broadcast %cst : f32 to vector<1x32xf32>
    %cst_3 = arith.constant 0.000000e+00 : f32
    %3 = vector.broadcast %cst_3 : f32 to vector<1x32xf32>
    %c0_4 = arith.constant 0 : index
    %c0_5 = arith.constant 0 : index
    %c0_6 = arith.constant 0 : index
    %4 = vector.load %arg1[%c0_4, %c0_5, %c0_6] : memref<2x99x1xf32, #tpu.memory_space<vmem>>, vector<1x99x1xf32>
    %5 = vector.shape_cast %4 : vector<1x99x1xf32> to vector<99x1xf32>
    %cst_7 = arith.constant 0.000000e+00 : f32
    %6 = vector.broadcast %cst_7 : f32 to vector<3x1xf32>
    %cst_8 = arith.constant 0.000000e+00 : f32
    %7 = vector.broadcast %cst_8 : f32 to vector<3x1xf32>
    %8 = tpu.concatenate %6, %5, %7 in 0 : vector<3x1xf32>, vector<99x1xf32>, vector<3x1xf32> -> vector<105x1xf32>
    %cst_9 = arith.constant 0.000000e+00 : f32
    %9 = vector.broadcast %cst_9 : f32 to vector<99x32xf32>
    %10 = vector.extract_strided_slice %8 {offsets = [0, 0], sizes = [99, 1], strides = [1, 1]} : vector<105x1xf32> to vector<99x1xf32>
    %11 = vector.extract_strided_slice %0 {offsets = [0, 0], sizes = [1, 32], strides = [1, 1]} : vector<7x32xf32> to vector<1x32xf32>
    %12 = vector.broadcast %10 : vector<99x1xf32> to vector<99x32xf32>
    %13 = vector.broadcast %11 : vector<1x32xf32> to vector<99x32xf32>
    %14 = arith.mulf %12, %13 : vector<99x32xf32>
    %15 = arith.addf %9, %14 : vector<99x32xf32>
    %16 = vector.extract_strided_slice %8 {offsets = [1, 0], sizes = [99, 1], strides = [1, 1]} : vector<105x1xf32> to vector<99x1xf32>
    %17 = vector.extract_strided_slice %0 {offsets = [1, 0], sizes = [1, 32], strides = [1, 1]} : vector<7x32xf32> to vector<1x32xf32>
    %18 = vector.broadcast %16 : vector<99x1xf32> to vector<99x32xf32>
    %19 = vector.broadcast %17 : vector<1x32xf32> to vector<99x32xf32>
    %20 = arith.mulf %18, %19 : vector<99x32xf32>
    %21 = arith.addf %15, %20 : vector<99x32xf32>
    %22 = vector.extract_strided_slice %8 {offsets = [2, 0], sizes = [99, 1], strides = [1, 1]} : vector<105x1xf32> to vector<99x1xf32>
    %23 = vector.extract_strided_slice %0 {offsets = [2, 0], sizes = [1, 32], strides = [1, 1]} : vector<7x32xf32> to vector<1x32xf32>
    %24 = vector.broadcast %22 : vector<99x1xf32> to vector<99x32xf32>
    %25 = vector.broadcast %23 : vector<1x32xf32> to vector<99x32xf32>
    %26 = arith.mulf %24, %25 : vector<99x32xf32>
    %27 = arith.addf %21, %26 : vector<99x32xf32>
    %28 = vector.extract_strided_slice %8 {offsets = [3, 0], sizes = [99, 1], strides = [1, 1]} : vector<105x1xf32> to vector<99x1xf32>
    %29 = vector.extract_strided_slice %0 {offsets = [3, 0], sizes = [1, 32], strides = [1, 1]} : vector<7x32xf32> to vector<1x32xf32>
    %30 = vector.broadcast %28 : vector<99x1xf32> to vector<99x32xf32>
    %31 = vector.broadcast %29 : vector<1x32xf32> to vector<99x32xf32>
    %32 = arith.mulf %30, %31 : vector<99x32xf32>
    %33 = arith.addf %27, %32 : vector<99x32xf32>
    %34 = vector.extract_strided_slice %8 {offsets = [4, 0], sizes = [99, 1], strides = [1, 1]} : vector<105x1xf32> to vector<99x1xf32>
    %35 = vector.extract_strided_slice %0 {offsets = [4, 0], sizes = [1, 32], strides = [1, 1]} : vector<7x32xf32> to vector<1x32xf32>
    %36 = vector.broadcast %34 : vector<99x1xf32> to vector<99x32xf32>
    %37 = vector.broadcast %35 : vector<1x32xf32> to vector<99x32xf32>
    %38 = arith.mulf %36, %37 : vector<99x32xf32>
    %39 = arith.addf %33, %38 : vector<99x32xf32>
    %40 = vector.extract_strided_slice %8 {offsets = [5, 0], sizes = [99, 1], strides = [1, 1]} : vector<105x1xf32> to vector<99x1xf32>
    %41 = vector.extract_strided_slice %0 {offsets = [5, 0], sizes = [1, 32], strides = [1, 1]} : vector<7x32xf32> to vector<1x32xf32>
    %42 = vector.broadcast %40 : vector<99x1xf32> to vector<99x32xf32>
    %43 = vector.broadcast %41 : vector<1x32xf32> to vector<99x32xf32>
    %44 = arith.mulf %42, %43 : vector<99x32xf32>
    %45 = arith.addf %39, %44 : vector<99x32xf32>
    %46 = vector.extract_strided_slice %8 {offsets = [6, 0], sizes = [99, 1], strides = [1, 1]} : vector<105x1xf32> to vector<99x1xf32>
    %47 = vector.extract_strided_slice %0 {offsets = [6, 0], sizes = [1, 32], strides = [1, 1]} : vector<7x32xf32> to vector<1x32xf32>
    %48 = vector.broadcast %46 : vector<99x1xf32> to vector<99x32xf32>
    %49 = vector.broadcast %47 : vector<1x32xf32> to vector<99x32xf32>
    %50 = arith.mulf %48, %49 : vector<99x32xf32>
    %51 = arith.addf %45, %50 : vector<99x32xf32>
    %52 = vector.broadcast %1 : vector<1x32xf32> to vector<99x32xf32>
    %53 = arith.addf %51, %52 : vector<99x32xf32>
    %cst_10 = arith.constant dense<0.000000e+00> : vector<32xf32>
    %54 = vector.multi_reduction <add>, %53, %cst_10 [0] : vector<99x32xf32> to vector<32xf32>
    %55 = vector.shape_cast %54 : vector<32xf32> to vector<1x32xf32>
    %56 = arith.addf %2, %55 : vector<1x32xf32>
    %57 = arith.mulf %53, %53 : vector<99x32xf32>
    %cst_11 = arith.constant dense<0.000000e+00> : vector<32xf32>
    %58 = vector.multi_reduction <add>, %57, %cst_11 [0] : vector<99x32xf32> to vector<32xf32>
    %59 = vector.shape_cast %58 : vector<32xf32> to vector<1x32xf32>
    %60 = arith.addf %3, %59 : vector<1x32xf32>
    %61 = arith.truncf %53 : vector<99x32xf32> to vector<99x32xbf16>
    %c0_12 = arith.constant 0 : index
    %c0_13 = arith.constant 0 : index
    %c0_14 = arith.constant 0 : index
    %62 = vector.load %arg4[%c0_12, %c0_13, %c0_14] : memref<2x99x32xbf16, #tpu.memory_space<vmem>>, vector<1x99x32xbf16>
    %63 = vector.shape_cast %62 : vector<1x99x32xbf16> to vector<99x32xbf16>
    %64 = vector.shape_cast %61 : vector<99x32xbf16> to vector<1x99x32xbf16>
    tpu.vector_store %arg4[%c0_12, %c0_13, %c0_14], %64 {strides = array<i32>} : memref<2x99x32xbf16, #tpu.memory_space<vmem>>, vector<1x99x32xbf16>,
    %c1 = arith.constant 1 : index
    %c0_15 = arith.constant 0 : index
    %c0_16 = arith.constant 0 : index
    %65 = vector.load %arg1[%c1, %c0_15, %c0_16] : memref<2x99x1xf32, #tpu.memory_space<vmem>>, vector<1x99x1xf32>
    %66 = vector.shape_cast %65 : vector<1x99x1xf32> to vector<99x1xf32>
    %cst_17 = arith.constant 0.000000e+00 : f32
    %67 = vector.broadcast %cst_17 : f32 to vector<3x1xf32>
    %cst_18 = arith.constant 0.000000e+00 : f32
    %68 = vector.broadcast %cst_18 : f32 to vector<3x1xf32>
    %69 = tpu.concatenate %67, %66, %68 in 0 : vector<3x1xf32>, vector<99x1xf32>, vector<3x1xf32> -> vector<105x1xf32>
    %cst_19 = arith.constant 0.000000e+00 : f32
    %70 = vector.broadcast %cst_19 : f32 to vector<99x32xf32>
    %71 = vector.extract_strided_slice %69 {offsets = [0, 0], sizes = [99, 1], strides = [1, 1]} : vector<105x1xf32> to vector<99x1xf32>
    %72 = vector.extract_strided_slice %0 {offsets = [0, 0], sizes = [1, 32], strides = [1, 1]} : vector<7x32xf32> to vector<1x32xf32>
    %73 = vector.broadcast %71 : vector<99x1xf32> to vector<99x32xf32>
    %74 = vector.broadcast %72 : vector<1x32xf32> to vector<99x32xf32>
    %75 = arith.mulf %73, %74 : vector<99x32xf32>
    %76 = arith.addf %70, %75 : vector<99x32xf32>
    %77 = vector.extract_strided_slice %69 {offsets = [1, 0], sizes = [99, 1], strides = [1, 1]} : vector<105x1xf32> to vector<99x1xf32>
    %78 = vector.extract_strided_slice %0 {offsets = [1, 0], sizes = [1, 32], strides = [1, 1]} : vector<7x32xf32> to vector<1x32xf32>
    %79 = vector.broadcast %77 : vector<99x1xf32> to vector<99x32xf32>
    %80 = vector.broadcast %78 : vector<1x32xf32> to vector<99x32xf32>
    %81 = arith.mulf %79, %80 : vector<99x32xf32>
    %82 = arith.addf %76, %81 : vector<99x32xf32>
    %83 = vector.extract_strided_slice %69 {offsets = [2, 0], sizes = [99, 1], strides = [1, 1]} : vector<105x1xf32> to vector<99x1xf32>
    %84 = vector.extract_strided_slice %0 {offsets = [2, 0], sizes = [1, 32], strides = [1, 1]} : vector<7x32xf32> to vector<1x32xf32>
    %85 = vector.broadcast %83 : vector<99x1xf32> to vector<99x32xf32>
    %86 = vector.broadcast %84 : vector<1x32xf32> to vector<99x32xf32>
    %87 = arith.mulf %85, %86 : vector<99x32xf32>
    %88 = arith.addf %82, %87 : vector<99x32xf32>
    %89 = vector.extract_strided_slice %69 {offsets = [3, 0], sizes = [99, 1], strides = [1, 1]} : vector<105x1xf32> to vector<99x1xf32>
    %90 = vector.extract_strided_slice %0 {offsets = [3, 0], sizes = [1, 32], strides = [1, 1]} : vector<7x32xf32> to vector<1x32xf32>
    %91 = vector.broadcast %89 : vector<99x1xf32> to vector<99x32xf32>
    %92 = vector.broadcast %90 : vector<1x32xf32> to vector<99x32xf32>
    %93 = arith.mulf %91, %92 : vector<99x32xf32>
    %94 = arith.addf %88, %93 : vector<99x32xf32>
    %95 = vector.extract_strided_slice %69 {offsets = [4, 0], sizes = [99, 1], strides = [1, 1]} : vector<105x1xf32> to vector<99x1xf32>
    %96 = vector.extract_strided_slice %0 {offsets = [4, 0], sizes = [1, 32], strides = [1, 1]} : vector<7x32xf32> to vector<1x32xf32>
    %97 = vector.broadcast %95 : vector<99x1xf32> to vector<99x32xf32>
    %98 = vector.broadcast %96 : vector<1x32xf32> to vector<99x32xf32>
    %99 = arith.mulf %97, %98 : vector<99x32xf32>
    %100 = arith.addf %94, %99 : vector<99x32xf32>
    %101 = vector.extract_strided_slice %69 {offsets = [5, 0], sizes = [99, 1], strides = [1, 1]} : vector<105x1xf32> to vector<99x1xf32>
    %102 = vector.extract_strided_slice %0 {offsets = [5, 0], sizes = [1, 32], strides = [1, 1]} : vector<7x32xf32> to vector<1x32xf32>
    %103 = vector.broadcast %101 : vector<99x1xf32> to vector<99x32xf32>
    %104 = vector.broadcast %102 : vector<1x32xf32> to vector<99x32xf32>
    %105 = arith.mulf %103, %104 : vector<99x32xf32>
    %106 = arith.addf %100, %105 : vector<99x32xf32>
    %107 = vector.extract_strided_slice %69 {offsets = [6, 0], sizes = [99, 1], strides = [1, 1]} : vector<105x1xf32> to vector<99x1xf32>
    %108 = vector.extract_strided_slice %0 {offsets = [6, 0], sizes = [1, 32], strides = [1, 1]} : vector<7x32xf32> to vector<1x32xf32>
    %109 = vector.broadcast %107 : vector<99x1xf32> to vector<99x32xf32>
    %110 = vector.broadcast %108 : vector<1x32xf32> to vector<99x32xf32>
    %111 = arith.mulf %109, %110 : vector<99x32xf32>
    %112 = arith.addf %106, %111 : vector<99x32xf32>
    %113 = vector.broadcast %1 : vector<1x32xf32> to vector<99x32xf32>
    %114 = arith.addf %112, %113 : vector<99x32xf32>
    %cst_20 = arith.constant dense<0.000000e+00> : vector<32xf32>
    %115 = vector.multi_reduction <add>, %114, %cst_20 [0] : vector<99x32xf32> to vector<32xf32>
    %116 = vector.shape_cast %115 : vector<32xf32> to vector<1x32xf32>
    %117 = arith.addf %56, %116 : vector<1x32xf32>
    %118 = arith.mulf %114, %114 : vector<99x32xf32>
    %cst_21 = arith.constant dense<0.000000e+00> : vector<32xf32>
    %119 = vector.multi_reduction <add>, %118, %cst_21 [0] : vector<99x32xf32> to vector<32xf32>
    %120 = vector.shape_cast %119 : vector<32xf32> to vector<1x32xf32>
    %121 = arith.addf %60, %120 : vector<1x32xf32>
    %122 = arith.truncf %114 : vector<99x32xf32> to vector<99x32xbf16>
    %c1_22 = arith.constant 1 : index
    %c0_23 = arith.constant 0 : index
    %c0_24 = arith.constant 0 : index
    %123 = vector.load %arg4[%c1_22, %c0_23, %c0_24] : memref<2x99x32xbf16, #tpu.memory_space<vmem>>, vector<1x99x32xbf16>
    %124 = vector.shape_cast %123 : vector<1x99x32xbf16> to vector<99x32xbf16>
    %125 = vector.shape_cast %122 : vector<99x32xbf16> to vector<1x99x32xbf16>
    tpu.vector_store %arg4[%c1_22, %c0_23, %c0_24], %125 {strides = array<i32>} : memref<2x99x32xbf16, #tpu.memory_space<vmem>>, vector<1x99x32xbf16>,
    %126 = tpu.concatenate %117, %121 in 0 : vector<1x32xf32>, vector<1x32xf32> -> vector<2x32xf32>
    %127 = vector.shape_cast %126 : vector<2x32xf32> to vector<1x2x32xf32>
    %c0_25 = arith.constant 0 : index
    %c0_26 = arith.constant 0 : index
    %c0_27 = arith.constant 0 : index
    %128 = vector.load %arg5[%c0_25, %c0_26, %c0_27] : memref<1x2x32xf32, #tpu.memory_space<vmem>>, vector<1x2x32xf32>
    tpu.vector_store %arg5[%c0_25, %c0_26, %c0_27], %127 {strides = array<i32>} : memref<1x2x32xf32, #tpu.memory_space<vmem>>, vector<1x2x32xf32>,
    return
  }
  func.func @transform_0(%arg0: i32) -> (i32, i32, i32) {
    %c0_i32 = arith.constant 0 : i32
    %c0_i32_0 = arith.constant 0 : i32
    %c0_i32_1 = arith.constant 0 : i32
    return %arg0, %c0_i32, %c0_i32_0 : i32, i32, i32
  }
  func.func @transform_1(%arg0: i32) -> (i32, i32) {
    %c0_i32 = arith.constant 0 : i32
    %c0_i32_0 = arith.constant 0 : i32
    %c0_i32_1 = arith.constant 0 : i32
    return %c0_i32, %c0_i32_0 : i32, i32
  }
  func.func @transform_2(%arg0: i32) -> (i32, i32) {
    %c0_i32 = arith.constant 0 : i32
    %c0_i32_0 = arith.constant 0 : i32
    %c0_i32_1 = arith.constant 0 : i32
    return %c0_i32, %c0_i32_0 : i32, i32
  }
  func.func @transform_3(%arg0: i32) -> (i32, i32, i32) {
    %c0_i32 = arith.constant 0 : i32
    %c0_i32_0 = arith.constant 0 : i32
    %c0_i32_1 = arith.constant 0 : i32
    return %arg0, %c0_i32, %c0_i32_0 : i32, i32, i32
  }
  func.func @transform_4(%arg0: i32) -> (i32, i32, i32) {
    %c0_i32 = arith.constant 0 : i32
    %c0_i32_0 = arith.constant 0 : i32
    %c0_i32_1 = arith.constant 0 : i32
    return %arg0, %c0_i32, %c0_i32_0 : i32, i32, i32
  }
}

module attributes {stable_mosaic.version = 11 : i64} {
  func.func @kernel(%arg0: i32, %arg1: memref<2x99x64xbf16, #tpu.memory_space<vmem>>, %arg2: memref<192x128xbf16, #tpu.memory_space<vmem>>, %arg3: memref<1x128xf32, #tpu.memory_space<vmem>>, %arg4: memref<1x64xf32, #tpu.memory_space<vmem>>, %arg5: memref<1x64xf32, #tpu.memory_space<vmem>>, %arg6: memref<2x99x128xbf16, #tpu.memory_space<vmem>>, %arg7: memref<1x2x128xf32, #tpu.memory_space<vmem>>) attributes {dimension_semantics = [#tpu.dimension_semantics<parallel>], iteration_bounds = array<i64: 4>, scalar_prefetch = 0 : i64, scratch_operands = 0 : i64, tpu.core_type = #tpu.core_type<tc>, window_params = [{transform_indices = @transform_0, window_bounds = array<i64: 2, 99, 64>}, {pipeline_mode = #tpu.pipeline_mode<synchronous>, transform_indices = @transform_1, window_bounds = array<i64: 192, 128>}, {pipeline_mode = #tpu.pipeline_mode<synchronous>, transform_indices = @transform_2, window_bounds = array<i64: 1, 128>}, {pipeline_mode = #tpu.pipeline_mode<synchronous>, transform_indices = @transform_3, window_bounds = array<i64: 1, 64>}, {pipeline_mode = #tpu.pipeline_mode<synchronous>, transform_indices = @transform_4, window_bounds = array<i64: 1, 64>}, {transform_indices = @transform_5, window_bounds = array<i64: 2, 99, 128>}, {transform_indices = @transform_6, window_bounds = array<i64: 1, 2, 128>}]} {
    %c0 = arith.constant 0 : index
    %c0_0 = arith.constant 0 : index
    %0 = vector.load %arg2[%c0, %c0_0] : memref<192x128xbf16, #tpu.memory_space<vmem>>, vector<192x128xbf16>
    %c0_1 = arith.constant 0 : index
    %c0_2 = arith.constant 0 : index
    %1 = vector.load %arg3[%c0_1, %c0_2] : memref<1x128xf32, #tpu.memory_space<vmem>>, vector<1x128xf32>
    %c0_3 = arith.constant 0 : index
    %c0_4 = arith.constant 0 : index
    %2 = vector.load %arg4[%c0_3, %c0_4] : memref<1x64xf32, #tpu.memory_space<vmem>>, vector<1x64xf32>
    %c0_5 = arith.constant 0 : index
    %c0_6 = arith.constant 0 : index
    %3 = vector.load %arg5[%c0_5, %c0_6] : memref<1x64xf32, #tpu.memory_space<vmem>>, vector<1x64xf32>
    %cst = arith.constant 0.000000e+00 : bf16
    %4 = vector.broadcast %cst : bf16 to vector<1x64xbf16>
    %cst_7 = arith.constant 0.000000e+00 : f32
    %5 = vector.broadcast %cst_7 : f32 to vector<1x128xf32>
    %cst_8 = arith.constant 0.000000e+00 : f32
    %6 = vector.broadcast %cst_8 : f32 to vector<1x128xf32>
    %c0_9 = arith.constant 0 : index
    %c0_10 = arith.constant 0 : index
    %c0_11 = arith.constant 0 : index
    %7 = vector.load %arg1[%c0_9, %c0_10, %c0_11] : memref<2x99x64xbf16, #tpu.memory_space<vmem>>, vector<1x99x64xbf16>
    %8 = vector.shape_cast %7 : vector<1x99x64xbf16> to vector<99x64xbf16>
    %9 = arith.extf %8 : vector<99x64xbf16> to vector<99x64xf32>
    %10 = vector.broadcast %2 : vector<1x64xf32> to vector<99x64xf32>
    %11 = arith.mulf %9, %10 : vector<99x64xf32>
    %12 = vector.broadcast %3 : vector<1x64xf32> to vector<99x64xf32>
    %13 = arith.addf %11, %12 : vector<99x64xf32>
    %cst_12 = arith.constant 0.000000e+00 : f32
    %14 = vector.broadcast %cst_12 : f32 to vector<99x64xf32>
    %15 = arith.cmpf ogt, %13, %14 : vector<99x64xf32>
    %cst_13 = arith.constant 0.00999999977 : f32
    %16 = vector.broadcast %cst_13 : f32 to vector<99x64xf32>
    %17 = arith.mulf %16, %13 : vector<99x64xf32>
    %18 = arith.select %15, %13, %17 : vector<99x64xi1>, vector<99x64xf32>
    %19 = arith.truncf %18 : vector<99x64xf32> to vector<99x64xbf16>
    %20 = tpu.concatenate %4, %19, %4 in 0 : vector<1x64xbf16>, vector<99x64xbf16>, vector<1x64xbf16> -> vector<101x64xbf16>
    %21 = vector.extract_strided_slice %20 {offsets = [0, 0], sizes = [99, 64], strides = [1, 1]} : vector<101x64xbf16> to vector<99x64xbf16>
    %22 = vector.extract_strided_slice %20 {offsets = [1, 0], sizes = [99, 64], strides = [1, 1]} : vector<101x64xbf16> to vector<99x64xbf16>
    %23 = vector.extract_strided_slice %20 {offsets = [2, 0], sizes = [99, 64], strides = [1, 1]} : vector<101x64xbf16> to vector<99x64xbf16>
    %24 = tpu.concatenate %21, %22, %23 in 1 : vector<99x64xbf16>, vector<99x64xbf16>, vector<99x64xbf16> -> vector<99x192xbf16>
    %cst_14 = arith.constant dense<0.000000e+00> : vector<99x128xf32>
    %25 = tpu.matmul %24, %0, %cst_14 {dimension_numbers = #tpu.dot_dimension_numbers<[1], [0], [0], [1], [0, 0, 1, 1], [], []>} : vector<99x192xbf16>, vector<192x128xbf16>, vector<99x128xf32> -> vector<99x128xf32>
    %26 = vector.broadcast %1 : vector<1x128xf32> to vector<99x128xf32>
    %27 = arith.addf %25, %26 : vector<99x128xf32>
    %cst_15 = arith.constant dense<0.000000e+00> : vector<128xf32>
    %28 = vector.multi_reduction <add>, %27, %cst_15 [0] : vector<99x128xf32> to vector<128xf32>
    %29 = vector.shape_cast %28 : vector<128xf32> to vector<1x128xf32>
    %30 = arith.addf %5, %29 : vector<1x128xf32>
    %31 = arith.mulf %27, %27 : vector<99x128xf32>
    %cst_16 = arith.constant dense<0.000000e+00> : vector<128xf32>
    %32 = vector.multi_reduction <add>, %31, %cst_16 [0] : vector<99x128xf32> to vector<128xf32>
    %33 = vector.shape_cast %32 : vector<128xf32> to vector<1x128xf32>
    %34 = arith.addf %6, %33 : vector<1x128xf32>
    %35 = arith.truncf %27 : vector<99x128xf32> to vector<99x128xbf16>
    %c0_17 = arith.constant 0 : index
    %c0_18 = arith.constant 0 : index
    %c0_19 = arith.constant 0 : index
    %36 = vector.load %arg6[%c0_17, %c0_18, %c0_19] : memref<2x99x128xbf16, #tpu.memory_space<vmem>>, vector<1x99x128xbf16>
    %37 = vector.shape_cast %36 : vector<1x99x128xbf16> to vector<99x128xbf16>
    %38 = vector.shape_cast %35 : vector<99x128xbf16> to vector<1x99x128xbf16>
    tpu.vector_store %arg6[%c0_17, %c0_18, %c0_19], %38 {strides = array<i32>} : memref<2x99x128xbf16, #tpu.memory_space<vmem>>, vector<1x99x128xbf16>,
    %c1 = arith.constant 1 : index
    %c0_20 = arith.constant 0 : index
    %c0_21 = arith.constant 0 : index
    %39 = vector.load %arg1[%c1, %c0_20, %c0_21] : memref<2x99x64xbf16, #tpu.memory_space<vmem>>, vector<1x99x64xbf16>
    %40 = vector.shape_cast %39 : vector<1x99x64xbf16> to vector<99x64xbf16>
    %41 = arith.extf %40 : vector<99x64xbf16> to vector<99x64xf32>
    %42 = vector.broadcast %2 : vector<1x64xf32> to vector<99x64xf32>
    %43 = arith.mulf %41, %42 : vector<99x64xf32>
    %44 = vector.broadcast %3 : vector<1x64xf32> to vector<99x64xf32>
    %45 = arith.addf %43, %44 : vector<99x64xf32>
    %cst_22 = arith.constant 0.000000e+00 : f32
    %46 = vector.broadcast %cst_22 : f32 to vector<99x64xf32>
    %47 = arith.cmpf ogt, %45, %46 : vector<99x64xf32>
    %cst_23 = arith.constant 0.00999999977 : f32
    %48 = vector.broadcast %cst_23 : f32 to vector<99x64xf32>
    %49 = arith.mulf %48, %45 : vector<99x64xf32>
    %50 = arith.select %47, %45, %49 : vector<99x64xi1>, vector<99x64xf32>
    %51 = arith.truncf %50 : vector<99x64xf32> to vector<99x64xbf16>
    %52 = tpu.concatenate %4, %51, %4 in 0 : vector<1x64xbf16>, vector<99x64xbf16>, vector<1x64xbf16> -> vector<101x64xbf16>
    %53 = vector.extract_strided_slice %52 {offsets = [0, 0], sizes = [99, 64], strides = [1, 1]} : vector<101x64xbf16> to vector<99x64xbf16>
    %54 = vector.extract_strided_slice %52 {offsets = [1, 0], sizes = [99, 64], strides = [1, 1]} : vector<101x64xbf16> to vector<99x64xbf16>
    %55 = vector.extract_strided_slice %52 {offsets = [2, 0], sizes = [99, 64], strides = [1, 1]} : vector<101x64xbf16> to vector<99x64xbf16>
    %56 = tpu.concatenate %53, %54, %55 in 1 : vector<99x64xbf16>, vector<99x64xbf16>, vector<99x64xbf16> -> vector<99x192xbf16>
    %cst_24 = arith.constant dense<0.000000e+00> : vector<99x128xf32>
    %57 = tpu.matmul %56, %0, %cst_24 {dimension_numbers = #tpu.dot_dimension_numbers<[1], [0], [0], [1], [0, 0, 1, 1], [], []>} : vector<99x192xbf16>, vector<192x128xbf16>, vector<99x128xf32> -> vector<99x128xf32>
    %58 = vector.broadcast %1 : vector<1x128xf32> to vector<99x128xf32>
    %59 = arith.addf %57, %58 : vector<99x128xf32>
    %cst_25 = arith.constant dense<0.000000e+00> : vector<128xf32>
    %60 = vector.multi_reduction <add>, %59, %cst_25 [0] : vector<99x128xf32> to vector<128xf32>
    %61 = vector.shape_cast %60 : vector<128xf32> to vector<1x128xf32>
    %62 = arith.addf %30, %61 : vector<1x128xf32>
    %63 = arith.mulf %59, %59 : vector<99x128xf32>
    %cst_26 = arith.constant dense<0.000000e+00> : vector<128xf32>
    %64 = vector.multi_reduction <add>, %63, %cst_26 [0] : vector<99x128xf32> to vector<128xf32>
    %65 = vector.shape_cast %64 : vector<128xf32> to vector<1x128xf32>
    %66 = arith.addf %34, %65 : vector<1x128xf32>
    %67 = arith.truncf %59 : vector<99x128xf32> to vector<99x128xbf16>
    %c1_27 = arith.constant 1 : index
    %c0_28 = arith.constant 0 : index
    %c0_29 = arith.constant 0 : index
    %68 = vector.load %arg6[%c1_27, %c0_28, %c0_29] : memref<2x99x128xbf16, #tpu.memory_space<vmem>>, vector<1x99x128xbf16>
    %69 = vector.shape_cast %68 : vector<1x99x128xbf16> to vector<99x128xbf16>
    %70 = vector.shape_cast %67 : vector<99x128xbf16> to vector<1x99x128xbf16>
    tpu.vector_store %arg6[%c1_27, %c0_28, %c0_29], %70 {strides = array<i32>} : memref<2x99x128xbf16, #tpu.memory_space<vmem>>, vector<1x99x128xbf16>,
    %71 = tpu.concatenate %62, %66 in 0 : vector<1x128xf32>, vector<1x128xf32> -> vector<2x128xf32>
    %72 = vector.shape_cast %71 : vector<2x128xf32> to vector<1x2x128xf32>
    %c0_30 = arith.constant 0 : index
    %c0_31 = arith.constant 0 : index
    %c0_32 = arith.constant 0 : index
    %73 = vector.load %arg7[%c0_30, %c0_31, %c0_32] : memref<1x2x128xf32, #tpu.memory_space<vmem>>, vector<1x2x128xf32>
    tpu.vector_store %arg7[%c0_30, %c0_31, %c0_32], %72 {strides = array<i32>} : memref<1x2x128xf32, #tpu.memory_space<vmem>>, vector<1x2x128xf32>,
    return
  }
  func.func @transform_0(%arg0: i32) -> (i32, i32, i32) {
    %c0_i32 = arith.constant 0 : i32
    %c0_i32_0 = arith.constant 0 : i32
    %c0_i32_1 = arith.constant 0 : i32
    return %arg0, %c0_i32, %c0_i32_0 : i32, i32, i32
  }
  func.func @transform_1(%arg0: i32) -> (i32, i32) {
    %c0_i32 = arith.constant 0 : i32
    %c0_i32_0 = arith.constant 0 : i32
    %c0_i32_1 = arith.constant 0 : i32
    return %c0_i32, %c0_i32_0 : i32, i32
  }
  func.func @transform_2(%arg0: i32) -> (i32, i32) {
    %c0_i32 = arith.constant 0 : i32
    %c0_i32_0 = arith.constant 0 : i32
    %c0_i32_1 = arith.constant 0 : i32
    return %c0_i32, %c0_i32_0 : i32, i32
  }
  func.func @transform_3(%arg0: i32) -> (i32, i32) {
    %c0_i32 = arith.constant 0 : i32
    %c0_i32_0 = arith.constant 0 : i32
    %c0_i32_1 = arith.constant 0 : i32
    return %c0_i32, %c0_i32_0 : i32, i32
  }
  func.func @transform_4(%arg0: i32) -> (i32, i32) {
    %c0_i32 = arith.constant 0 : i32
    %c0_i32_0 = arith.constant 0 : i32
    %c0_i32_1 = arith.constant 0 : i32
    return %c0_i32, %c0_i32_0 : i32, i32
  }
  func.func @transform_5(%arg0: i32) -> (i32, i32, i32) {
    %c0_i32 = arith.constant 0 : i32
    %c0_i32_0 = arith.constant 0 : i32
    %c0_i32_1 = arith.constant 0 : i32
    return %arg0, %c0_i32, %c0_i32_0 : i32, i32, i32
  }
  func.func @transform_6(%arg0: i32) -> (i32, i32, i32) {
    %c0_i32 = arith.constant 0 : i32
    %c0_i32_0 = arith.constant 0 : i32
    %c0_i32_1 = arith.constant 0 : i32
    return %arg0, %c0_i32, %c0_i32_0 : i32, i32, i32
  }
}

module attributes {stable_mosaic.version = 11 : i64} {
  func.func @kernel(%arg0: i32, %arg1: memref<2x99x128xbf16, #tpu.memory_space<vmem>>, %arg2: memref<1x128xf32, #tpu.memory_space<vmem>>, %arg3: memref<1x128xf32, #tpu.memory_space<vmem>>, %arg4: memref<2x128x99xf32, #tpu.memory_space<vmem>>) attributes {dimension_semantics = [#tpu.dimension_semantics<parallel>], iteration_bounds = array<i64: 4>, scalar_prefetch = 0 : i64, scratch_operands = 0 : i64, tpu.core_type = #tpu.core_type<tc>, window_params = [{transform_indices = @transform_0, window_bounds = array<i64: 2, 99, 128>}, {pipeline_mode = #tpu.pipeline_mode<synchronous>, transform_indices = @transform_1, window_bounds = array<i64: 1, 128>}, {pipeline_mode = #tpu.pipeline_mode<synchronous>, transform_indices = @transform_2, window_bounds = array<i64: 1, 128>}, {transform_indices = @transform_3, window_bounds = array<i64: 2, 128, 99>}]} {
    %c0 = arith.constant 0 : index
    %c0_0 = arith.constant 0 : index
    %0 = vector.load %arg2[%c0, %c0_0] : memref<1x128xf32, #tpu.memory_space<vmem>>, vector<1x128xf32>
    %c0_1 = arith.constant 0 : index
    %c0_2 = arith.constant 0 : index
    %1 = vector.load %arg3[%c0_1, %c0_2] : memref<1x128xf32, #tpu.memory_space<vmem>>, vector<1x128xf32>
    %c0_3 = arith.constant 0 : index
    %c0_4 = arith.constant 0 : index
    %c0_5 = arith.constant 0 : index
    %2 = vector.load %arg1[%c0_3, %c0_4, %c0_5] : memref<2x99x128xbf16, #tpu.memory_space<vmem>>, vector<1x99x128xbf16>
    %3 = vector.shape_cast %2 : vector<1x99x128xbf16> to vector<99x128xbf16>
    %4 = arith.extf %3 : vector<99x128xbf16> to vector<99x128xf32>
    %5 = vector.broadcast %0 : vector<1x128xf32> to vector<99x128xf32>
    %6 = arith.mulf %4, %5 : vector<99x128xf32>
    %7 = vector.broadcast %1 : vector<1x128xf32> to vector<99x128xf32>
    %8 = arith.addf %6, %7 : vector<99x128xf32>
    %cst = arith.constant 0.000000e+00 : f32
    %9 = vector.broadcast %cst : f32 to vector<99x128xf32>
    %10 = arith.cmpf ogt, %8, %9 : vector<99x128xf32>
    %cst_6 = arith.constant 0.00999999977 : f32
    %11 = vector.broadcast %cst_6 : f32 to vector<99x128xf32>
    %12 = arith.mulf %11, %8 : vector<99x128xf32>
    %13 = arith.select %10, %8, %12 : vector<99x128xi1>, vector<99x128xf32>
    %cst_7 = arith.constant 0.000000e+00 : f32
    %14 = vector.broadcast %cst_7 : f32 to vector<5x128xf32>
    %15 = tpu.concatenate %13, %14 in 0 : vector<99x128xf32>, vector<5x128xf32> -> vector<104x128xf32>
    %16 = tpu.transpose %15, [1, 0] : vector<104x128xf32> -> vector<128x104xf32>
    %17 = vector.extract_strided_slice %16 {offsets = [0, 0], sizes = [128, 99], strides = [1, 1]} : vector<128x104xf32> to vector<128x99xf32>
    %c0_8 = arith.constant 0 : index
    %c0_9 = arith.constant 0 : index
    %c0_10 = arith.constant 0 : index
    %18 = vector.load %arg4[%c0_8, %c0_9, %c0_10] : memref<2x128x99xf32, #tpu.memory_space<vmem>>, vector<1x128x99xf32>
    %19 = vector.shape_cast %18 : vector<1x128x99xf32> to vector<128x99xf32>
    %20 = vector.shape_cast %17 : vector<128x99xf32> to vector<1x128x99xf32>
    tpu.vector_store %arg4[%c0_8, %c0_9, %c0_10], %20 {strides = array<i32>} : memref<2x128x99xf32, #tpu.memory_space<vmem>>, vector<1x128x99xf32>,
    %c1 = arith.constant 1 : index
    %c0_11 = arith.constant 0 : index
    %c0_12 = arith.constant 0 : index
    %21 = vector.load %arg1[%c1, %c0_11, %c0_12] : memref<2x99x128xbf16, #tpu.memory_space<vmem>>, vector<1x99x128xbf16>
    %22 = vector.shape_cast %21 : vector<1x99x128xbf16> to vector<99x128xbf16>
    %23 = arith.extf %22 : vector<99x128xbf16> to vector<99x128xf32>
    %24 = vector.broadcast %0 : vector<1x128xf32> to vector<99x128xf32>
    %25 = arith.mulf %23, %24 : vector<99x128xf32>
    %26 = vector.broadcast %1 : vector<1x128xf32> to vector<99x128xf32>
    %27 = arith.addf %25, %26 : vector<99x128xf32>
    %cst_13 = arith.constant 0.000000e+00 : f32
    %28 = vector.broadcast %cst_13 : f32 to vector<99x128xf32>
    %29 = arith.cmpf ogt, %27, %28 : vector<99x128xf32>
    %cst_14 = arith.constant 0.00999999977 : f32
    %30 = vector.broadcast %cst_14 : f32 to vector<99x128xf32>
    %31 = arith.mulf %30, %27 : vector<99x128xf32>
    %32 = arith.select %29, %27, %31 : vector<99x128xi1>, vector<99x128xf32>
    %cst_15 = arith.constant 0.000000e+00 : f32
    %33 = vector.broadcast %cst_15 : f32 to vector<5x128xf32>
    %34 = tpu.concatenate %32, %33 in 0 : vector<99x128xf32>, vector<5x128xf32> -> vector<104x128xf32>
    %35 = tpu.transpose %34, [1, 0] : vector<104x128xf32> -> vector<128x104xf32>
    %36 = vector.extract_strided_slice %35 {offsets = [0, 0], sizes = [128, 99], strides = [1, 1]} : vector<128x104xf32> to vector<128x99xf32>
    %c1_16 = arith.constant 1 : index
    %c0_17 = arith.constant 0 : index
    %c0_18 = arith.constant 0 : index
    %37 = vector.load %arg4[%c1_16, %c0_17, %c0_18] : memref<2x128x99xf32, #tpu.memory_space<vmem>>, vector<1x128x99xf32>
    %38 = vector.shape_cast %37 : vector<1x128x99xf32> to vector<128x99xf32>
    %39 = vector.shape_cast %36 : vector<128x99xf32> to vector<1x128x99xf32>
    tpu.vector_store %arg4[%c1_16, %c0_17, %c0_18], %39 {strides = array<i32>} : memref<2x128x99xf32, #tpu.memory_space<vmem>>, vector<1x128x99xf32>,
    return
  }
  func.func @transform_0(%arg0: i32) -> (i32, i32, i32) {
    %c0_i32 = arith.constant 0 : i32
    %c0_i32_0 = arith.constant 0 : i32
    %c0_i32_1 = arith.constant 0 : i32
    return %arg0, %c0_i32, %c0_i32_0 : i32, i32, i32
  }
  func.func @transform_1(%arg0: i32) -> (i32, i32) {
    %c0_i32 = arith.constant 0 : i32
    %c0_i32_0 = arith.constant 0 : i32
    %c0_i32_1 = arith.constant 0 : i32
    return %c0_i32, %c0_i32_0 : i32, i32
  }
  func.func @transform_2(%arg0: i32) -> (i32, i32) {
    %c0_i32 = arith.constant 0 : i32
    %c0_i32_0 = arith.constant 0 : i32
    %c0_i32_1 = arith.constant 0 : i32
    return %c0_i32, %c0_i32_0 : i32, i32
  }
  func.func @transform_3(%arg0: i32) -> (i32, i32, i32) {
    %c0_i32 = arith.constant 0 : i32
    %c0_i32_0 = arith.constant 0 : i32
    %c0_i32_1 = arith.constant 0 : i32
    return %arg0, %c0_i32, %c0_i32_0 : i32, i32, i32
  }
}

</mosaic_0001>

<bundles_post_ra>
// kernel: gabor_nn_1d_forward.7
= control target key start
LH: loop header
LB: loop body
LE: loop exit
PB: predicated region body
PF: predicated region fallthrough
CT: control target
= control target key end

     0   :  { %s665_s12 = smov 0   ;;  %s851_s0 = inlined_call_operand.vmem [shape: bf16[8,99,128], index: 0, kind: input, shape index: {}]   ;;  %s852_s1 = inlined_call_operand.vmem [shape: f32[1,128], index: 1, kind: input, shape index: {}]   ;;  %s853_s2 = inlined_call_operand.vmem [shape: f32[1,128], index: 2, kind: input, shape index: {}]   ;;  %s854_s3 = inlined_call_operand.vmem [shape: f32[8,128,99], index: 3, kind: output, shape index: {}]  }
   0x1 LB: > { %s529_s13 = sadd.s32 4294967295, %s643_s12   ;;  %p533_p0 = scmp.ge.s32.totalorder %s643_s12, 1  ;;  %s643_s12 = sphi %s665_s12, %s13_s12  }
   0x2   : > { %p139_p1 = scmp.lt.s32.totalorder %s643_s12, 5 }
   0x4   : > { %p140_p2 = pnand %p533_p0, %p139_p1 }
   0x5   : > { %s534_s14 = sshll.u32 (!%p140_p2), %s529_s13, 1 }
   0x6   : > { %143 = sbr.rel (%p140_p2) target bundleno = 312 (0x138), region = 32  ;;  %p166_p3 = scmp.lt.s32.totalorder (!%p140_p2), %s534_s14, 7 }
   0xb   : > { %s856_s14 = smov (!%p166_p3, %s534_s14), 7  ;;  %v684_v0 = vld [vmem:[%s852_s1] ss:$0 sm:$0xff] }
   0xc   : > { %s625_s15 = smul.u32 52, %s856_s14  ;;  %v692_v5 = vld [vmem:[%s853_s2] ss:$0 sm:$0xff]  ;;  %s570_s23 = sshll.u32 %s856_s14, 7 }
   0xd   : > { %s782_s26 = scalar_lea.vmem %s854_s3, %s570_s23 }
   0xe   : > { %s679_s18 = scalar_lea.vmem %s851_s0, %s625_s15 }
   0xf   : > { %v572_v1 = vld [vmem:[%s679_s18] sm:$0xff]   ;;  %v539_v2 = vld [vmem:[%s679_s18 + $0x34] sm:$0xf]  ;;  %v620_v3 = vld [vmem:[%s679_s18 + $0x38] sm:$0xff]  }
  0x10   : > { %v573_v4 = vunpack.c.l.bf16 %v572_v1  ;;  %v343_v6 = vunpack.c.l.bf16 %v539_v2  ;;  %v574_v7 = vunpack.c.h.bf16 %v572_v1  ;;  %v597_v8 = vunpack.c.l.bf16 %v620_v3  ;;  %v615_v13 = vld [vmem:[%s679_s18 + $0x8] sm:$0xff]   ;;  %v621_v28 = vld [vmem:[%s679_s18 + $0x40] sm:$0xff]   ;;  %v616_v39 = vld [vmem:[%s679_s18 + $0x10] sm:$0xff]  }
  0x11   : > { %v577_v18 = vunpack.c.l.bf16 %v615_v13  ;;  %v598_v19 = vunpack.c.h.bf16 %v620_v3  ;;  %v578_v29 = vunpack.c.h.bf16 %v615_v13  ;;  %v601_v30 = vunpack.c.l.bf16 %v621_v28  ;;  %v622_v50 = vld [vmem:[%s679_s18 + $0x48] sm:$0xff]   ;;  %v618_v57 = vld [vmem:[%s679_s18 + $0x20] sm:$0xff]   ;;  %v623_v58 = vld [vmem:[%s679_s18 + $0x50] sm:$0xff]  }
  0x12   : > { %v210_v9 = vmul.f32 %v684_v0, %v573_v4  ;;  %v356_v10 = vmul.f32 %v684_v0, %v343_v6  ;;  %v211_v11 = vmul.f32 %v684_v0, %v574_v7  ;;  %v357_v12 = vmul.f32 %v684_v0, %v597_v8  ;;  %v617_v2 = vld [vmem:[%s679_s18 + $0x18] sm:$0xff]  }
  0x13   : > { %v212_v26 = vmul.f32 %v684_v0, %v577_v18  ;;  %v358_v27 = vmul.f32 %v684_v0, %v598_v19  ;;  %v213_v35 = vmul.f32 %v684_v0, %v578_v29  ;;  %v359_v36 = vmul.f32 %v684_v0, %v601_v30 }
  0x14   : > { %v226_v14 = vadd.f32 %v692_v5, %v210_v9  ;;  %v369_v15 = vadd.f32 %v692_v5, %v356_v10  ;;  %v227_v16 = vadd.f32 %v692_v5, %v211_v11  ;;  %v370_v17 = vadd.f32 %v692_v5, %v357_v12 }
  0x15   : > { %v228_v33 = vadd.f32 %v692_v5, %v212_v26  ;;  %v371_v34 = vadd.f32 %v692_v5, %v358_v27  ;;  %v229_v40 = vadd.f32 %v692_v5, %v213_v35  ;;  %v372_v41 = vadd.f32 %v692_v5, %v359_v36 }
  0x16   : > { %vm239_vm0 = vcmp.gt.f32.partialorder %v226_v14, 0.0  ;;  %v252_v20 = vmul.f32 0.01, %v226_v14  ;;  %vm382_vm1 = vcmp.gt.f32.partialorder %v369_v15, 0.0  ;;  %v395_v21 = vmul.f32 0.01, %v369_v15 }
  0x17   : > { %v253_v24 = vmul.f32 0.01, %v227_v16  ;;  %v396_v25 = vmul.f32 0.01, %v370_v17  ;;  %vm240_vm2 = vcmp.gt.f32.partialorder %v227_v16, 0.0  ;;  %vm383_vm3 = vcmp.gt.f32.partialorder %v370_v17, 0.0 }
  0x18   : > { %v265_v22 = vsel %vm239_vm0, %v226_v14, %v252_v20  ;;  %v408_v23 = vsel %vm382_vm1, %v369_v15, %v395_v21  ;;  %v254_v37 = vmul.f32 0.01, %v228_v33  ;;  %v397_v38 = vmul.f32 0.01, %v371_v34  ;;  %v624_v15 = vld [vmem:[%s679_s18 + $0x58] sm:$0xff]  }
  0x19   : > { %280 = vxpose.xlu0.b32.start [1/13] (short) %v265_v22, 128  ;;  %422 = vxpose.xlu1.b32.start [1/13] (short) %v408_v23, 128  ;;  %v266_v31 = vsel %vm240_vm2, %v227_v16, %v253_v24  ;;  %v409_v32 = vsel %vm383_vm3, %v370_v17, %v396_v25  ;;  %vm241_vm4 = vcmp.gt.f32.partialorder %v228_v33, 0.0  ;;  %vm384_vm5 = vcmp.gt.f32.partialorder %v371_v34, 0.0 }
  0x1a   : > { %v267_v42 = vsel %vm241_vm4, %v228_v33, %v254_v37  ;;  %v410_v43 = vsel %vm384_vm5, %v371_v34, %v397_v38  ;;  %v581_v44 = vunpack.c.l.bf16 %v616_v39  ;;  %v602_v45 = vunpack.c.h.bf16 %v621_v28 }
  0x1b   : > { %v255_v46 = vmul.f32 0.01, %v229_v40  ;;  %vm242_vm6 = vcmp.gt.f32.partialorder %v229_v40, 0.0  ;;  %v398_v47 = vmul.f32 0.01, %v372_v41  ;;  %vm385_vm7 = vcmp.gt.f32.partialorder %v372_v41, 0.0 }
  0x1c   : > { %v214_v48 = vmul.f32 %v684_v0, %v581_v44  ;;  %v360_v49 = vmul.f32 %v684_v0, %v602_v45  ;;  %v582_v52 = vunpack.c.h.bf16 %v616_v39  ;;  %v605_v56 = vunpack.c.l.bf16 %v622_v50 }
  0x1d   : > { %v268_v51 = vsel %vm242_vm6, %v229_v40, %v255_v46  ;;  %v411_v53 = vsel %vm385_vm7, %v372_v41, %v398_v47  ;;  %v589_v59 = vunpack.c.l.bf16 %v618_v57  ;;  %v610_v61 = vunpack.c.h.bf16 %v623_v58  ;;  %v550_v47 = vld [vmem:[%s679_s18 + $0x60] sm:$0xf] }
  0x1e   : > { %v230_v54 = vadd.f32 %v692_v5, %v214_v48  ;;  %v373_v55 = vadd.f32 %v692_v5, %v360_v49  ;;  %v215_v60 = vmul.f32 %v684_v0, %v582_v52  ;;  %v361_v1 = vmul.f32 %v684_v0, %v605_v56 }
  0x1f   : > { %v218_v3 = vmul.f32 %v684_v0, %v589_v59  ;;  %v364_v4 = vmul.f32 %v684_v0, %v610_v61  ;;  %v585_v8 = vunpack.c.l.bf16 %v617_v2  ;;  %v606_v13 = vunpack.c.h.bf16 %v622_v50  ;;  %v551_v59 = vld [vmem:[%s679_s18 + $0x64] sm:$0x3] }
  0x20   : > { %v256_v62 = vmul.f32 0.01, %v230_v54  ;;  %v399_v63 = vmul.f32 0.01, %v373_v55  ;;  %vm243_vm8 = vcmp.gt.f32.partialorder %v230_v54, 0.0  ;;  %vm386_vm9 = vcmp.gt.f32.partialorder %v373_v55, 0.0 }
  0x21   : > { %281 = vxpose.xlu0.b32.cont [2/13] (short) %v266_v31, 128  ;;  %423 = vxpose.xlu1.b32.cont [2/13] (short) %v409_v32, 128  ;;  %v726_v6 = vadd.f32 %v692_v5, %v218_v3  ;;  %v231_v7 = vadd.f32 %v692_v5, %v215_v60  ;;  %v730_v9 = vadd.f32 %v692_v5, %v364_v4  ;;  %v590_v14 = vunpack.c.h.bf16 %v618_v57  ;;  %v619_v31 = vld [vmem:[%s679_s18 + $0x28] sm:$0xff]   ;;  %v193_v57 = vld [vmem:[%s679_s18 + $0x30] sm:$0x3] }
  0x22   : > { %v269_v10 = vsel %vm243_vm8, %v230_v54, %v256_v62  ;;  %v412_v11 = vsel %vm386_vm9, %v373_v55, %v399_v63  ;;  %v374_v12 = vadd.f32 %v692_v5, %v361_v1  ;;  %v216_v17 = vmul.f32 %v684_v0, %v585_v8 }
  0x23   : > { %v257_v16 = vmul.f32 0.01, %v231_v7  ;;  %v613_v18 = vunpack.c.l.bf16 %v624_v15  ;;  %vm244_vm10 = vcmp.gt.f32.partialorder %v231_v7, 0.0  ;;  %v362_v20 = vmul.f32 %v684_v0, %v606_v13 }
  0x24   : > { %v400_v19 = vmul.f32 0.01, %v374_v12  ;;  %v219_v21 = vmul.f32 %v684_v0, %v590_v14  ;;  %vm387_vm11 = vcmp.gt.f32.partialorder %v374_v12, 0.0  ;;  %v232_v25 = vadd.f32 %v692_v5, %v216_v17 }
  0x25   : > { %v365_v22 = vmul.f32 %v684_v0, %v613_v18  ;;  %v270_v24 = vsel %vm244_vm10, %v231_v7, %v257_v16  ;;  %v375_v28 = vadd.f32 %v692_v5, %v362_v20  ;;  %v586_v29 = vunpack.c.h.bf16 %v617_v2 }
  0x26   : > { %v739_v23 = vadd.f32 %v692_v5, %v219_v21  ;;  %v413_v27 = vsel %vm387_vm11, %v374_v12, %v400_v19  ;;  %v609_v30 = vunpack.c.l.bf16 %v623_v58  ;;  %v593_v32 = vunpack.c.l.bf16 %v619_v31 }
  0x27   : > { %v743_v26 = vadd.f32 %v692_v5, %v365_v22  ;;  %v258_v33 = vmul.f32 0.01, %v232_v25  ;;  %v614_v34 = vunpack.c.h.bf16 %v624_v15  ;;  %v401_v35 = vmul.f32 0.01, %v375_v28 }
  0x28   : > { %v217_v36 = vmul.f32 %v684_v0, %v586_v29  ;;  %v363_v37 = vmul.f32 %v684_v0, %v609_v30  ;;  %v220_v38 = vmul.f32 %v684_v0, %v593_v32  ;;  %vm245_vm12 = vcmp.gt.f32.partialorder %v232_v25, 0.0 }
  0x29   : > { %282 = vxpose.xlu0.b32.cont [3/13] (short) %v267_v42, 128  ;;  %424 = vxpose.xlu1.b32.cont [3/13] (short) %v410_v43, 128  ;;  %vm388_vm13 = vcmp.gt.f32.partialorder %v375_v28, 0.0  ;;  %v366_v39 = vmul.f32 %v684_v0, %v614_v34  ;;  %v271_v42 = vsel %vm245_vm12, %v232_v25, %v258_v33  ;;  %v594_v46 = vunpack.c.h.bf16 %v619_v31 }
  0x2a   : > { %v236_v40 = vadd.f32 %v692_v5, %v220_v38  ;;  %v414_v43 = vsel %vm388_vm13, %v375_v28, %v401_v35  ;;  %v233_v44 = vadd.f32 %v692_v5, %v217_v36  ;;  %v376_v45 = vadd.f32 %v692_v5, %v363_v37 }
  0x2b   : > { %v379_v41 = vadd.f32 %v692_v5, %v366_v39  ;;  %v354_v48 = vunpack.c.l.bf16 %v550_v47  ;;  %v206_v58 = vunpack.c.l.bf16 %v193_v57  ;;  %v355_v60 = vunpack.c.l.bf16 %v551_v59 }
  0x2c   : > { %v259_v49 = vmul.f32 0.01, %v233_v44  ;;  %v402_v50 = vmul.f32 0.01, %v376_v45  ;;  %vm246_vm14 = vcmp.gt.f32.partialorder %v233_v44, 0.0  ;;  %vm389_vm15 = vcmp.gt.f32.partialorder %v376_v45, 0.0 }
  0x2d   : > { %v367_v52 = vmul.f32 %v684_v0, %v354_v48  ;;  %v222_v61 = vmul.f32 %v684_v0, %v206_v58  ;;  %v260_v62 = vmul.f32 0.01, %v726_v6  ;;  %v403_v63 = vmul.f32 0.01, %v730_v9 }
  0x2e   : > { %v272_v55 = vsel %vm246_vm14, %v233_v44, %v259_v49  ;;  %v415_v56 = vsel %vm389_vm15, %v376_v45, %v402_v50  ;;  %v368_v1 = vmul.f32 %v684_v0, %v355_v60  ;;  %vm247_vm0 = vcmp.gt.f32.partialorder %v726_v6, 0.0 }
  0x2f   : > { %v380_v54 = vadd.f32 %v692_v5, %v367_v52  ;;  %vm390_vm1 = vcmp.gt.f32.partialorder %v730_v9, 0.0  ;;  %v238_v2 = vadd.f32 %v692_v5, %v222_v61  ;;  %v273_v4 = vsel %vm247_vm0, %v726_v6, %v260_v62 }
  0x30   : > { %v381_v3 = vadd.f32 %v692_v5, %v368_v1  ;;  %v416_v7 = vsel %vm390_vm1, %v730_v9, %v403_v63  ;;  %v261_v8 = vmul.f32 0.01, %v739_v23  ;;  %vm248_vm2 = vcmp.gt.f32.partialorder %v739_v23, 0.0 }
  0x31   : > { %283 = vxpose.xlu0.b32.cont [4/13] (short) %v268_v51, 128  ;;  %425 = vxpose.xlu1.b32.cont [4/13] (short) %v411_v53, 128  ;;  %v221_v51 = vmul.f32 %v684_v0, %v594_v46  ;;  %vm391_vm3 = vcmp.gt.f32.partialorder %v743_v26, 0.0  ;;  %v405_v6 = vmul.f32 0.01, %v379_v41  ;;  %vm249_vm4 = vcmp.gt.f32.partialorder %v236_v40, 0.0 }
  0x32   : > { %v274_v0 = vsel %vm248_vm2, %v739_v23, %v261_v8  ;;  %vm392_vm5 = vcmp.gt.f32.partialorder %v379_v41, 0.0  ;;  %v406_v14 = vmul.f32 0.01, %v380_v54  ;;  %vm393_vm7 = vcmp.gt.f32.partialorder %v380_v54, 0.0 }
  0x33   : > { %v237_v53 = vadd.f32 %v692_v5, %v221_v51  ;;  %v262_v5 = vmul.f32 0.01, %v236_v40  ;;  %v418_v12 = vsel %vm392_vm5, %v379_v41, %v405_v6  ;;  %v264_v17 = vmul.f32 0.01, %v238_v2 }
  0x34   : > { %v419_v16 = vsel %vm393_vm7, %v380_v54, %v406_v14  ;;  %v407_v18 = vmul.f32 0.01, %v381_v3  ;;  %vm251_vm8 = vcmp.gt.f32.partialorder %v238_v2, 0.0  ;;  %vm394_vm9 = vcmp.gt.f32.partialorder %v381_v3, 0.0 }
  0x35   : > { %v275_v9 = vsel %vm249_vm4, %v236_v40, %v262_v5  ;;  %v263_v13 = vmul.f32 0.01, %v237_v53  ;;  %vm250_vm6 = vcmp.gt.f32.partialorder %v237_v53, 0.0  ;;  %v277_v19 = vsel %vm251_vm8, %v238_v2, %v264_v17 }
  0x36   : > { %vm278_vm10 = vcmask 1042432   ;;  %v420_v20 = vsel %vm394_vm9, %v381_v3, %v407_v18  ;;  %vm312_vm11 = vcmask 809984  }
  0x37   : > { %v276_v15 = vsel %vm250_vm6, %v237_v53, %v263_v13  ;;  %v279_v21 = vsel %vm278_vm10, %v277_v19, 0.0  ;;  %v421_v22 = vsel %vm278_vm10, %v420_v20, 0.0 }
  0x39   : > { %284 = vxpose.xlu0.b32.cont [5/13] (short) %v269_v10, 128  ;;  %426 = vxpose.xlu1.b32.cont [5/13] (short) %v412_v11, 128  ;;  %v404_v10 = vmul.f32 0.01, %v743_v26 }
  0x3b   : > { %v417_v11 = vsel %vm391_vm3, %v743_v26, %v404_v10 }
  0x41   : > { %285 = vxpose.xlu0.b32.cont [6/13] (short) %v270_v24, 128  ;;  %427 = vxpose.xlu1.b32.cont [6/13] (short) %v413_v27, 128 }
  0x49   : > { %286 = vxpose.xlu0.b32.cont [7/13] (short) %v271_v42, 128  ;;  %428 = vxpose.xlu1.b32.cont [7/13] (short) %v414_v43, 128 }
  0x51   : > { %287 = vxpose.xlu0.b32.cont [8/13] (short) %v272_v55, 128  ;;  %429 = vxpose.xlu1.b32.cont [8/13] (short) %v415_v56, 128 }
  0x59   : > { %288 = vxpose.xlu0.b32.cont [9/13] (short) %v273_v4, 128  ;;  %430 = vxpose.xlu1.b32.cont [9/13] (short) %v416_v7, 128 }
  0x61   : > { %289 = vxpose.xlu0.b32.cont [10/13] (short) %v274_v0, 128  ;;  %431 = vxpose.xlu1.b32.cont [10/13] (short) %v417_v11, 128 }
  0x69   : > { %290 = vxpose.xlu0.b32.cont [11/13] (short) %v275_v9, 128  ;;  %432 = vxpose.xlu1.b32.cont [11/13] (short) %v418_v12, 128 }
  0x71   : > { %291 = vxpose.xlu0.b32.cont [12/13] (short) %v276_v15, 128  ;;  %433 = vxpose.xlu1.b32.cont [12/13] (short) %v419_v16, 128 }
  0x79   : > { %292 = vxpose.xlu0.b32.end [13/13] (short) %v279_v21, 128  ;;  %434 = vxpose.xlu1.b32.end [13/13] (short) %v421_v22, 128 }
  0xbd   : > { %v296_v23 = vpop.trf.xlu0  ;;  %v438_v24 = vpop.trf.xlu1 }
  0xbe   : > { %313 = vst.msk [vmem:[%s782_s26] sm:$0xff] %vm312_vm11, %v296_v23 }
  0xbf   : > { %552 = vst.msk [vmem:[%s782_s26 + $0x80] sm:$0xff] %vm312_vm11, %v438_v24 }
  0xc5   : > { %v297_v25 = vpop.trf.xlu0  ;;  %v439_v26 = vpop.trf.xlu1 }
  0xc6   : > { %314 = vst.msk [vmem:[%s782_s26 + $0x8] sm:$0xff] %vm312_vm11, %v297_v25 }
  0xc7   : > { %553 = vst.msk [vmem:[%s782_s26 + $0x88] sm:$0xff] %vm312_vm11, %v439_v26 }
  0xcd   : > { %v298_v27 = vpop.trf.xlu0  ;;  %v440_v28 = vpop.trf.xlu1 }
  0xce   : > { %315 = vst.msk [vmem:[%s782_s26 + $0x10] sm:$0xff] %vm312_vm11, %v298_v27 }
  0xcf   : > { %554 = vst.msk [vmem:[%s782_s26 + $0x90] sm:$0xff] %vm312_vm11, %v440_v28 }
  0xd5   : > { %v299_v29 = vpop.trf.xlu0  ;;  %v441_v30 = vpop.trf.xlu1 }
  0xd6   : > { %316 = vst.msk [vmem:[%s782_s26 + $0x18] sm:$0xff] %vm312_vm11, %v299_v29 }
  0xd7   : > { %555 = vst.msk [vmem:[%s782_s26 + $0x98] sm:$0xff] %vm312_vm11, %v441_v30 }
  0xdd   : > { %v300_v31 = vpop.trf.xlu0  ;;  %v442_v32 = vpop.trf.xlu1 }
  0xde   : > { %317 = vst.msk [vmem:[%s782_s26 + $0x20] sm:$0xff] %vm312_vm11, %v300_v31 }
  0xdf   : > { %556 = vst.msk [vmem:[%s782_s26 + $0xa0] sm:$0xff] %vm312_vm11, %v442_v32 }
  0xe5   : > { %v301_v33 = vpop.trf.xlu0  ;;  %v443_v34 = vpop.trf.xlu1 }
  0xe6   : > { %318 = vst.msk [vmem:[%s782_s26 + $0x28] sm:$0xff] %vm312_vm11, %v301_v33 }
  0xe7   : > { %557 = vst.msk [vmem:[%s782_s26 + $0xa8] sm:$0xff] %vm312_vm11, %v443_v34 }
  0xed   : > { %v302_v35 = vpop.trf.xlu0  ;;  %v444_v36 = vpop.trf.xlu1 }
  0xee   : > { %319 = vst.msk [vmem:[%s782_s26 + $0x30] sm:$0xff] %vm312_vm11, %v302_v35 }
  0xef   : > { %558 = vst.msk [vmem:[%s782_s26 + $0xb0] sm:$0xff] %vm312_vm11, %v444_v36 }
  0xf5   : > { %v303_v37 = vpop.trf.xlu0  ;;  %v445_v38 = vpop.trf.xlu1 }
  0xf6   : > { %320 = vst.msk [vmem:[%s782_s26 + $0x38] sm:$0xff] %vm312_vm11, %v303_v37 }
  0xf7   : > { %559 = vst.msk [vmem:[%s782_s26 + $0xb8] sm:$0xff] %vm312_vm11, %v445_v38 }
  0xfd   : > { %v304_v39 = vpop.trf.xlu0  ;;  %v446_v40 = vpop.trf.xlu1 }
  0xfe   : > { %321 = vst.msk [vmem:[%s782_s26 + $0x40] sm:$0xff] %vm312_vm11, %v304_v39 }
  0xff   : > { %560 = vst.msk [vmem:[%s782_s26 + $0xc0] sm:$0xff] %vm312_vm11, %v446_v40 }
 0x105   : > { %v305_v41 = vpop.trf.xlu0  ;;  %v447_v42 = vpop.trf.xlu1 }
 0x106   : > { %322 = vst.msk [vmem:[%s782_s26 + $0x48] sm:$0xff] %vm312_vm11, %v305_v41 }
 0x107   : > { %561 = vst.msk [vmem:[%s782_s26 + $0xc8] sm:$0xff] %vm312_vm11, %v447_v42 }
 0x10d   : > { %v306_v43 = vpop.trf.xlu0  ;;  %v448_v44 = vpop.trf.xlu1 }
 0x10e   : > { %323 = vst.msk [vmem:[%s782_s26 + $0x50] sm:$0xff] %vm312_vm11, %v306_v43 }
 0x10f   : > { %562 = vst.msk [vmem:[%s782_s26 + $0xd0] sm:$0xff] %vm312_vm11, %v448_v44 }
 0x115   : > { %v307_v45 = vpop.trf.xlu0  ;;  %v449_v46 = vpop.trf.xlu1 }
 0x116   : > { %324 = vst.msk [vmem:[%s782_s26 + $0x58] sm:$0xff] %vm312_vm11, %v307_v45 }
 0x117   : > { %563 = vst.msk [vmem:[%s782_s26 + $0xd8] sm:$0xff] %vm312_vm11, %v449_v46 }
 0x11d   : > { %v308_v47 = vpop.trf.xlu0  ;;  %v450_v48 = vpop.trf.xlu1 }
 0x11e   : > { %325 = vst.msk [vmem:[%s782_s26 + $0x60] sm:$0xff] %vm312_vm11, %v308_v47 }
 0x11f   : > { %564 = vst.msk [vmem:[%s782_s26 + $0xe0] sm:$0xff] %vm312_vm11, %v450_v48 }
 0x125   : > { %v309_v49 = vpop.trf.xlu0  ;;  %v451_v50 = vpop.trf.xlu1 }
 0x126   : > { %326 = vst.msk [vmem:[%s782_s26 + $0x68] sm:$0xff] %vm312_vm11, %v309_v49 }
 0x127   : > { %565 = vst.msk [vmem:[%s782_s26 + $0xe8] sm:$0xff] %vm312_vm11, %v451_v50 }
 0x12d   : > { %v310_v51 = vpop.trf.xlu0  ;;  %v452_v52 = vpop.trf.xlu1 }
 0x12e   : > { %327 = vst.msk [vmem:[%s782_s26 + $0x70] sm:$0xff] %vm312_vm11, %v310_v51 }
 0x12f   : > { %566 = vst.msk [vmem:[%s782_s26 + $0xf0] sm:$0xff] %vm312_vm11, %v452_v52 }
 0x135   : > { %v311_v53 = vpop.trf.xlu0  ;;  %v453_v54 = vpop.trf.xlu1 }
 0x136   : > { %328 = vst.msk [vmem:[%s782_s26 + $0x78] sm:$0xff] %vm312_vm11, %v311_v53 }
 0x137   : > { %567 = vst.msk [vmem:[%s782_s26 + $0xf8] sm:$0xff] %vm312_vm11, %v453_v54 }
 0x138 PF: > { %s13_s12 = sadd.s32 1, %s643_s12  }
 0x139   : > { %p10_p4 = scmp.ge.s32.totalorder %s13_s12, 6  }
 0x13b   :  { %12 = sbr.rel (!%p10_p4) target bundleno = 1 (0x1), region = 64 }

// kernel: gabor_nn_1d_forward.6
= control target key start
LH: loop header
LB: loop body
LE: loop exit
PB: predicated region body
PF: predicated region fallthrough
CT: control target
= control target key end

     0   :  { %s1751_s21 = smov 0   ;;  %s2306_s0 = inlined_call_operand.vmem [shape: bf16[8,99,64], index: 0, kind: input, shape index: {}]   ;;  %s2307_s1 = inlined_call_operand.vmem [shape: bf16[192,128], index: 1, kind: input, shape index: {}]   ;;  %s2308_s2 = inlined_call_operand.vmem [shape: f32[1,128], index: 2, kind: input, shape index: {}]   ;;  %s2309_s3 = inlined_call_operand.vmem [shape: f32[1,64], index: 3, kind: input, shape index: {}]   ;;  %s2310_s4 = inlined_call_operand.vmem [shape: f32[1,64], index: 4, kind: input, shape index: {}]   ;;  %s2311_s5 = inlined_call_operand.vmem [shape: bf16[8,99,128], index: 5, kind: output, shape index: {0}]   ;;  %s2312_s6 = inlined_call_operand.vmem [shape: f32[4,2,128], index: 6, kind: output, shape index: {1}]  }
   0x1 LB: > { %s1757_s22 = sadd.s32 4294967295, %s1713_s21   ;;  %p1466_p0 = scmp.ge.s32.totalorder %s1713_s21, 1  ;;  %s1713_s21 = sphi %s1751_s21, %s17_s21  }
   0x2   : > { %p217_p1 = scmp.lt.s32.totalorder %s1713_s21, 5 }
   0x4   : > { %p218_p2 = pnand %p1466_p0, %p217_p1 }
   0x5   : > { %s1467_s23 = sshll.u32 (!%p218_p2), %s1757_s22, 1  ;;  %s1715_s8 = smov (!%p218_p2), 64  }
   0x6   : > { %221 = sbr.rel (%p218_p2) target bundleno = 418 (0x1a2), region = 40  ;;  %p254_p3 = scmp.lt.s32.totalorder (!%p218_p2), %s1467_s23, 7 }
   0x7   : > { %p267_p4 = scmp.lt.s32.totalorder (!%p218_p2), %s1757_s22, 3 }
   0xb   : > { %s2318_s23 = smov (!%p254_p3, %s1467_s23), 7  ;;  %v1775_v0 = vld [vmem:[%s2309_s3] ss:$0 sm:$0xff]  ;;  %vm442_vm4 = vsmask.f32 256  ;;  %vm499_vm5 = vcmask 1040384  }
   0xc   : > { %s1694_s24 = smul.u32 52, %s2318_s23  ;;  %v1785_v4 = vld [vmem:[%s2310_s4] ss:$0 sm:$0xff]  ;;  %vm506_vm10 = vsmask.f32 7424  ;;  %vm1820_vm11 = vmand %vm499_vm5, %vm442_vm4  ;;  %s2320_s22 = smov (!%p267_p4, %s1757_s22), 3 }
   0xd   : > { %s1471_s23 = sshll.u32 %s2320_s22, 1 }
   0xe   : > { %s1770_s27 = scalar_lea.vmem %s2306_s0, %s1694_s24  ;;  %s2142_s17 = scalar_lea.vmem %s2311_s5, %s1694_s24 }
   0xf   : > { %v1527_v1 = vld [vmem:[%s1770_s27 + $0x34] sm:$0xf]  ;;  %v1684_v2 = vld [vmem:[%s1770_s27 + $0x38] sm:$0xff]   ;;  %v1780_v3 = vld [vmem:[%s1770_s27 + $0x40] sm:$0xff]   ;;  %s270_s19 = scalar_lea.vmem %s2312_s6, %s1471_s23 }
  0x10   : > { %v1631_v5 = vunpack.c.l.bf16 %v1684_v2  ;;  %v1632_v6 = vunpack.c.h.bf16 %v1684_v2  ;;  %v1635_v7 = vunpack.c.l.bf16 %v1780_v3  ;;  %v894_v8 = vunpack.c.l.bf16 %v1527_v1  ;;  %v1576_v9 = vld [vmem:[%s1770_s27] sm:$0xff]   ;;  %v1674_v10 = vld [vmem:[%s1770_s27 + $0x8] sm:$0xff]  }
  0x11   : > { %v1577_v11 = vunpack.c.l.bf16 %v1576_v9  ;;  %v1578_v12 = vunpack.c.h.bf16 %v1576_v9  ;;  %v1581_v13 = vunpack.c.l.bf16 %v1674_v10  ;;  %v1582_v14 = vunpack.c.h.bf16 %v1674_v10  ;;  %v1808_v51 = vld [vmem:[%s1770_s27 + $0x48] sm:$0xff]  }
  0x12   : > { %v907_v15 = vmul.f32 %v1775_v0, %v894_v8  ;;  %v908_v16 = vmul.f32 %v1775_v0, %v1631_v5  ;;  %v909_v17 = vmul.f32 %v1775_v0, %v1632_v6  ;;  %v910_v18 = vmul.f32 %v1775_v0, %v1635_v7  ;;  %v1675_v6 = vld [vmem:[%s1770_s27 + $0x10] sm:$0xff]  }
  0x13   : > { %v328_v19 = vmul.f32 %v1775_v0, %v1577_v11  ;;  %v329_v20 = vmul.f32 %v1775_v0, %v1578_v12  ;;  %v330_v21 = vmul.f32 %v1775_v0, %v1581_v13  ;;  %v331_v22 = vmul.f32 %v1775_v0, %v1582_v14 }
  0x14   : > { %v920_v23 = vadd.f32 %v1785_v4, %v907_v15  ;;  %v921_v24 = vadd.f32 %v1785_v4, %v908_v16  ;;  %v922_v25 = vadd.f32 %v1785_v4, %v909_v17  ;;  %v923_v26 = vadd.f32 %v1785_v4, %v910_v18 }
  0x15   : > { %v344_v27 = vadd.f32 %v1785_v4, %v328_v19  ;;  %v345_v28 = vadd.f32 %v1785_v4, %v329_v20  ;;  %v346_v29 = vadd.f32 %v1785_v4, %v330_v21  ;;  %v347_v30 = vadd.f32 %v1785_v4, %v331_v22 }
  0x16   : > { %vm933_vm0 = vcmp.gt.f32.partialorder %v920_v23, 0.0  ;;  %vm934_vm1 = vcmp.gt.f32.partialorder %v921_v24, 0.0  ;;  %vm935_vm2 = vcmp.gt.f32.partialorder %v922_v25, 0.0  ;;  %vm936_vm3 = vcmp.gt.f32.partialorder %v923_v26, 0.0 }
  0x17   : > { %v946_v31 = vmul.f32 0.01, %v920_v23  ;;  %v947_v32 = vmul.f32 0.01, %v921_v24  ;;  %v948_v33 = vmul.f32 0.01, %v922_v25  ;;  %v1636_v34 = vunpack.c.h.bf16 %v1780_v3 }
  0x18   : > { %v949_v35 = vmul.f32 0.01, %v923_v26  ;;  %vm357_vm6 = vcmp.gt.f32.partialorder %v344_v27, 0.0  ;;  %vm358_vm7 = vcmp.gt.f32.partialorder %v345_v28, 0.0  ;;  %vm359_vm8 = vcmp.gt.f32.partialorder %v346_v29, 0.0 }
  0x19   : > { %v959_v36 = vsel %vm933_vm0, %v920_v23, %v946_v31  ;;  %v960_v37 = vsel %vm934_vm1, %v921_v24, %v947_v32  ;;  %v961_v38 = vsel %vm935_vm2, %v922_v25, %v948_v33  ;;  %vm360_vm9 = vcmp.gt.f32.partialorder %v347_v30, 0.0 }
  0x1a   : > { %v962_v39 = vsel %vm936_vm3, %v923_v26, %v949_v35  ;;  %v972_v40 = vpack.c.bf16 %v959_v36, %v959_v36  ;;  %v973_v41 = vpack.c.bf16 %v960_v37, %v960_v37  ;;  %v974_v42 = vpack.c.bf16 %v961_v38, %v961_v38 }
  0x1b   : > { %v975_v43 = vpack.c.bf16 %v962_v39, %v962_v39  ;;  %v370_v44 = vmul.f32 0.01, %v344_v27  ;;  %v371_v45 = vmul.f32 0.01, %v345_v28  ;;  %v372_v46 = vmul.f32 0.01, %v346_v29 }
  0x1c   : > { %v998_v47 = vunpack.c.l.b16 %v972_v40  ;;  %v999_v48 = vunpack.c.l.b16 %v973_v41  ;;  %v1000_v49 = vunpack.c.l.b16 %v974_v42  ;;  %v373_v50 = vmul.f32 0.01, %v347_v30 }
  0x1d   : > { %v1001_v52 = vunpack.c.l.b16 %v975_v43  ;;  %v383_v53 = vsel %vm357_vm6, %v344_v27, %v370_v44  ;;  %v384_v54 = vsel %vm358_vm7, %v345_v28, %v371_v45  ;;  %v385_v55 = vsel %vm359_vm8, %v346_v29, %v372_v46 }
  0x1e   : > { %v1011_v56 = vpack.c.b16 %v999_v48, %v998_v47  ;;  %v386_v57 = vsel %vm360_vm9, %v347_v30, %v373_v50  ;;  %v396_v58 = vpack.c.bf16 %v383_v53, %v383_v53  ;;  %v397_v59 = vpack.c.bf16 %v384_v54, %v384_v54  ;;  %v1687_v54 = vld [vmem:[%s1770_s27 + $0x50] sm:$0xff]  }
  0x1f   : > { %v1012_v60 = vpack.c.b16 %v1001_v52, %v1000_v49  ;;  %v398_v61 = vpack.c.bf16 %v385_v55, %v385_v55  ;;  %v399_v62 = vpack.c.bf16 %v386_v57, %v386_v57  ;;  %v1639_v63 = vunpack.c.l.bf16 %v1808_v51 }
  0x20   : > { %v1019_v1 = vshrl.u32 %v1011_v56, 16  ;;  %v1022_v2 = vshll.u32 %v1011_v56, 16  ;;  %v422_v3 = vunpack.c.l.b16 %v396_v58  ;;  %v423_v5 = vunpack.c.l.b16 %v397_v59  ;;  %v1858_v59 = vld [vmem:[%s1770_s27 + $0x58] sm:$0xff]  }
  0x21   : > { %v1026_v7 = vshrl.u32 %v1012_v60, 16  ;;  %v1029_v8 = vshll.u32 %v1012_v60, 16  ;;  %v424_v9 = vunpack.c.l.b16 %v398_v61  ;;  %v425_v10 = vunpack.c.l.b16 %v399_v62 }
  0x22   : > { %v1021_v11 = vrot.slane %v1019_v1, 7  ;;  %v435_v12 = vpack.c.b16 %v423_v5, %v422_v3  ;;  %v911_v13 = vmul.f32 %v1775_v0, %v1636_v34  ;;  %v912_v14 = vmul.f32 %v1775_v0, %v1639_v63 }
  0x23   : > { %v1824_v16 = vrot.slane %v1026_v7, 7  ;;  %v436_v17 = vpack.c.b16 %v425_v10, %v424_v9  ;;  %v1585_v18 = vunpack.c.l.bf16 %v1675_v6  ;;  %v1586_v19 = vunpack.c.h.bf16 %v1675_v6 }
  0x24   : > { %v1024_v20 = vor.u32 %v1022_v2, %v1021_v11  ;;  %v444_v21 = vshrl.u32 %v435_v12, 16  ;;  %v447_v22 = vshll.u32 %v435_v12, 16  ;;  %v924_v23 = vadd.f32 %v1785_v4, %v911_v13 }
  0x25   : > { %v1031_v24 = vor.u32 %v1029_v8, %v1824_v16  ;;  %v451_v25 = vshrl.u32 %v436_v17, 16  ;;  %v454_v26 = vshll.u32 %v436_v17, 16  ;;  %v925_v27 = vadd.f32 %v1785_v4, %v912_v14 }
  0x26   : > { %v1831_v28 = vsel %vm1820_vm11, 0, %v1024_v20  ;;  %v446_v29 = vrot.slane %v444_v21, 7  ;;  %vm937_vm12 = vcmp.gt.f32.partialorder %v924_v23, 0.0  ;;  %v950_v30 = vmul.f32 0.01, %v924_v23 }
  0x27   : > { %v1834_v31 = vsel %vm442_vm4, %v1021_v11, %v1031_v24  ;;  %v1078_v32 = vshrl.u32 %v1831_v28, 16  ;;  %v1080_v33 = vshll.u32 %v1831_v28, 16  ;;  %v1838_v34 = vrot.slane %v451_v25, 7 }
  0x28   : > { %v1085_v35 = vshll.u32 %v1834_v31, 16  ;;  %v449_v36 = vor.u32 %v447_v22, %v446_v29  ;;  %vm938_vm13 = vcmp.gt.f32.partialorder %v925_v27, 0.0  ;;  %v951_v37 = vmul.f32 0.01, %v925_v27 }
  0x29   : > { %v1082_v38 = vrot.slane %v1080_v33, 1  ;;  %v456_v39 = vor.u32 %v454_v26, %v1838_v34  ;;  %v963_v40 = vsel %vm937_vm12, %v924_v23, %v950_v30  ;;  %v1089_v41 = vshrl.u32 %v1834_v31, 16 }
  0x2a   : > { %v1087_v42 = vrot.slane %v1085_v35, 1  ;;  %v1845_v43 = vsel %vm1820_vm11, 0, %v449_v36  ;;  %v964_v44 = vsel %vm938_vm13, %v925_v27, %v951_v37  ;;  %v976_v45 = vpack.c.bf16 %v963_v40, %v963_v40 }
  0x2b   : > { %v1083_v46 = vor.u32 %v1082_v38, %v1078_v32  ;;  %v1848_v47 = vsel %vm442_vm4, %v446_v29, %v456_v39  ;;  %v508_v48 = vshrl.u32 %v1845_v43, 16  ;;  %v510_v49 = vshll.u32 %v1845_v43, 16 }
  0x2c   : > { %v515_v50 = vshll.u32 %v1848_v47, 16  ;;  %v977_v52 = vpack.c.bf16 %v964_v44, %v964_v44  ;;  %v1002_v53 = vunpack.c.l.b16 %v976_v45  ;;  %v332_v57 = vmul.f32 %v1775_v0, %v1585_v18  ;;  %v1676_v44 = vld [vmem:[%s1770_s27 + $0x18] sm:$0xff]  }
  0x2d   : > { %v1088_v55 = vsel %vm506_vm10, %v1083_v46, %v1087_v42  ;;  %v512_v56 = vrot.slane %v510_v49, 1  ;;  %v333_v58 = vmul.f32 %v1775_v0, %v1586_v19  ;;  %v1091_v62 = vor.u32 %v1089_v41, %v1087_v42 }
  0x2e   : > { %1131 = vrot.lane.b32.xlu0 %v1088_v55, %s1715_s8  ;;  %v1861_v60 = vrot.slane %v515_v50, 1  ;;  %v1003_v61 = vunpack.c.l.b16 %v977_v52  ;;  %v1640_v63 = vunpack.c.h.bf16 %v1808_v51  ;;  %v348_v2 = vadd.f32 %v1785_v4, %v332_v57 }
  0x2f   : > { %v513_v1 = vor.u32 %v512_v56, %v508_v48  ;;  %v349_v3 = vadd.f32 %v1785_v4, %v333_v58  ;;  %v1643_v5 = vunpack.c.l.bf16 %v1687_v54  ;;  %v519_v7 = vshrl.u32 %v1848_v47, 16 }
  0x30   : > { %v1013_v6 = vpack.c.b16 %v1003_v61, %v1002_v53  ;;  %v1644_v8 = vunpack.c.h.bf16 %v1687_v54  ;;  %v1647_v9 = vunpack.c.l.bf16 %v1858_v59  ;;  %vm361_vm14 = vcmp.gt.f32.partialorder %v348_v2, 0.0  ;;  %v1677_v54 = vld [vmem:[%s1770_s27 + $0x20] sm:$0xff]  }
  0x31   : > { %v518_v10 = vsel %vm506_vm10, %v513_v1, %v1861_v60  ;;  %vm362_vm15 = vcmp.gt.f32.partialorder %v349_v3, 0.0  ;;  %v374_v11 = vmul.f32 0.01, %v348_v2  ;;  %v375_v13 = vmul.f32 0.01, %v349_v3 }
  0x32   : > { %v1034_v12 = vshrl.u32 %v1013_v6, 16  ;;  %v1037_v51 = vshll.u32 %v1013_v6, 16  ;;  %v913_v14 = vmul.f32 %v1775_v0, %v1640_v63  ;;  %v914_v17 = vmul.f32 %v1775_v0, %v1643_v5 }
  0x33   : > { %v387_v15 = vsel %vm361_vm14, %v348_v2, %v374_v11  ;;  %v915_v18 = vmul.f32 %v1775_v0, %v1644_v8  ;;  %v916_v19 = vmul.f32 %v1775_v0, %v1647_v9  ;;  %v388_v21 = vsel %vm362_vm15, %v349_v3, %v375_v13 }
  0x34   : > { %v1874_v20 = vrot.slane %v1034_v12, 7  ;;  %v400_v22 = vpack.c.bf16 %v387_v15, %v387_v15  ;;  %v926_v23 = vadd.f32 %v1785_v4, %v913_v14  ;;  %v401_v24 = vpack.c.bf16 %v388_v21, %v388_v21 }
  0x35   : > { %v927_v25 = vadd.f32 %v1785_v4, %v914_v17  ;;  %v928_v26 = vadd.f32 %v1785_v4, %v915_v18  ;;  %v929_v27 = vadd.f32 %v1785_v4, %v916_v19  ;;  %v1589_v58 = vunpack.c.l.bf16 %v1676_v44 }
  0x36   : > { %561 = vrot.lane.b32.xlu0 %v518_v10, %s1715_s8  ;;  %v1039_v29 = vor.u32 %v1037_v51, %v1874_v20  ;;  %v426_v30 = vunpack.c.l.b16 %v400_v22  ;;  %vm939_vm0 = vcmp.gt.f32.partialorder %v926_v23, 0.0  ;;  %v952_v32 = vmul.f32 0.01, %v926_v23 }
  0x37   : > { %v427_v33 = vunpack.c.l.b16 %v401_v24  ;;  %vm940_vm1 = vcmp.gt.f32.partialorder %v927_v25, 0.0  ;;  %vm941_vm2 = vcmp.gt.f32.partialorder %v928_v26, 0.0  ;;  %vm942_vm3 = vcmp.gt.f32.partialorder %v929_v27, 0.0 }
  0x38   : > { %v1884_v35 = vsel %vm442_vm4, %v1824_v16, %v1039_v29  ;;  %v953_v36 = vmul.f32 0.01, %v927_v25  ;;  %v954_v37 = vmul.f32 0.01, %v928_v26  ;;  %v955_v38 = vmul.f32 0.01, %v929_v27 }
  0x39   : > { %v1093_v39 = vshll.u32 %v1884_v35, 16  ;;  %v437_v40 = vpack.c.b16 %v427_v33, %v426_v30  ;;  %v965_v41 = vsel %vm939_vm0, %v926_v23, %v952_v32  ;;  %v1097_v42 = vshrl.u32 %v1884_v35, 16  ;;  %v1678_v30 = vld [vmem:[%s1770_s27 + $0x28] sm:$0xff]  }
  0x3a   : > { %v966_v45 = vsel %vm940_vm1, %v927_v25, %v953_v36  ;;  %v967_v46 = vsel %vm941_vm2, %v928_v26, %v954_v37  ;;  %v968_v48 = vsel %vm942_vm3, %v929_v27, %v955_v38  ;;  %v978_v49 = vpack.c.bf16 %v965_v41, %v965_v41 }
  0x3b   : > { %v1095_v50 = vrot.slane %v1093_v39, 1  ;;  %v459_v52 = vshrl.u32 %v437_v40, 16  ;;  %v462_v53 = vshll.u32 %v437_v40, 16  ;;  %v979_v16 = vpack.c.bf16 %v966_v45, %v966_v45 }
  0x3c   : > { %v980_v55 = vpack.c.bf16 %v967_v46, %v967_v46  ;;  %v981_v56 = vpack.c.bf16 %v968_v48, %v968_v48  ;;  %v1004_v57 = vunpack.c.l.b16 %v978_v49  ;;  %v521_v1 = vor.u32 %v519_v7, %v1861_v60 }
  0x3d   : > { %v1096_v61 = vsel %vm506_vm10, %v1091_v62, %v1095_v50  ;;  %v1891_v63 = vrot.slane %v459_v52, 7  ;;  %v1005_v2 = vunpack.c.l.b16 %v979_v16  ;;  %v1590_v6 = vunpack.c.h.bf16 %v1676_v44 }
  0x3e   : > { %1133 = vrot.lane.b32.xlu1 %v1096_v61, %s1715_s8  ;;  %v1006_v3 = vunpack.c.l.b16 %v980_v55  ;;  %v1007_v5 = vunpack.c.l.b16 %v981_v56  ;;  %v1593_v8 = vunpack.c.l.bf16 %v1677_v54  ;;  %v1594_v11 = vunpack.c.h.bf16 %v1677_v54  ;;  %v1538_v61 = vld [vmem:[%s1770_s27 + $0x60] sm:$0xf] }
  0x3f   : > { %v464_v9 = vor.u32 %v462_v53, %v1891_v63  ;;  %v1014_v10 = vpack.c.b16 %v1005_v2, %v1004_v57  ;;  %v334_v12 = vmul.f32 %v1775_v0, %v1589_v58  ;;  %v1099_v13 = vor.u32 %v1097_v42, %v1095_v50 }
  0x40   : > { %v1015_v51 = vpack.c.b16 %v1007_v5, %v1006_v3  ;;  %v335_v62 = vmul.f32 %v1775_v0, %v1590_v6  ;;  %v336_v14 = vmul.f32 %v1775_v0, %v1593_v8  ;;  %v337_v17 = vmul.f32 %v1775_v0, %v1594_v11  ;;  %v1539_v6 = vld [vmem:[%s1770_s27 + $0x64] sm:$0x3] }
  0x41   : > { %v1901_v60 = vsel %vm442_vm4, %v1838_v34, %v464_v9  ;;  %v1042_v7 = vshrl.u32 %v1014_v10, 16  ;;  %v1045_v15 = vshll.u32 %v1014_v10, 16  ;;  %v350_v22 = vadd.f32 %v1785_v4, %v334_v12 }
  0x42   : > { %v523_v18 = vshll.u32 %v1901_v60, 16  ;;  %v1050_v19 = vshrl.u32 %v1015_v51, 16  ;;  %v1053_v21 = vshll.u32 %v1015_v51, 16  ;;  %v351_v24 = vadd.f32 %v1785_v4, %v335_v62 }
  0x43   : > { %v1044_v23 = vrot.slane %v1042_v7, 7  ;;  %v352_v25 = vadd.f32 %v1785_v4, %v336_v14  ;;  %v353_v26 = vadd.f32 %v1785_v4, %v337_v17  ;;  %vm363_vm6 = vcmp.gt.f32.partialorder %v350_v22, 0.0 }
  0x44   : > { %v1909_v34 = vrot.slane %v523_v18, 1  ;;  %v1911_v27 = vrot.slane %v1050_v19, 7  ;;  %v376_v29 = vmul.f32 0.01, %v350_v22  ;;  %vm364_vm7 = vcmp.gt.f32.partialorder %v351_v24, 0.0  ;;  %v1570_v18 = vld [vmem:[%s2307_s1 + $0x38] sm:$0xff] }
  0x45   : > { %v1047_v32 = vor.u32 %v1045_v15, %v1044_v23  ;;  %vm365_vm8 = vcmp.gt.f32.partialorder %v352_v25, 0.0  ;;  %vm366_vm9 = vcmp.gt.f32.partialorder %v353_v26, 0.0  ;;  %v377_v37 = vmul.f32 0.01, %v351_v24  ;;  %1202 = vmatpush.bf16.msra.mxu2 %v1570_v18  ;;  %709 = vmatpush.bf16.msra.mxu0 %v1570_v18  ;;  %v1571_v18 = vld [vmem:[%s2307_s1 + $0x40] sm:$0xff] }
  0x46   : > { %v526_v33 = vsel %vm506_vm10, %v521_v1, %v1909_v34  ;;  %v1055_v36 = vor.u32 %v1053_v21, %v1911_v27  ;;  %v378_v38 = vmul.f32 0.01, %v352_v25  ;;  %v379_v40 = vmul.f32 0.01, %v353_v26 }
  0x47   : > { %563 = vrot.lane.b32.xlu1 %v526_v33, %s1715_s8  ;;  %v1920_v39 = vsel %vm442_vm4, %v1874_v20, %v1047_v32  ;;  %v389_v41 = vsel %vm363_vm6, %v350_v22, %v376_v29  ;;  %v1597_v42 = vunpack.c.l.bf16 %v1678_v30  ;;  %v390_v48 = vsel %vm364_vm7, %v351_v24, %v377_v37 }
  0x48   : > { %v1923_v44 = vsel %vm442_vm4, %v1044_v23, %v1055_v36  ;;  %v1101_v45 = vshll.u32 %v1920_v39, 16  ;;  %v1105_v46 = vshrl.u32 %v1920_v39, 16  ;;  %v391_v50 = vsel %vm365_vm8, %v352_v25, %v378_v38  ;;  %v1573_v36 = vld [vmem:[%s2307_s1 + $0x50] sm:$0xff] }
  0x49   : > { %v1109_v49 = vshll.u32 %v1923_v44, 16  ;;  %v392_v20 = vsel %vm366_vm9, %v353_v26, %v379_v40  ;;  %v402_v52 = vpack.c.bf16 %v389_v41, %v389_v41  ;;  %v403_v16 = vpack.c.bf16 %v390_v48, %v390_v48  ;;  %v1569_v26 = vld [vmem:[%s2307_s1 + $0x30] sm:$0xff] }
  0x4a   : > { %v1103_v53 = vrot.slane %v1101_v45, 1  ;;  %v404_v54 = vpack.c.bf16 %v391_v50, %v391_v50  ;;  %v405_v55 = vpack.c.bf16 %v392_v20, %v392_v20  ;;  %v1598_v58 = vunpack.c.h.bf16 %v1678_v30  ;;  %1203 = vmatpush.bf16.msra.mxu2 %v1569_v26  ;;  %710 = vmatpush.bf16.msra.mxu0 %v1569_v26 }
  0x4b   : > { %v1930_v56 = vrot.slane %v1109_v49, 1  ;;  %v428_v57 = vunpack.c.l.b16 %v402_v52  ;;  %v429_v3 = vunpack.c.l.b16 %v403_v16  ;;  %v527_v9 = vshrl.u32 %v1901_v60, 16 }
  0x4c   : > { %v1107_v1 = vor.u32 %v1105_v46, %v1103_v53  ;;  %v1104_v2 = vsel %vm506_vm10, %v1099_v13, %v1103_v53  ;;  %v430_v5 = vunpack.c.l.b16 %v404_v54  ;;  %v431_v8 = vunpack.c.l.b16 %v405_v55 }
  0x4d   : > { %1135 = vrot.lane.b32.xlu2 %v1104_v2, %s1715_s8  ;;  %v338_v10 = vmul.f32 %v1775_v0, %v1597_v42  ;;  %v339_v11 = vmul.f32 %v1775_v0, %v1598_v58  ;;  %v438_v51 = vpack.c.b16 %v429_v3, %v428_v57  ;;  %v1648_v62 = vunpack.c.h.bf16 %v1858_v59  ;;  %v1574_v59 = vld [vmem:[%s2307_s1 + $0x58] sm:$0xff] }
  0x4e   : > { %v1112_v12 = vsel %vm506_vm10, %v1107_v1, %v1930_v56  ;;  %v905_v14 = vunpack.c.l.bf16 %v1538_v61  ;;  %v439_v13 = vpack.c.b16 %v431_v8, %v430_v5  ;;  %v906_v17 = vunpack.c.l.bf16 %v1539_v6  ;;  %1249 = vmatpush.bf16.msra.mxu3 %v1574_v59  ;;  %756 = vmatpush.bf16.msra.mxu1 %v1574_v59  ;;  %v1567_v5 = vld [vmem:[%s2307_s1 + $0x20] sm:$0xff] }
  0x4f   : > { %1137 = vrot.lane.b32.xlu0 %v1112_v12, %s1715_s8  ;;  %v354_v7 = vadd.f32 %v1785_v4, %v338_v10  ;;  %v355_v15 = vadd.f32 %v1785_v4, %v339_v11  ;;  %v467_v19 = vshrl.u32 %v438_v51, 16  ;;  %v470_v21 = vshll.u32 %v438_v51, 16  ;;  %v311_v11 = vld [vmem:[%s1770_s27 + $0x30] sm:$0x3]  ;;  %v1572_v12 = vld [vmem:[%s2307_s1 + $0x48] sm:$0xff] }
  0x50   : > { %v917_v22 = vmul.f32 %v1775_v0, %v1648_v62  ;;  %v918_v23 = vmul.f32 %v1775_v0, %v905_v14  ;;  %v475_v24 = vshrl.u32 %v439_v13, 16  ;;  %v478_v25 = vshll.u32 %v439_v13, 16 }
  0x51   : > { %vm367_vm11 = vcmp.gt.f32.partialorder %v354_v7, 0.0  ;;  %vm368_vm12 = vcmp.gt.f32.partialorder %v355_v15, 0.0  ;;  %v469_v29 = vrot.slane %v467_v19, 7  ;;  %v380_v30 = vmul.f32 0.01, %v354_v7 }
  0x52   : > { %v381_v32 = vmul.f32 0.01, %v355_v15  ;;  %v919_v33 = vmul.f32 %v1775_v0, %v906_v17  ;;  %v1960_v37 = vrot.slane %v475_v24, 7  ;;  %v529_v38 = vor.u32 %v527_v9, %v1909_v34  ;;  %v1568_v34 = vld [vmem:[%s2307_s1 + $0x28] sm:$0xff]  ;;  %1250 = vmatpush.bf16.msra.mxu3 %v1573_v36  ;;  %757 = vmatpush.bf16.msra.mxu1 %v1573_v36 }
  0x53   : > { %v930_v40 = vadd.f32 %v1785_v4, %v917_v22  ;;  %v931_v41 = vadd.f32 %v1785_v4, %v918_v23  ;;  %v472_v42 = vor.u32 %v470_v21, %v469_v29  ;;  %v393_v45 = vsel %vm367_vm11, %v354_v7, %v380_v30  ;;  %1204 = vmatpush.bf16.msra.mxu2 %v1568_v34  ;;  %v1566_v23 = vld [vmem:[%s2307_s1 + $0x18] sm:$0xff] }
  0x54   : > { %v394_v46 = vsel %vm368_vm12, %v355_v15, %v381_v32  ;;  %v932_v48 = vadd.f32 %v1785_v4, %v919_v33  ;;  %v480_v49 = vor.u32 %v478_v25, %v1960_v37  ;;  %v406_v50 = vpack.c.bf16 %v393_v45, %v393_v45  ;;  %711 = vmatpush.bf16.msra.mxu0 %v1568_v34 }
  0x55   : > { %v407_v20 = vpack.c.bf16 %v394_v46, %v394_v46  ;;  %v1974_v52 = vsel %vm442_vm4, %v1891_v63, %v472_v42  ;;  %vm943_vm13 = vcmp.gt.f32.partialorder %v930_v40, 0.0  ;;  %vm944_vm14 = vcmp.gt.f32.partialorder %v931_v41, 0.0 }
  0x56   : > { %v956_v53 = vmul.f32 0.01, %v930_v40  ;;  %v1977_v16 = vsel %vm442_vm4, %v469_v29, %v480_v49  ;;  %v531_v54 = vshll.u32 %v1974_v52, 16  ;;  %v535_v55 = vshrl.u32 %v1974_v52, 16  ;;  %1251 = vmatpush.bf16.msra.mxu3 %v1572_v12  ;;  %758 = vmatpush.bf16.msra.mxu1 %v1572_v12 }
  0x57   : > { %v432_v57 = vunpack.c.l.b16 %v406_v50  ;;  %v539_v58 = vshll.u32 %v1977_v16, 16  ;;  %v433_v61 = vunpack.c.l.b16 %v407_v20  ;;  %vm945_vm15 = vcmp.gt.f32.partialorder %v932_v48, 0.0  ;;  %1205 = vmatpush.bf16.msra.mxu2 %v1567_v5 }
  0x58   : > { %v957_v63 = vmul.f32 0.01, %v931_v41  ;;  %v533_v1 = vrot.slane %v531_v54, 1  ;;  %v958_v2 = vmul.f32 0.01, %v932_v48  ;;  %v969_v3 = vsel %vm943_vm13, %v930_v40, %v956_v53  ;;  %712 = vmatpush.bf16.msra.mxu0 %v1567_v5 }
  0x59   : > { %v541_v6 = vrot.slane %v539_v58, 1  ;;  %v440_v8 = vpack.c.b16 %v433_v61, %v432_v57  ;;  %v982_v10 = vpack.c.bf16 %v969_v3, %v969_v3  ;;  %v324_v59 = vunpack.c.l.bf16 %v311_v11 }
  0x5a   : > { %v970_v9 = vsel %vm944_vm14, %v931_v41, %v957_v63  ;;  %v537_v51 = vor.u32 %v535_v55, %v533_v1  ;;  %v534_v62 = vsel %vm506_vm10, %v529_v38, %v533_v1  ;;  %v971_v14 = vsel %vm945_vm15, %v932_v48, %v958_v2  ;;  %1252 = vmatpush.bf16.msra.mxu3 %v1571_v18 }
  0x5b   : > { %v983_v13 = vpack.c.bf16 %v970_v9, %v970_v9  ;;  %565 = vrot.lane.b32.xlu2 %v534_v62, %s1715_s8  ;;  %v483_v7 = vshrl.u32 %v440_v8, 16  ;;  %v486_v15 = vshll.u32 %v440_v8, 16  ;;  %v984_v17 = vpack.c.bf16 %v971_v14, %v971_v14  ;;  %1206 = vmatpush.bf16.msra.mxu2 %v1566_v23 }
  0x5c   : > { %v542_v19 = vsel %vm506_vm10, %v537_v51, %v541_v6  ;;  %v1008_v21 = vunpack.c.l.b16 %v982_v10  ;;  %v543_v25 = vshrl.u32 %v1977_v16, 16  ;;  %vm577_vm0 = vcmask 1046528   ;;  %713 = vmatpush.bf16.msra.mxu0 %v1566_v23  ;;  %759 = vmatpush.bf16.msra.mxu1 %v1571_v18 }
  0x5d   : > { %v1009_v22 = vunpack.c.l.b16 %v983_v13  ;;  %567 = vrot.lane.b32.xlu1 %v542_v19, %s1715_s8  ;;  %v2001_v24 = vrot.slane %v483_v7, 7  ;;  %v1010_v26 = vunpack.c.l.b16 %v984_v17  ;;  %v340_v30 = vmul.f32 %v1775_v0, %v324_v59  ;;  %v1565_v0 = vld [vmem:[%s2307_s1 + $0x10] sm:$0xff] }
  0x5e   : > { %v1147_v32 = vrot.slane %v1831_v28, 1  ;;  %v1148_v33 = vrot.slane %v1834_v31, 1  ;;  %v1113_v40 = vshrl.u32 %v1923_v44, 16  ;;  %vm591_vm1 = vcmask 523264  }
  0x5f   : > { %v1016_v29 = vpack.c.b16 %v1009_v22, %v1008_v21  ;;  %v488_v36 = vor.u32 %v486_v15, %v2001_v24  ;;  %v1017_v38 = vpack.c.b16 %v1010_v26, %v1010_v26  ;;  %v356_v45 = vadd.f32 %v1785_v4, %v340_v30  ;;  %1207 = vmatpush.bf16.msra.mxu2 %v1565_v0 }
  0x60   : > { %v1149_v46 = vsel %vm577_vm0, %v1147_v32, %v1148_v33  ;;  %v545_v49 = vor.u32 %v543_v25, %v541_v6  ;;  %714 = vmatpush.bf16.msra.mxu0 %v1565_v0  ;;  %vm502_vm3 = vcmask 1041408   ;;  %v1115_v3 = vor.u32 %v1113_v40, %v1930_v56 }
  0x61   : > { %v1058_v41 = vshrl.u32 %v1016_v29, 16  ;;  %v1061_v42 = vshll.u32 %v1016_v29, 16  ;;  %v2018_v48 = vsel %vm442_vm4, %v1960_v37, %v488_v36  ;;  %v1066_v50 = vshrl.u32 %v1017_v38, 16  ;;  %1540 = vmatmul.msk.bf16.vlgmr.msra.gmra.mxu3 %vm591_vm1, %v1149_v46  ;;  %v1564_v37 = vld [vmem:[%s2307_s1 + $0x8] sm:$0xff] }
  0x62   : > { %v1069_v20 = vshll.u32 %v1017_v38, 16  ;;  %v547_v34 = vshll.u32 %v2018_v48, 16  ;;  %vm369_vm2 = vcmp.gt.f32.partialorder %v356_v45, 0.0  ;;  %v382_v53 = vmul.f32 0.01, %v356_v45 }
  0x63   : > { %v1060_v4 = vrot.slane %v1058_v41, 7  ;;  %v1068_v54 = vrot.slane %v1066_v50, 7  ;;  %1208 = vmatpush.bf16.msra.mxu2 %v1564_v37  ;;  %v551_v22 = vshrl.u32 %v2018_v48, 16  ;;  %v578_v38 = vrot.slane %v1845_v43, 1 }
  0x64   : > { %v549_v55 = vrot.slane %v547_v34, 1  ;;  %v395_v58 = vsel %vm369_vm2, %v356_v45, %v382_v53  ;;  %715 = vmatpush.bf16.msra.mxu0 %v1564_v37  ;;  %v1150_v41 = vrot.slane %v1884_v35, 1  ;;  %v581_v45 = vrot.slane %v1901_v60, 1 }
  0x65   : > { %v1063_v57 = vor.u32 %v1061_v42, %v1060_v4  ;;  %v1071_v61 = vor.u32 %v1069_v20, %v1068_v54  ;;  %v408_v63 = vpack.c.bf16 %v395_v58, %v395_v58  ;;  %v1152_v46 = vrot.slane %v1920_v39, 1 }
  0x66   : > { %v550_v1 = vsel %vm506_vm10, %v545_v49, %v549_v55  ;;  %v553_v29 = vor.u32 %v551_v22, %v549_v55  ;;  %v1151_v42 = vsel %vm577_vm0, %v1148_v33, %v1150_v41  ;;  %v583_v33 = vrot.slane %v1974_v52, 1 }
  0x67   : > { %v2028_v2 = vsel %vm442_vm4, %v1911_v27, %v1063_v57  ;;  %569 = vrot.lane.b32.xlu0 %v550_v1, %s1715_s8  ;;  %v1072_v5 = vsel %vm442_vm4, %v1060_v4, %v1071_v61  ;;  %v434_v9 = vunpack.c.l.b16 %v408_v63  ;;  %v1563_v27 = vld [vmem:[%s2307_s1] sm:$0xff]  ;;  %v1153_v49 = vsel %vm577_vm0, %v1150_v41, %v1152_v46 }
  0x68   : > { %v1117_v6 = vshll.u32 %v2028_v2, 16  ;;  %v1121_v8 = vshrl.u32 %v2028_v2, 16  ;;  %v2036_v10 = vsel %vm502_vm3, %v1072_v5, 0  ;;  %1209 = vmatpush.bf16.msra.mxu2 %v1563_v27  ;;  %716 = vmatpush.bf16.msra.mxu0 %v1563_v27  ;;  %v584_v34 = vsel %vm577_vm0, %v581_v45, %v583_v33 }
  0x69   : > { %v1124_v56 = vshll.u32 %v2036_v10, 16  ;;  %v1128_v12 = vshrl.u32 %v2036_v10, 16  ;;  %v441_v51 = vpack.c.b16 %v434_v9, %v434_v9  ;;  %v1154_v54 = vrot.slane %v1923_v44, 1 }
  0x6a   : > { %v1119_v11 = vrot.slane %v1117_v6, 1  ;;  %v585_v58 = vrot.slane %v1977_v16, 1  ;;  %v1156_v1 = vrot.slane %v2028_v2, 1  ;;  %v587_v5 = vrot.slane %v2018_v48, 1 }
  0x6b   : > { %v1126_v14 = vrot.slane %v1124_v56, 1  ;;  %v491_v7 = vshrl.u32 %v441_v51, 16  ;;  %v494_v15 = vshll.u32 %v441_v51, 16  ;;  %v1155_v55 = vsel %vm577_vm0, %v1152_v46, %v1154_v54 }
  0x6c   : > { %v1123_v62 = vor.u32 %v1121_v8, %v1119_v11  ;;  %v1120_v13 = vsel %vm506_vm10, %v1115_v3, %v1119_v11  ;;  %v586_v37 = vsel %vm577_vm0, %v583_v33, %v585_v58  ;;  %v1157_v3 = vsel %vm577_vm0, %v1154_v54, %v1156_v1 }
  0x6d   : > { %1139 = vrot.lane.b32.xlu2 %v1120_v13, %s1715_s8  ;;  %v1130_v18 = vor.u32 %v1128_v12, %v1126_v14  ;;  %v493_v19 = vrot.slane %v491_v7, 7  ;;  %v588_v6 = vsel %vm577_vm0, %v585_v58, %v587_v5  ;;  %v1158_v9 = vrot.slane %v2036_v10, 1 }
  0x6e   : > { %v1127_v17 = vsel %vm506_vm10, %v1123_v62, %v1126_v14 }
  0x6f   : > { %1141 = vrot.lane.b32.xlu1 %v1127_v17, %s1715_s8  ;;  %1143 = vrot.lane.b32.xlu0 %v1130_v18, %s1715_s8  ;;  %v496_v21 = vor.u32 %v494_v15, %v493_v19  ;;  %v1159_v11 = vsel %vm577_vm0, %v1156_v1, %v1158_v9 }
  0x71   : > { %v497_v23 = vsel %vm442_vm4, %v2001_v24, %v496_v21  ;;  %v579_v24 = vrot.slane %v1848_v47, 1  ;;  %1541 = vmatmul.msk.bf16.gmra.mxu3 %vm591_vm1, %v1151_v42  ;;  %vm806_vm4 = vcmask 1042432  }
  0x72   : > { %v2052_v59 = vsel %vm502_vm3, %v497_v23, 0 }
  0x73   : > { %v554_v25 = vshll.u32 %v2052_v59, 16  ;;  %v558_v26 = vshrl.u32 %v2052_v59, 16  ;;  %v580_v40 = vsel %vm577_vm0, %v578_v38, %v579_v24  ;;  %v582_v0 = vsel %vm577_vm0, %v579_v24, %v581_v45 }
  0x74   : > { %1520 = vmatmul.msk.bf16.vlgmr.msra.gmra.mxu1 %vm591_vm1, %v580_v40  ;;  %v589_v56 = vrot.slane %v2052_v59, 1 }
  0x75   : > { %v556_v30 = vrot.slane %v554_v25, 1 }
  0x76   : > { %v590_v12 = vsel %vm577_vm0, %v587_v5, %v589_v56 }
  0x77   : > { %v560_v32 = vor.u32 %v558_v26, %v556_v30  ;;  %v557_v36 = vsel %vm506_vm10, %v553_v29, %v556_v30  ;;  %vm875_vm10 = vsmask.f32 1280 }
  0x78   : > { %571 = vrot.lane.b32.xlu2 %v557_v36, %s1715_s8  ;;  %vm2284_vm6 = vmand %vm502_vm3, %vm875_vm10 }
  0x79   : > { %573 = vrot.lane.b32.xlu1 %v560_v32, %s1715_s8 }
  0x81   : > { %1542 = vmatmul.msk.bf16.gmra.mxu3 %vm591_vm1, %v1153_v49 }
  0x84   : > { %1521 = vmatmul.msk.bf16.gmra.mxu1 %vm591_vm1, %v582_v0 }
  0x91   : > { %1543 = vmatmul.msk.bf16.gmra.mxu3 %vm591_vm1, %v1155_v55 }
  0x94   : > { %1522 = vmatmul.msk.bf16.gmra.mxu1 %vm591_vm1, %v584_v34 }
  0xa0   : > { %v1132_v50 = vpop.permute.xlu0 %1131 }
  0xa1   : > { %v1161_v20 = vsel %vm591_vm1, %v1831_v28, %v1132_v50  ;;  %1544 = vmatmul.msk.bf16.gmra.mxu3 %vm591_vm1, %v1157_v3 }
  0xa2   : > { %1210 = vmatmul.bf16.vlgmr.msra.gmra.mxu2 %v1161_v20 }
  0xa4   : > { %1523 = vmatmul.msk.bf16.gmra.mxu1 %vm591_vm1, %v586_v37 }
  0xa7   : > { %v1136_v63 = vpop.permute.xlu2 %1135 }
  0xa8   : > { %v562_v4 = vpop.permute.xlu0 %561 }
  0xa9   : > { %v593_v53 = vsel %vm591_vm1, %v1845_v43, %v562_v4 }
  0xaa   : > { %717 = vmatmul.bf16.vlgmr.msra.gmra.mxu0 %v593_v53 }
  0xb0   : > { %v1134_v57 = vpop.permute.xlu1 %1133 }
  0xb1   : > { %v1164_v28 = vsel %vm591_vm1, %v1834_v31, %v1134_v57  ;;  %v1167_v31 = vsel %vm591_vm1, %v1884_v35, %v1136_v63  ;;  %1545 = vmatmul.msk.bf16.gmra.mxu3 %vm591_vm1, %v1159_v11 }
  0xb2   : > { %1215 = vmatmul.bf16.gmra.mxu2 %v1164_v28 }
  0xb4   : > { %1524 = vmatmul.msk.bf16.gmra.mxu1 %vm591_vm1, %v588_v6 }
  0xb5   : > { %v566_v8 = vpop.permute.xlu2 %565 }
  0xb9   : > { %v564_v61 = vpop.permute.xlu1 %563 }
  0xba   : > { %v596_v43 = vsel %vm591_vm1, %v1848_v47, %v564_v61  ;;  %v599_v47 = vsel %vm591_vm1, %v1901_v60, %v566_v8 }
  0xbb   : > { %722 = vmatmul.bf16.gmra.mxu0 %v596_v43 }
  0xc1   : > { %v1138_v27 = vpop.permute.xlu0 %1137  ;;  %1546 = vmatmul.msk.bf16.gmra.mxu3 %vm591_vm1, %v1158_v9 }
  0xc2   : > { %1220 = vmatmul.bf16.gmra.mxu2 %v1167_v31  ;;  %v1170_v35 = vsel %vm591_vm1, %v1920_v39, %v1138_v27 }
  0xc4   : > { %1525 = vmatmul.msk.bf16.gmra.mxu1 %vm591_vm1, %v590_v12 }
  0xc7   : > { %v1140_v62 = vpop.permute.xlu2 %1139 }
  0xc8   : > { %v1173_v14 = vsel %vm591_vm1, %v1923_v44, %v1140_v62 }
  0xcb   : > { %727 = vmatmul.bf16.gmra.mxu0 %v599_v47 }
  0xcf   : > { %v568_v51 = vpop.permute.xlu1 %567 }
  0xd0   : > { %v602_v60 = vsel %vm591_vm1, %v1974_v52, %v568_v51 }
  0xd2   : > { %1225 = vmatmul.bf16.gmra.mxu2 %v1170_v35  ;;  %v572_v52 = vpop.permute.xlu2 %571 }
  0xd3   : > { %v608_v17 = vsel %vm591_vm1, %v2018_v48, %v572_v52 }
  0xd4   : > { %1526 = vmatmul.msk.bf16.gmra.mxu1 %vm591_vm1, %v589_v56 }
  0xd9   : > { %v570_v39 = vpop.permute.xlu0 %569 }
  0xda   : > { %v605_v13 = vsel %vm591_vm1, %v1977_v16, %v570_v39 }
  0xdb   : > { %732 = vmatmul.bf16.gmra.mxu0 %v602_v60 }
  0xe1   : > { %v1142_v7 = vpop.permute.xlu1 %1141  ;;  %v1144_v18 = vpop.permute.xlu0 %1143 }
  0xe2   : > { %1230 = vmatmul.bf16.gmra.mxu2 %v1173_v14  ;;  %v1176_v15 = vsel %vm591_vm1, %v2028_v2, %v1142_v7  ;;  %v1179_v44 = vsel %vm591_vm1, %v2036_v10, %v1144_v18  ;;  %v2128_v10 = vld [vmem:[%s2308_s2] ss:$0 sm:$0xff] }
  0xe4   : > { %v1254_v19 = vpop.f32.mrf.mxu3 }
  0xeb   : > { %737 = vmatmul.bf16.gmra.mxu0 %v605_v13  ;;  %v574_v22 = vpop.permute.xlu1 %573 }
  0xec   : > { %v611_v16 = vsel %vm591_vm1, %v2052_v59, %v574_v22  ;;  %v1256_v25 = vpop.f32.mrf.mxu3 }
  0xf1   : > { %v761_v21 = vpop.f32.mrf.mxu1 }
  0xf2   : > { %1235 = vmatmul.bf16.gmra.mxu2 %v1176_v15 }
  0xf4   : > { %v1259_v26 = vpop.f32.mrf.mxu3 }
  0xf9   : > { %v763_v23 = vpop.f32.mrf.mxu1 }
  0xfb   : > { %742 = vmatmul.bf16.gmra.mxu0 %v608_v17 }
  0xfc   : > { %v1261_v30 = vpop.f32.mrf.mxu3 }
 0x101   : > { %v766_v2 = vpop.f32.mrf.mxu1 }
 0x102   : > { %1240 = vmatmul.bf16.gmra.mxu2 %v1179_v44 }
 0x104   : > { %v1264_v32 = vpop.f32.mrf.mxu3 }
 0x109   : > { %v768_v29 = vpop.f32.mrf.mxu1 }
 0x10b   : > { %747 = vmatmul.bf16.gmra.mxu0 %v611_v16 }
 0x10c   : > { %v2130_v40 = vpop.f32.mrf.mxu3 }
 0x111   : > { %v771_v48 = vpop.f32.mrf.mxu1 }
 0x114   : > { %v1269_v33 = vpop.f32.mrf.mxu3 }
 0x119   : > { %v773_v24 = vpop.f32.mrf.mxu1 }
 0x11c   : > { %v2152_v61 = vpop.f32.mrf.mxu3 }
 0x121   : > { %v776_v20 = vpop.f32.mrf.mxu1 }
 0x124   : > { %v1274_v47 = vpop.f32.mrf.mxu3 }
 0x125   : > { %v1211_v36 = vpop.f32.mrf.mxu2 }
 0x126   : > { %v1212_v41 = vadd.f32 %v2128_v10, %v1211_v36 }
 0x127   : > { %v718_v38 = vpop.f32.mrf.mxu0 }
 0x128   : > { %v719_v59 = vadd.f32 %v2128_v10, %v718_v38  ;;  %v2135_v49 = vadd.f32 %v1254_v19, %v1212_v41 }
 0x129   : > { %v778_v37 = vpop.f32.mrf.mxu1 }
 0x12a   : > { %v762_v0 = vadd.f32 %v761_v21, %v719_v59  ;;  %v1341_v55 = vpack.c.bf16 %v2135_v49, %v2135_v49 }
 0x12c   : > { %v816_v34 = vmul.f32 %v762_v0, %v762_v0  ;;  %1547 = vst [vmem:[%s2142_s17 + $0x34] sm:$0xf] %v1341_v55  ;;  %v2171_v62 = vpop.f32.mrf.mxu3 }
 0x12d   : > { %v1213_v42 = vpop.f32.mrf.mxu2 }
 0x12e   : > { %v1214_v3 = vadd.f32 %v2128_v10, %v1213_v42 }
 0x12f   : > { %v720_v45 = vpop.f32.mrf.mxu0 }
 0x130   : > { %v721_v46 = vadd.f32 %v2128_v10, %v720_v45  ;;  %v1257_v11 = vadd.f32 %v1256_v25, %v1214_v3  ;;  %v1308_v3 = vmul.f32 %v2135_v49, %v2135_v49 }
 0x131   : > { %v2160_v8 = vpop.f32.mrf.mxu1 }
 0x132   : > { %v764_v50 = vadd.f32 %v763_v23, %v721_v46 }
 0x134   : > { %v2144_v4 = vadd.f32 %v764_v50, %v762_v0  ;;  %v817_v53 = vmul.f32 %v764_v50, %v764_v50  ;;  %v1602_v54 = vpack.c.bf16 %v764_v50, %v762_v0  ;;  %v2181_v44 = vpop.f32.mrf.mxu3 }
 0x135   : > { %v1216_v57 = vpop.f32.mrf.mxu2 }
 0x136   : > { %v2148_v28 = vadd.f32 %v817_v53, %v816_v34  ;;  %1603 = vst [vmem:[%s2142_s17] sm:$0xff] %v1602_v54   ;;  %v1217_v63 = vadd.f32 %v2128_v10, %v1216_v57 }
 0x138   : > { %v723_v58 = vpop.f32.mrf.mxu0  ;;  %v2158_v6 = vadd.f32 %v1259_v26, %v1217_v63  ;;  %v1309_v63 = vmul.f32 %v1257_v11, %v1257_v11 }
 0x139   : > { %v724_v1 = vadd.f32 %v2128_v10, %v723_v58  ;;  %v783_v60 = vpop.f32.mrf.mxu1 }
 0x13a   : > { %v1652_v12 = vpack.c.bf16 %v2158_v6, %v1257_v11 }
 0x13b   : > { %v2162_v9 = vadd.f32 %v766_v2, %v724_v1 }
 0x13c   : > { %1689 = vst [vmem:[%s2142_s17 + $0x38] sm:$0xff] %v1652_v12  }
 0x13d   : > { %v1218_v43 = vpop.f32.mrf.mxu2 }
 0x13e   : > { %v1219_v7 = vadd.f32 %v2128_v10, %v1218_v43 }
 0x140   : > { %v725_v31 = vpop.f32.mrf.mxu0  ;;  %v1262_v22 = vadd.f32 %v1261_v30, %v1219_v7 }
 0x141   : > { %v726_v5 = vadd.f32 %v2128_v10, %v725_v31  ;;  %v2179_v18 = vpop.f32.mrf.mxu1  ;;  %v1310_v31 = vmul.f32 %v2158_v6, %v2158_v6 }
 0x143   : > { %v2164_v27 = vadd.f32 %v768_v29, %v726_v5  ;;  %v2194_v29 = vpop.f32.mrf.mxu3 }
 0x145   : > { %v1607_v35 = vpack.c.bf16 %v2164_v27, %v2162_v9  ;;  %v1221_v56 = vpop.f32.mrf.mxu2 }
 0x146   : > { %v1222_v39 = vadd.f32 %v2128_v10, %v1221_v56  ;;  %v1288_v56 = vadd.f32 %v1257_v11, %v2135_v49 }
 0x147   : > { %1679 = vst [vmem:[%s2142_s17 + $0x8] sm:$0xff] %v1607_v35  }
 0x148   : > { %v728_v51 = vpop.f32.mrf.mxu0  ;;  %v2177_v17 = vadd.f32 %v1264_v32, %v1222_v39  ;;  %v1289_v7 = vadd.f32 %v1288_v56, %v2158_v6 }
 0x149   : > { %v729_v13 = vadd.f32 %v2128_v10, %v728_v51  ;;  %v2192_v26 = vpop.f32.mrf.mxu1  ;;  %v1321_v51 = vadd.f32 %v1309_v63, %v1308_v3 }
 0x14a   : > { %v1657_v25 = vpack.c.bf16 %v2177_v17, %v1262_v22  ;;  %v1312_v49 = vmul.f32 %v2177_v17, %v2177_v17  ;;  %v1290_v11 = vadd.f32 %v1289_v7, %v1262_v22 }
 0x14b   : > { %v2183_v19 = vadd.f32 %v771_v48, %v729_v13  ;;  %v2206_v0 = vpop.f32.mrf.mxu3 }
 0x14c   : > { %1690 = vst [vmem:[%s2142_s17 + $0x40] sm:$0xff] %v1657_v25  }
 0x14d   : > { %v1223_v14 = vpop.f32.mrf.mxu2  ;;  %v820_v6 = vmul.f32 %v2183_v19, %v2183_v19 }
 0x14e   : > { %v1224_v36 = vadd.f32 %v2128_v10, %v1223_v14  ;;  %v1311_v14 = vmul.f32 %v1262_v22, %v1262_v22 }
 0x150   : > { %v730_v15 = vpop.f32.mrf.mxu0  ;;  %v1267_v46 = vadd.f32 %v2130_v40, %v1224_v36 }
 0x151   : > { %v731_v52 = vadd.f32 %v2128_v10, %v730_v15  ;;  %v2204_v45 = vpop.f32.mrf.mxu1  ;;  %v1322_v15 = vadd.f32 %v1321_v51, %v1310_v31 }
 0x152   : > { %v1313_v25 = vmul.f32 %v1267_v46, %v1267_v46 }
 0x153   : > { %v2185_v21 = vadd.f32 %v773_v24, %v731_v52 }
 0x155   : > { %v1612_v16 = vpack.c.bf16 %v2185_v21, %v2183_v19  ;;  %v1226_v23 = vpop.f32.mrf.mxu2  ;;  %v821_v36 = vmul.f32 %v2185_v21, %v2185_v21 }
 0x156   : > { %v1227_v48 = vadd.f32 %v2128_v10, %v1226_v23  ;;  %v1323_v23 = vadd.f32 %v1322_v15, %v1311_v14 }
 0x157   : > { %1680 = vst [vmem:[%s2142_s17 + $0x10] sm:$0xff] %v1612_v16  }
 0x158   : > { %v733_v2 = vpop.f32.mrf.mxu0  ;;  %v1270_v59 = vadd.f32 %v1269_v33, %v1227_v48  ;;  %v1286_v33 = vpop.f32.mrf.mxu3 }
 0x159   : > { %v734_v30 = vadd.f32 %v2128_v10, %v733_v2  ;;  %v793_v55 = vpop.f32.mrf.mxu1 }
 0x15a   : > { %v1662_v53 = vpack.c.bf16 %v1270_v59, %v1267_v46 }
 0x15b   : > { %v2200_v41 = vadd.f32 %v776_v20, %v734_v30  ;;  %v1324_v30 = vadd.f32 %v1323_v23, %v1312_v49 }
 0x15c   : > { %1691 = vst [vmem:[%s2142_s17 + $0x48] sm:$0xff] %v1662_v53  }
 0x15d   : > { %v1228_v32 = vpop.f32.mrf.mxu2 }
 0x160   : > { %v735_v38 = vpop.f32.mrf.mxu0 }
 0x161   : > { %v736_v24 = vadd.f32 %v2128_v10, %v735_v38 }
 0x163   : > { %v2202_v42 = vadd.f32 %v778_v37, %v736_v24  ;;  %v1229_v37 = vadd.f32 %v2128_v10, %v1228_v32  ;;  %v1291_v32 = vadd.f32 %v1290_v11, %v2177_v17  ;;  %v1325_v24 = vadd.f32 %v1324_v30, %v1313_v25 }
 0x164   : > { %v822_v17 = vmul.f32 %v2200_v41, %v2200_v41 }
 0x165   : > { %v1617_v50 = vpack.c.bf16 %v2202_v42, %v2200_v41  ;;  %v1231_v34 = vpop.f32.mrf.mxu2  ;;  %v1272_v12 = vadd.f32 %v2152_v61, %v1229_v37  ;;  %v796_v61 = vadd.f32 %v2144_v4, %v2162_v9  ;;  %v1292_v22 = vadd.f32 %v1291_v32, %v1267_v46 }
 0x166   : > { %v1232_v57 = vadd.f32 %v2128_v10, %v1231_v34 }
 0x167   : > { %1681 = vst [vmem:[%s2142_s17 + $0x18] sm:$0xff] %v1617_v50   ;;  %v797_v2 = vadd.f32 %v796_v61, %v2164_v27  ;;  %v1293_v53 = vadd.f32 %v1292_v22, %v1270_v59 }
 0x168   : > { %v738_v54 = vpop.f32.mrf.mxu0  ;;  %v1275_v1 = vadd.f32 %v1274_v47, %v1232_v57  ;;  %v818_v47 = vmul.f32 %v2162_v9, %v2162_v9 }
 0x169   : > { %v739_v58 = vadd.f32 %v2128_v10, %v738_v54  ;;  %v798_v9 = vadd.f32 %v797_v2, %v2183_v19  ;;  %v1315_v54 = vmul.f32 %v1272_v12, %v1272_v12  ;;  %v1294_v57 = vadd.f32 %v1293_v53, %v1272_v12 }
 0x16a   : > { %v830_v16 = vadd.f32 %v2148_v28, %v818_v47  ;;  %v1314_v28 = vmul.f32 %v1270_v59, %v1270_v59  ;;  %v1316_v37 = vmul.f32 %v1275_v1, %v1275_v1 }
 0x16b   : > { %v2222_v5 = vadd.f32 %v2160_v8, %v739_v58  ;;  %v1667_v8 = vpack.c.bf16 %v1275_v1, %v1272_v12  ;;  %v823_v58 = vmul.f32 %v2202_v42, %v2202_v42 }
 0x16c   : > { %v1326_v46 = vadd.f32 %v1325_v24, %v1314_v28 }
 0x16d   : > { %v1233_v20 = vpop.f32.mrf.mxu2  ;;  %1692 = vst [vmem:[%s2142_s17 + $0x50] sm:$0xff] %v1667_v8   ;;  %v824_v31 = vmul.f32 %v2222_v5, %v2222_v5 }
 0x16e   : > { %v1234_v4 = vadd.f32 %v2128_v10, %v1233_v20  ;;  %v1327_v3 = vadd.f32 %v1326_v46, %v1315_v54 }
 0x170   : > { %v740_v43 = vpop.f32.mrf.mxu0  ;;  %v1277_v33 = vadd.f32 %v2171_v62, %v1234_v4  ;;  %v1295_v62 = vadd.f32 %v1294_v57, %v1275_v1 }
 0x171   : > { %v741_v40 = vadd.f32 %v2128_v10, %v740_v43 }
 0x172   : > { %v1317_v56 = vmul.f32 %v1277_v33, %v1277_v33 }
 0x173   : > { %v2224_v35 = vadd.f32 %v783_v60, %v741_v40  ;;  %v819_v60 = vmul.f32 %v2164_v27, %v2164_v27  ;;  %v799_v27 = vadd.f32 %v798_v9, %v2185_v21 }
 0x175   : > { %v1622_v39 = vpack.c.bf16 %v2224_v35, %v2222_v5  ;;  %v1236_v13 = vpop.f32.mrf.mxu2  ;;  %v831_v48 = vadd.f32 %v830_v16, %v819_v60  ;;  %v800_v21 = vadd.f32 %v799_v27, %v2200_v41  ;;  %v825_v1 = vmul.f32 %v2224_v35, %v2224_v35  ;;  %v877_v27 = vld [vmem:[%s2142_s17 + $0x30] sm:$0x3] }
 0x176   : > { %v1237_v50 = vadd.f32 %v2128_v10, %v1236_v13 }
 0x177   : > { %1682 = vst [vmem:[%s2142_s17 + $0x20] sm:$0xff] %v1622_v39   ;;  %v832_v38 = vadd.f32 %v831_v48, %v820_v6  ;;  %v801_v14 = vadd.f32 %v800_v21, %v2202_v42  ;;  %v1296_v39 = vadd.f32 %v1295_v62, %v1277_v33 }
 0x178   : > { %v743_v52 = vpop.f32.mrf.mxu0  ;;  %v1280_v59 = vadd.f32 %v2181_v44, %v1237_v50  ;;  %v1328_v44 = vadd.f32 %v1327_v3, %v1316_v37 }
 0x179   : > { %v833_v55 = vadd.f32 %v832_v38, %v821_v36  ;;  %v744_v20 = vadd.f32 %v2128_v10, %v743_v52 }
 0x17a   : > { %v1318_v13 = vmul.f32 %v1280_v59, %v1280_v59  ;;  %v1329_v42 = vadd.f32 %v1328_v44, %v1317_v56  ;;  %v1297_v60 = vadd.f32 %v1296_v39, %v1280_v59  ;;  %v1559_v39 = vld [vmem:[%s2142_s17 + $0x64] sm:$0x3] }
 0x17b   : > { %v834_v40 = vadd.f32 %v833_v55, %v822_v17  ;;  %v787_v12 = vadd.f32 %v2179_v18, %v744_v20  ;;  %v802_v18 = vadd.f32 %v801_v14, %v2222_v5 }
 0x17c   : > { %v1330_v5 = vadd.f32 %v1329_v42, %v1318_v13 }
 0x17d   : > { %v1238_v34 = vpop.f32.mrf.mxu2  ;;  %v835_v41 = vadd.f32 %v834_v40, %v823_v58  ;;  %v803_v11 = vadd.f32 %v802_v18, %v2224_v35  ;;  %v826_v52 = vmul.f32 %v787_v12, %v787_v12 }
 0x17e   : > { %v1239_v19 = vadd.f32 %v2128_v10, %v1238_v34 }
 0x17f   : > { %v836_v15 = vadd.f32 %v835_v41, %v824_v31  ;;  %v804_v32 = vadd.f32 %v803_v11, %v787_v12 }
 0x180   : > { %v745_v43 = vpop.f32.mrf.mxu0  ;;  %v1282_v51 = vadd.f32 %v2194_v29, %v1239_v19  ;;  %v1672_v29 = vpack.c.bf16 %v1280_v59, %v1277_v33 }
 0x181   : > { %v746_v63 = vadd.f32 %v2128_v10, %v745_v43  ;;  %v837_v6 = vadd.f32 %v836_v15, %v825_v1 }
 0x182   : > { %v1319_v49 = vmul.f32 %v1282_v51, %v1282_v51  ;;  %v1352_v61 = vpack.c.bf16 %v1282_v51, %v1282_v51  ;;  %1693 = vst [vmem:[%s2142_s17 + $0x58] sm:$0xff] %v1672_v29   ;;  %v1298_v25 = vadd.f32 %v1297_v60, %v1282_v51 }
 0x183   : > { %v789_v47 = vadd.f32 %v2192_v26, %v746_v63  ;;  %v838_v22 = vadd.f32 %v837_v6, %v826_v52 }
 0x184   : > { %1558 = vst [vmem:[%s2142_s17 + $0x60] sm:$0xf] %v1352_v61  ;;  %v1331_v4 = vadd.f32 %v1330_v5, %v1319_v49 }
 0x185   : > { %v1627_v7 = vpack.c.bf16 %v789_v47, %v787_v12  ;;  %v1241_v8 = vpop.f32.mrf.mxu2  ;;  %v827_v48 = vmul.f32 %v789_v47, %v789_v47 }
 0x186   : > { %v1242_v26 = vadd.f32 %v2128_v10, %v1241_v8 }
 0x187   : > { %1683 = vst [vmem:[%s2142_s17 + $0x28] sm:$0xff] %v1627_v7   ;;  %v839_v17 = vadd.f32 %v838_v22, %v827_v48 }
 0x188   : > { %v1285_v16 = vadd.f32 %v2206_v0, %v1242_v26  ;;  %v748_v23 = vpop.f32.mrf.mxu0  ;;  %v805_v0 = vadd.f32 %v804_v32, %v789_v47 }
 0x189   : > { %v749_v2 = vadd.f32 %v2128_v10, %v748_v23 }
 0x18a   : > { %v1299_v30 = vsel %vm806_vm4, %v1285_v16, 0.0  ;;  %v1320_v36 = vmul.f32 %v1285_v16, %v1285_v16  ;;  %v1353_v47 = vpack.c.bf16 %v1285_v16, %v1285_v16 }
 0x18b   : > { %v1300_v35 = vadd.f32 %v1299_v30, %v1298_v25  ;;  %v792_v9 = vadd.f32 %v2204_v45, %v749_v2 }
 0x18c   : > { %v1332_v28 = vsel %vm806_vm4, %v1320_v36, 0.0  ;;  %v1368_v1 = vsel %vm2284_vm6, %v1353_v47, %v1559_v39 }
 0x18d   : > { %v1301_v38 = vrot.slane %v1300_v35, 4  ;;  %v1333_v24 = vadd.f32 %v1332_v28, %v1331_v4  ;;  %v807_v50 = vsel %vm806_vm4, %v792_v9, 0.0  ;;  %v828_v34 = vmul.f32 %v792_v9, %v792_v9  ;;  %v1243_v53 = vpop.f32.mrf.mxu2  ;;  %1560 = vst [vmem:[%s2142_s17 + $0x64] sm:$0x3] %v1368_v1 }
 0x18e   : > { %v808_v45 = vadd.f32 %v807_v50, %v805_v0  ;;  %v861_v54 = vpack.c.bf16 %v792_v9, %v792_v9 }
 0x18f   : > { %v1302_v55 = vadd.f32 %v1301_v38, %v1300_v35  ;;  %v1334_v33 = vrot.slane %v1333_v24, 4  ;;  %v840_v20 = vsel %vm806_vm4, %v828_v34, 0.0 }
 0x190   : > { %v809_v19 = vrot.slane %v808_v45, 4  ;;  %v841_v46 = vadd.f32 %v840_v20, %v839_v17  ;;  %v878_v57 = vsel %vm2284_vm6, %v861_v54, %v877_v27  ;;  %v750_v58 = vpop.f32.mrf.mxu0 }
 0x191   : > { %v1303_v37 = vrot.slane %v1302_v55, 2  ;;  %v1335_v43 = vadd.f32 %v1334_v33, %v1333_v24  ;;  %879 = vst [vmem:[%s2142_s17 + $0x30] sm:$0x3] %v878_v57 }
 0x192   : > { %v810_v21 = vadd.f32 %v809_v19, %v808_v45  ;;  %v842_v59 = vrot.slane %v841_v46, 4 }
 0x193   : > { %v1304_v63 = vadd.f32 %v1303_v37, %v1302_v55  ;;  %v1336_v40 = vrot.slane %v1335_v43, 2 }
 0x194   : > { %v811_v3 = vrot.slane %v810_v21, 2  ;;  %v843_v62 = vadd.f32 %v842_v59, %v841_v46 }
 0x195   : > { %v1337_v31 = vadd.f32 %v1336_v40, %v1335_v43  ;;  %v1305_v56 = vrot.slane %v1304_v63, 1 }
 0x196   : > { %v812_v12 = vadd.f32 %v811_v3, %v810_v21  ;;  %v844_v51 = vrot.slane %v843_v62, 2 }
 0x197   : > { %v1338_v14 = vrot.slane %v1337_v31, 1  ;;  %v1306_v13 = vadd.f32 %v1305_v56, %v1304_v63 }
 0x198   : > { %v813_v41 = vrot.slane %v812_v12, 1  ;;  %v845_v44 = vadd.f32 %v844_v51, %v843_v62 }
 0x199   : > { %v1339_v18 = vadd.f32 %v1338_v14, %v1337_v31 }
 0x19a   : > { %v814_v7 = vadd.f32 %v813_v41, %v812_v12  ;;  %v846_v8 = vrot.slane %v845_v44, 1 }
 0x19c   : > { %v847_v15 = vadd.f32 %v846_v8, %v845_v44  ;;  %v1307_v29 = vadd.f32 %v1306_v13, %v814_v7 }
 0x19e   : > { %v1340_v26 = vadd.f32 %v1339_v18, %v847_v15 }
 0x1a0   : > { %v1371_v42 = vsel %vm499_vm5, %v1307_v29, %v1340_v26 }
 0x1a1   : > { %1372 = vst [vmem:[%s270_s19] sm:$0x3] %v1371_v42 }
 0x1a2 PF: > { %s17_s21 = sadd.s32 1, %s1713_s21  }
 0x1a3   : > { %p14_p5 = scmp.ge.s32.totalorder %s17_s21, 6  }
 0x1a5   :  { %16 = sbr.rel (!%p14_p5) target bundleno = 1 (0x1), region = 84 }

// kernel: gabor_nn_1d_forward.5
= control target key start
LH: loop header
LB: loop body
LE: loop exit
PB: predicated region body
PF: predicated region fallthrough
CT: control target
= control target key end

     0   :  { %s1826_s21 = smov 0   ;;  %s2695_s0 = inlined_call_operand.vmem [shape: bf16[8,99,32], index: 0, kind: input, shape index: {}]   ;;  %s2696_s1 = inlined_call_operand.vmem [shape: bf16[160,64], index: 1, kind: input, shape index: {}]   ;;  %s2697_s2 = inlined_call_operand.vmem [shape: f32[1,64], index: 2, kind: input, shape index: {}]   ;;  %s2698_s3 = inlined_call_operand.vmem [shape: f32[1,32], index: 3, kind: input, shape index: {}]   ;;  %s2699_s4 = inlined_call_operand.vmem [shape: f32[1,32], index: 4, kind: input, shape index: {}]   ;;  %s2700_s5 = inlined_call_operand.vmem [shape: bf16[8,99,64], index: 5, kind: output, shape index: {0}]   ;;  %s2701_s6 = inlined_call_operand.vmem [shape: f32[4,2,64], index: 6, kind: output, shape index: {1}]  }
   0x1 LB: > { %s1832_s22 = sadd.s32 4294967295, %s1786_s21   ;;  %p1612_p0 = scmp.ge.s32.totalorder %s1786_s21, 1  ;;  %s1786_s21 = sphi %s1826_s21, %s17_s21  }
   0x2   : > { %p217_p1 = scmp.lt.s32.totalorder %s1786_s21, 5 }
   0x4   : > { %p218_p2 = pnand %p1612_p0, %p217_p1 }
   0x5   : > { %s1613_s23 = sshll.u32 (!%p218_p2), %s1832_s22, 1  ;;  %s1788_s8 = smov (!%p218_p2), 32  }
   0x6   : > { %221 = sbr.rel (%p218_p2) target bundleno = 420 (0x1a4), region = 40  ;;  %p254_p3 = scmp.lt.s32.totalorder (!%p218_p2), %s1613_s23, 7 }
   0x7   : > { %s1789_s9 = smov (!%p218_p2), 96   ;;  %s1790_s10 = smov (!%p218_p2), 64  }
   0x8   : > { %p267_p4 = scmp.lt.s32.totalorder (!%p218_p2), %s1832_s22, 3 }
   0xb   : > { %s2707_s23 = smov (!%p254_p3, %s1613_s23), 7  ;;  %v1850_v0 = vld [vmem:[%s2698_s3] ss:$0 sm:$0xff]  ;;  %vm438_vm4 = vcmask 1040384   ;;  %vm461_vm9 = vsmask.f32 7424 }
   0xc   : > { %s1765_s24 = smul.u32 52, %s2707_s23  ;;  %v1860_v4 = vld [vmem:[%s2699_s4] ss:$0 sm:$0xff]  ;;  %vm560_vm10 = vsmask.f32 6400  ;;  %vm532_vm11 = vcmask 1046528  }
   0xd   : > { %s2709_s22 = smov (!%p267_p4, %s1832_s22), 3 }
   0xe   : > { %s1845_s27 = scalar_lea.vmem %s2695_s0, %s1765_s24  ;;  %s2387_s15 = scalar_lea.vmem %s2700_s5, %s1765_s24 }
   0xf   : > { %v1665_v1 = vld [vmem:[%s1845_s27 + $0x34] sm:$0xf]  ;;  %v1760_v2 = vld [vmem:[%s1845_s27 + $0x38] sm:$0xff]   ;;  %v1855_v3 = vld [vmem:[%s1845_s27 + $0x40] sm:$0xff]   ;;  %s1617_s23 = sshll.u32 %s2709_s22, 1 }
  0x10   : > { %v1737_v5 = vunpack.c.l.bf16 %v1760_v2  ;;  %v1738_v6 = vunpack.c.h.bf16 %v1760_v2  ;;  %v1741_v7 = vunpack.c.l.bf16 %v1855_v3  ;;  %v962_v8 = vunpack.c.l.bf16 %v1665_v1  ;;  %v1712_v9 = vld [vmem:[%s1845_s27] sm:$0xff]   ;;  %v1755_v10 = vld [vmem:[%s1845_s27 + $0x8] sm:$0xff]   ;;  %s270_s17 = scalar_lea.vmem %s2701_s6, %s1617_s23 }
  0x11   : > { %v1713_v11 = vunpack.c.l.bf16 %v1712_v9  ;;  %v1714_v12 = vunpack.c.h.bf16 %v1712_v9  ;;  %v1717_v13 = vunpack.c.l.bf16 %v1755_v10  ;;  %v1718_v14 = vunpack.c.h.bf16 %v1755_v10  ;;  %v1883_v51 = vld [vmem:[%s1845_s27 + $0x48] sm:$0xff]  }
  0x12   : > { %v975_v15 = vmul.f32 %v1850_v0, %v962_v8  ;;  %v976_v16 = vmul.f32 %v1850_v0, %v1737_v5  ;;  %v977_v17 = vmul.f32 %v1850_v0, %v1738_v6  ;;  %v978_v18 = vmul.f32 %v1850_v0, %v1741_v7  ;;  %v1756_v6 = vld [vmem:[%s1845_s27 + $0x10] sm:$0xff]  }
  0x13   : > { %v324_v19 = vmul.f32 %v1850_v0, %v1713_v11  ;;  %v325_v20 = vmul.f32 %v1850_v0, %v1714_v12  ;;  %v326_v21 = vmul.f32 %v1850_v0, %v1717_v13  ;;  %v327_v22 = vmul.f32 %v1850_v0, %v1718_v14 }
  0x14   : > { %v988_v23 = vadd.f32 %v1860_v4, %v975_v15  ;;  %v989_v24 = vadd.f32 %v1860_v4, %v976_v16  ;;  %v990_v25 = vadd.f32 %v1860_v4, %v977_v17  ;;  %v991_v26 = vadd.f32 %v1860_v4, %v978_v18 }
  0x15   : > { %v340_v27 = vadd.f32 %v1860_v4, %v324_v19  ;;  %v341_v28 = vadd.f32 %v1860_v4, %v325_v20  ;;  %v342_v29 = vadd.f32 %v1860_v4, %v326_v21  ;;  %v343_v30 = vadd.f32 %v1860_v4, %v327_v22 }
  0x16   : > { %vm1001_vm0 = vcmp.gt.f32.partialorder %v988_v23, 0.0  ;;  %vm1002_vm1 = vcmp.gt.f32.partialorder %v989_v24, 0.0  ;;  %vm1003_vm2 = vcmp.gt.f32.partialorder %v990_v25, 0.0  ;;  %vm1004_vm3 = vcmp.gt.f32.partialorder %v991_v26, 0.0 }
  0x17   : > { %v1014_v31 = vmul.f32 0.01, %v988_v23  ;;  %v1015_v32 = vmul.f32 0.01, %v989_v24  ;;  %v1016_v33 = vmul.f32 0.01, %v990_v25  ;;  %v1742_v34 = vunpack.c.h.bf16 %v1855_v3 }
  0x18   : > { %v1017_v35 = vmul.f32 0.01, %v991_v26  ;;  %vm353_vm5 = vcmp.gt.f32.partialorder %v340_v27, 0.0  ;;  %vm354_vm6 = vcmp.gt.f32.partialorder %v341_v28, 0.0  ;;  %vm355_vm7 = vcmp.gt.f32.partialorder %v342_v29, 0.0 }
  0x19   : > { %v1027_v36 = vsel %vm1001_vm0, %v988_v23, %v1014_v31  ;;  %v1028_v37 = vsel %vm1002_vm1, %v989_v24, %v1015_v32  ;;  %v1029_v38 = vsel %vm1003_vm2, %v990_v25, %v1016_v33  ;;  %vm356_vm8 = vcmp.gt.f32.partialorder %v343_v30, 0.0 }
  0x1a   : > { %v1030_v39 = vsel %vm1004_vm3, %v991_v26, %v1017_v35  ;;  %v1040_v40 = vpack.c.bf16 %v1027_v36, %v1027_v36  ;;  %v1041_v41 = vpack.c.bf16 %v1028_v37, %v1028_v37  ;;  %v1042_v42 = vpack.c.bf16 %v1029_v38, %v1029_v38 }
  0x1b   : > { %v1043_v43 = vpack.c.bf16 %v1030_v39, %v1030_v39  ;;  %v366_v44 = vmul.f32 0.01, %v340_v27  ;;  %v367_v45 = vmul.f32 0.01, %v341_v28  ;;  %v368_v46 = vmul.f32 0.01, %v342_v29 }
  0x1c   : > { %v1066_v47 = vunpack.c.l.b16 %v1040_v40  ;;  %v1067_v48 = vunpack.c.l.b16 %v1041_v41  ;;  %v1068_v49 = vunpack.c.l.b16 %v1042_v42  ;;  %v369_v50 = vmul.f32 0.01, %v343_v30 }
  0x1d   : > { %v1069_v52 = vunpack.c.l.b16 %v1043_v43  ;;  %v379_v53 = vsel %vm353_vm5, %v340_v27, %v366_v44  ;;  %v380_v54 = vsel %vm354_vm6, %v341_v28, %v367_v45  ;;  %v381_v55 = vsel %vm355_vm7, %v342_v29, %v368_v46 }
  0x1e   : > { %v1079_v56 = vpack.c.b16 %v1067_v48, %v1066_v47  ;;  %v382_v57 = vsel %vm356_vm8, %v343_v30, %v369_v50  ;;  %v392_v58 = vpack.c.bf16 %v379_v53, %v379_v53  ;;  %v393_v59 = vpack.c.bf16 %v380_v54, %v380_v54 }
  0x1f   : > { %v1080_v60 = vpack.c.b16 %v1069_v52, %v1068_v49  ;;  %v394_v61 = vpack.c.bf16 %v381_v55, %v381_v55  ;;  %v395_v62 = vpack.c.bf16 %v382_v57, %v382_v57  ;;  %v1745_v63 = vunpack.c.l.bf16 %v1883_v51  ;;  %v1940_v57 = vld [vmem:[%s1845_s27 + $0x50] sm:$0xff]  }
  0x20   : > { %v1086_v1 = vrot.slane %v1079_v56, 7  ;;  %v418_v2 = vunpack.c.l.b16 %v392_v58  ;;  %v419_v3 = vunpack.c.l.b16 %v393_v59  ;;  %v979_v5 = vmul.f32 %v1850_v0, %v1742_v34 }
  0x21   : > { %v1892_v7 = vrot.slane %v1080_v60, 7  ;;  %v420_v8 = vunpack.c.l.b16 %v394_v61  ;;  %v421_v9 = vunpack.c.l.b16 %v395_v62  ;;  %v980_v12 = vmul.f32 %v1850_v0, %v1745_v63 }
  0x22   : > { %v1895_v10 = vsel %vm438_vm4, 0, %v1086_v1  ;;  %v431_v11 = vpack.c.b16 %v419_v3, %v418_v2  ;;  %v992_v13 = vadd.f32 %v1860_v4, %v979_v5  ;;  %v1721_v17 = vunpack.c.l.bf16 %v1756_v6 }
  0x23   : > { %v1901_v14 = vsel %vm438_vm4, %v1086_v1, %v1892_v7  ;;  %v1103_v15 = vshrl.u32 %v1895_v10, 16  ;;  %v1105_v16 = vshll.u32 %v1895_v10, 16  ;;  %v1173_v20 = vrot.slane %v1895_v10, 1 }
  0x24   : > { %v1110_v18 = vshll.u32 %v1901_v14, 16  ;;  %v1114_v19 = vshrl.u32 %v1901_v14, 16  ;;  %v432_v21 = vpack.c.b16 %v421_v9, %v420_v8  ;;  %v439_v25 = vrot.slane %v431_v11, 7 }
  0x25   : > { %v1200_v22 = vrot.slane %v1103_v15, 1  ;;  %v1201_v23 = vrot.slane %v1105_v16, 2  ;;  %v1107_v24 = vrot.slane %v1105_v16, 1  ;;  %v1174_v29 = vrot.slane %v1901_v14, 1 }
  0x26   : > { %v1203_v26 = vrot.slane %v1114_v19, 1  ;;  %v1204_v27 = vrot.slane %v1110_v18, 2  ;;  %v1112_v28 = vrot.slane %v1110_v18, 1  ;;  %v1909_v32 = vrot.slane %v432_v21, 7 }
  0x27   : > { %v1202_v30 = vor.u32 %v1201_v23, %v1200_v22  ;;  %v1108_v31 = vor.u32 %v1107_v24, %v1103_v15  ;;  %v1912_v33 = vsel %vm438_vm4, 0, %v439_v25  ;;  %v993_v37 = vadd.f32 %v1860_v4, %v980_v12 }
  0x28   : > { %v1914_v34 = vor.u32 %v1204_v27, %v1203_v26  ;;  %v462_v35 = vshrl.u32 %v1912_v33, 16  ;;  %v464_v36 = vshll.u32 %v1912_v33, 16  ;;  %v1922_v39 = vsel %vm438_vm4, %v439_v25, %v1909_v32 }
  0x29   : > { %v1113_v38 = vsel %vm461_vm9, %v1108_v31, %v1112_v28  ;;  %vm1005_vm12 = vcmp.gt.f32.partialorder %v992_v13, 0.0  ;;  %v1018_v40 = vmul.f32 0.01, %v992_v13  ;;  %v469_v43 = vshll.u32 %v1922_v39, 16  ;;  %v1757_v31 = vld [vmem:[%s1845_s27 + $0x18] sm:$0xff]  }
  0x2a   : > { %v1206_v41 = vsel %vm560_vm10, %v1202_v30, %v1914_v34  ;;  %1157 = vrot.lane.b32.xlu0 %v1113_v38, %s1788_s8  ;;  %v466_v42 = vrot.slane %v464_v36, 1  ;;  %vm1006_vm13 = vcmp.gt.f32.partialorder %v993_v37, 0.0  ;;  %v1175_v44 = vsel %vm532_vm11, %v1173_v20, %v1174_v29 }
  0x2b   : > { %1227 = vrot.lane.b32.xlu1 %v1206_v41, %s1789_s9  ;;  %v1019_v45 = vmul.f32 0.01, %v993_v37  ;;  %v1031_v46 = vsel %vm1005_vm12, %v992_v13, %v1018_v40  ;;  %v1722_v47 = vunpack.c.h.bf16 %v1756_v6  ;;  %v1934_v49 = vrot.slane %v469_v43, 1 }
  0x2c   : > { %v467_v48 = vor.u32 %v466_v42, %v462_v35  ;;  %v1044_v50 = vpack.c.bf16 %v1031_v46, %v1031_v46  ;;  %v328_v52 = vmul.f32 %v1850_v0, %v1721_v17  ;;  %v1116_v54 = vor.u32 %v1114_v19, %v1112_v28 }
  0x2d   : > { %v1032_v53 = vsel %vm1006_vm13, %v993_v37, %v1019_v45  ;;  %v329_v55 = vmul.f32 %v1850_v0, %v1722_v47  ;;  %v534_v56 = vrot.slane %v1922_v39, 1  ;;  %v473_v61 = vshrl.u32 %v1922_v39, 16 }
  0x2e   : > { %v1045_v58 = vpack.c.bf16 %v1032_v53, %v1032_v53  ;;  %v1070_v59 = vunpack.c.l.b16 %v1044_v50  ;;  %v344_v60 = vadd.f32 %v1860_v4, %v328_v52  ;;  %v472_v62 = vsel %vm461_vm9, %v467_v48, %v1934_v49 }
  0x2f   : > { %v345_v63 = vadd.f32 %v1860_v4, %v329_v55  ;;  %v533_v1 = vrot.slane %v1912_v33, 1  ;;  %v1746_v2 = vunpack.c.h.bf16 %v1883_v51  ;;  %v1749_v6 = vunpack.c.l.bf16 %v1940_v57 }
  0x30   : > { %v1071_v3 = vunpack.c.l.b16 %v1045_v58  ;;  %vm357_vm14 = vcmp.gt.f32.partialorder %v344_v60, 0.0  ;;  %v370_v5 = vmul.f32 0.01, %v344_v60  ;;  %v561_v15 = vrot.slane %v462_v35, 1 }
  0x31   : > { %vm358_vm15 = vcmp.gt.f32.partialorder %v345_v63, 0.0  ;;  %v371_v8 = vmul.f32 0.01, %v345_v63  ;;  %v535_v9 = vsel %vm532_vm11, %v533_v1, %v534_v56  ;;  %v981_v11 = vmul.f32 %v1850_v0, %v1746_v2 }
  0x32   : > { %1186 = vrot.lane.b32.xlu0 %v1175_v44, %s1790_s10  ;;  %v1081_v12 = vpack.c.b16 %v1071_v3, %v1070_v59  ;;  %v383_v13 = vsel %vm357_vm14, %v344_v60, %v370_v5  ;;  %546 = vrot.lane.b32.xlu2 %v535_v9, %s1790_s10  ;;  %v982_v51 = vmul.f32 %v1850_v0, %v1749_v6  ;;  %v562_v19 = vrot.slane %v464_v36, 2  ;;  %v1998_v6 = vld [vmem:[%s1845_s27 + $0x58] sm:$0xff]  }
  0x33   : > { %516 = vrot.lane.b32.xlu1 %v472_v62, %s1788_s8  ;;  %v384_v16 = vsel %vm358_vm15, %v345_v63, %v371_v8  ;;  %v396_v17 = vpack.c.bf16 %v383_v13, %v383_v13  ;;  %v994_v18 = vadd.f32 %v1860_v4, %v981_v11  ;;  %v564_v23 = vrot.slane %v473_v61, 1 }
  0x34   : > { %v1089_v20 = vrot.slane %v1081_v12, 7  ;;  %v397_v21 = vpack.c.bf16 %v384_v16, %v384_v16  ;;  %v995_v22 = vadd.f32 %v1860_v4, %v982_v51  ;;  %v563_v26 = vor.u32 %v562_v19, %v561_v15 }
  0x35   : > { %v422_v24 = vunpack.c.l.b16 %v396_v17  ;;  %vm1007_vm0 = vcmp.gt.f32.partialorder %v994_v18, 0.0  ;;  %v1020_v25 = vmul.f32 0.01, %v994_v18  ;;  %v565_v44 = vrot.slane %v469_v43, 2 }
  0x36   : > { %v1962_v27 = vsel %vm438_vm4, %v1892_v7, %v1089_v20  ;;  %v423_v28 = vunpack.c.l.b16 %v397_v21  ;;  %vm1008_vm1 = vcmp.gt.f32.partialorder %v995_v22, 0.0  ;;  %v1021_v30 = vmul.f32 0.01, %v995_v22 }
  0x37   : > { %v1118_v35 = vshll.u32 %v1962_v27, 16  ;;  %v1176_v36 = vrot.slane %v1962_v27, 1  ;;  %v1033_v37 = vsel %vm1007_vm0, %v994_v18, %v1020_v25  ;;  %v1122_v38 = vshrl.u32 %v1962_v27, 16 }
  0x38   : > { %v433_v40 = vpack.c.b16 %v423_v28, %v422_v24  ;;  %v1034_v41 = vsel %vm1008_vm1, %v995_v22, %v1021_v30  ;;  %v1046_v42 = vpack.c.bf16 %v1033_v37, %v1033_v37  ;;  %v1725_v47 = vunpack.c.l.bf16 %v1757_v31 }
  0x39   : > { %v1120_v45 = vrot.slane %v1118_v35, 1  ;;  %v1177_v7 = vsel %vm532_vm11, %v1174_v29, %v1176_v36  ;;  %v1047_v46 = vpack.c.bf16 %v1034_v41, %v1034_v41  ;;  %v1975_v52 = vor.u32 %v565_v44, %v564_v23 }
  0x3a   : > { %v1973_v48 = vrot.slane %v433_v40, 7  ;;  %v1072_v50 = vunpack.c.l.b16 %v1046_v42  ;;  %v1726_v53 = vunpack.c.h.bf16 %v1757_v31  ;;  %v475_v58 = vor.u32 %v473_v61, %v1934_v49  ;;  %v1758_v31 = vld [vmem:[%s1845_s27 + $0x20] sm:$0xff]  }
  0x3b   : > { %v1121_v55 = vsel %vm461_vm9, %v1116_v54, %v1120_v45  ;;  %1188 = vrot.lane.b32.xlu1 %v1177_v7, %s1790_s10  ;;  %v1073_v43 = vunpack.c.l.b16 %v1047_v46  ;;  %v330_v59 = vmul.f32 %v1850_v0, %v1725_v47  ;;  %v567_v60 = vsel %vm560_vm10, %v563_v26, %v1975_v52 }
  0x3c   : > { %1159 = vrot.lane.b32.xlu0 %v1121_v55, %s1788_s8  ;;  %v1985_v29 = vsel %vm438_vm4, %v1909_v32, %v1973_v48  ;;  %v331_v54 = vmul.f32 %v1850_v0, %v1726_v53  ;;  %v1207_v62 = vrot.slane %v1122_v38, 1  ;;  %588 = vrot.lane.b32.xlu2 %v567_v60, %s1789_s9  ;;  %v1208_v3 = vrot.slane %v1118_v35, 2 }
  0x3d   : > { %v477_v63 = vshll.u32 %v1985_v29, 16  ;;  %v536_v49 = vrot.slane %v1985_v29, 1  ;;  %v1082_v61 = vpack.c.b16 %v1073_v43, %v1072_v50  ;;  %v346_v1 = vadd.f32 %v1860_v4, %v330_v59 }
  0x3e   : > { %v347_v2 = vadd.f32 %v1860_v4, %v331_v54  ;;  %v481_v32 = vshrl.u32 %v1985_v29, 16  ;;  %v1750_v5 = vunpack.c.h.bf16 %v1940_v57  ;;  %v2007_v51 = vor.u32 %v1208_v3, %v1207_v62 }
  0x3f   : > { %v479_v8 = vrot.slane %v477_v63, 1  ;;  %v537_v9 = vsel %vm532_vm11, %v534_v56, %v536_v49  ;;  %v2005_v11 = vrot.slane %v1082_v61, 7  ;;  %vm359_vm2 = vcmp.gt.f32.partialorder %v346_v1, 0.0 }
  0x40   : > { %vm360_vm3 = vcmp.gt.f32.partialorder %v347_v2, 0.0  ;;  %v372_v12 = vmul.f32 0.01, %v346_v1  ;;  %v373_v13 = vmul.f32 0.01, %v347_v2  ;;  %v1124_v16 = vor.u32 %v1122_v38, %v1120_v45 }
  0x41   : > { %v480_v15 = vsel %vm461_vm9, %v475_v58, %v479_v8  ;;  %v2012_v57 = vsel %vm438_vm4, %v1089_v20, %v2005_v11  ;;  %v1753_v17 = vunpack.c.l.bf16 %v1998_v6  ;;  %v1210_v24 = vsel %vm560_vm10, %v1914_v34, %v2007_v51 }
  0x42   : > { %v1126_v56 = vshll.u32 %v2012_v57, 16  ;;  %v1178_v18 = vrot.slane %v2012_v57, 1  ;;  %v385_v19 = vsel %vm359_vm2, %v346_v1, %v372_v12  ;;  %v386_v21 = vsel %vm360_vm3, %v347_v2, %v373_v13 }
  0x43   : > { %548 = vrot.lane.b32.xlu1 %v537_v9, %s1790_s10  ;;  %v398_v22 = vpack.c.bf16 %v385_v19, %v385_v19  ;;  %v399_v23 = vpack.c.bf16 %v386_v21, %v386_v21  ;;  %v983_v20 = vmul.f32 %v1850_v0, %v1750_v5  ;;  %v483_v28 = vor.u32 %v481_v32, %v479_v8 }
  0x44   : > { %518 = vrot.lane.b32.xlu0 %v480_v15, %s1788_s8  ;;  %v2023_v25 = vrot.slane %v1126_v56, 1  ;;  %v1179_v26 = vsel %vm532_vm11, %v1176_v36, %v1178_v18  ;;  %v984_v30 = vmul.f32 %v1850_v0, %v1753_v17  ;;  %1229 = vrot.lane.b32.xlu2 %v1210_v24, %s1789_s9  ;;  %v568_v38 = vrot.slane %v481_v32, 1 }
  0x45   : > { %v424_v35 = vunpack.c.l.b16 %v398_v22  ;;  %v425_v37 = vunpack.c.l.b16 %v399_v23  ;;  %v996_v34 = vadd.f32 %v1860_v4, %v983_v20  ;;  %v1130_v42 = vshrl.u32 %v2012_v57, 16 }
  0x46   : > { %v1129_v40 = vsel %vm461_vm9, %v1124_v16, %v2023_v25  ;;  %v997_v41 = vadd.f32 %v1860_v4, %v984_v30  ;;  %v569_v44 = vrot.slane %v477_v63, 2  ;;  %v1729_v7 = vunpack.c.l.bf16 %v1758_v31 }
  0x47   : > { %v434_v36 = vpack.c.b16 %v425_v37, %v424_v35  ;;  %vm1009_vm5 = vcmp.gt.f32.partialorder %v996_v34, 0.0  ;;  %v1022_v45 = vmul.f32 0.01, %v996_v34  ;;  %v1730_v50 = vunpack.c.h.bf16 %v1758_v31  ;;  %v1759_v35 = vld [vmem:[%s1845_s27 + $0x28] sm:$0xff]  }
  0x48   : > { %vm1010_vm6 = vcmp.gt.f32.partialorder %v997_v41, 0.0  ;;  %v1023_v46 = vmul.f32 0.01, %v997_v41  ;;  %v2036_v47 = vor.u32 %v569_v44, %v568_v38  ;;  %v332_v58 = vmul.f32 %v1850_v0, %v1729_v7 }
  0x49   : > { %v2038_v53 = vrot.slane %v434_v36, 7  ;;  %v1035_v55 = vsel %vm1009_vm5, %v996_v34, %v1022_v45  ;;  %v1211_v43 = vrot.slane %v1130_v42, 1  ;;  %v333_v62 = vmul.f32 %v1850_v0, %v1730_v50 }
  0x4a   : > { %v1036_v59 = vsel %vm1010_vm6, %v997_v41, %v1023_v46  ;;  %v1048_v60 = vpack.c.bf16 %v1035_v55, %v1035_v55  ;;  %v571_v54 = vsel %vm560_vm10, %v1975_v52, %v2036_v47  ;;  %v348_v1 = vadd.f32 %v1860_v4, %v332_v58 }
  0x4b   : > { %1190 = vrot.lane.b32.xlu1 %v1179_v26, %s1790_s10  ;;  %v2049_v63 = vsel %vm438_vm4, %v1973_v48, %v2038_v53  ;;  %v1049_v61 = vpack.c.bf16 %v1036_v59, %v1036_v59  ;;  %v1212_v2 = vrot.slane %v1126_v56, 2  ;;  %v349_v5 = vadd.f32 %v1860_v4, %v333_v62  ;;  %v1676_v48 = vld [vmem:[%s1845_s27 + $0x60] sm:$0xf] }
  0x4c   : > { %1161 = vrot.lane.b32.xlu0 %v1129_v40, %s1788_s8  ;;  %v485_v32 = vshll.u32 %v2049_v63, 16  ;;  %v538_v52 = vrot.slane %v2049_v63, 1  ;;  %v1074_v3 = vunpack.c.l.b16 %v1048_v60  ;;  %590 = vrot.lane.b32.xlu2 %v571_v54, %s1789_s9  ;;  %vm361_vm7 = vcmp.gt.f32.partialorder %v348_v1, 0.0 }
  0x4d   : > { %v1075_v8 = vunpack.c.l.b16 %v1049_v61  ;;  %v374_v9 = vmul.f32 0.01, %v348_v1  ;;  %vm362_vm8 = vcmp.gt.f32.partialorder %v349_v5, 0.0  ;;  %v375_v13 = vmul.f32 0.01, %v349_v5 }
  0x4e   : > { %v487_v12 = vrot.slane %v485_v32, 1  ;;  %v489_v15 = vshrl.u32 %v2049_v63, 16  ;;  %v2059_v56 = vor.u32 %v1212_v2, %v1211_v43  ;;  %v1754_v19 = vunpack.c.h.bf16 %v1998_v6 }
  0x4f   : > { %v1083_v16 = vpack.c.b16 %v1075_v8, %v1074_v3  ;;  %v387_v17 = vsel %vm361_vm7, %v348_v1, %v374_v9  ;;  %v539_v22 = vsel %vm532_vm11, %v536_v49, %v538_v52  ;;  %v388_v23 = vsel %vm362_vm8, %v349_v5, %v375_v13 }
  0x50   : > { %v488_v21 = vsel %vm461_vm9, %v483_v28, %v487_v12  ;;  %v400_v24 = vpack.c.bf16 %v387_v17, %v387_v17  ;;  %v401_v26 = vpack.c.bf16 %v388_v23, %v388_v23  ;;  %v1214_v30 = vsel %vm560_vm10, %v2007_v51, %v2059_v56 }
  0x51   : > { %v2068_v20 = vrot.slane %v1083_v16, 7  ;;  %v973_v31 = vunpack.c.l.bf16 %v1676_v48  ;;  %v985_v28 = vmul.f32 %v1850_v0, %v1754_v19  ;;  %v572_v37 = vrot.slane %v489_v15, 1  ;;  %v1677_v19 = vld [vmem:[%s1845_s27 + $0x64] sm:$0x3] }
  0x52   : > { %v426_v6 = vunpack.c.l.b16 %v400_v24  ;;  %v573_v34 = vrot.slane %v485_v32, 2  ;;  %v1132_v38 = vor.u32 %v1130_v42, %v2023_v25  ;;  %v427_v40 = vunpack.c.l.b16 %v401_v26  ;;  %v307_v26 = vld [vmem:[%s1845_s27 + $0x30] sm:$0x3] }
  0x53   : > { %550 = vrot.lane.b32.xlu1 %v539_v22, %s1790_s10  ;;  %v2079_v49 = vsel %vm438_vm4, %v2005_v11, %v2068_v20  ;;  %v986_v41 = vmul.f32 %v1850_v0, %v973_v31  ;;  %v998_v36 = vadd.f32 %v1860_v4, %v985_v28  ;;  %v1733_v45 = vunpack.c.l.bf16 %v1759_v35 }
  0x54   : > { %520 = vrot.lane.b32.xlu0 %v488_v21, %s1788_s8  ;;  %v1134_v51 = vshll.u32 %v2079_v49, 16  ;;  %v1180_v44 = vrot.slane %v2079_v49, 1  ;;  %v435_v7 = vpack.c.b16 %v427_v40, %v426_v6  ;;  %1231 = vrot.lane.b32.xlu2 %v1214_v30, %s1789_s9  ;;  %v2089_v46 = vor.u32 %v573_v34, %v572_v37 }
  0x55   : > { %v999_v11 = vadd.f32 %v1860_v4, %v986_v41  ;;  %v1734_v25 = vunpack.c.h.bf16 %v1759_v35  ;;  %vm1011_vm12 = vcmp.gt.f32.partialorder %v998_v36, 0.0  ;;  %v1024_v50 = vmul.f32 0.01, %v998_v36 }
  0x56   : > { %v2091_v42 = vrot.slane %v1134_v51, 1  ;;  %v1138_v55 = vshrl.u32 %v2079_v49, 16  ;;  %v1181_v58 = vsel %vm532_vm11, %v1178_v18, %v1180_v44  ;;  %v2099_v43 = vrot.slane %v435_v7, 7 }
  0x57   : > { %vm1012_vm13 = vcmp.gt.f32.partialorder %v999_v11, 0.0  ;;  %v1025_v59 = vmul.f32 0.01, %v999_v11  ;;  %v1037_v54 = vsel %vm1011_vm12, %v998_v36, %v1024_v50  ;;  %v575_v62 = vsel %vm560_vm10, %v2036_v47, %v2089_v46 }
  0x58   : > { %v1137_v60 = vsel %vm461_vm9, %v1132_v38, %v2091_v42  ;;  %v334_v61 = vmul.f32 %v1850_v0, %v1733_v45  ;;  %v2110_v1 = vsel %vm438_vm4, %v2038_v53, %v2099_v43  ;;  %v1050_v2 = vpack.c.bf16 %v1037_v54, %v1037_v54 }
  0x59   : > { %v1038_v18 = vsel %vm1012_vm13, %v999_v11, %v1025_v59  ;;  %v335_v32 = vmul.f32 %v1850_v0, %v1734_v25  ;;  %v493_v3 = vshll.u32 %v2110_v1, 16  ;;  %v540_v5 = vrot.slane %v2110_v1, 1 }
  0x5a   : > { %v1051_v8 = vpack.c.bf16 %v1038_v18, %v1038_v18  ;;  %v350_v9 = vadd.f32 %v1860_v4, %v334_v61  ;;  %v491_v47 = vor.u32 %v489_v15, %v487_v12  ;;  %v1076_v48 = vunpack.c.l.b16 %v1050_v2 }
  0x5b   : > { %1192 = vrot.lane.b32.xlu1 %v1181_v58, %s1790_s10  ;;  %v351_v53 = vadd.f32 %v1860_v4, %v335_v32  ;;  %v1215_v13 = vrot.slane %v1138_v55, 1  ;;  %v2119_v16 = vrot.slane %v493_v3, 1  ;;  %v1216_v23 = vrot.slane %v1134_v51, 2 }
  0x5c   : > { %1163 = vrot.lane.b32.xlu0 %v1137_v60, %s1788_s8  ;;  %v1077_v17 = vunpack.c.l.b16 %v1051_v8  ;;  %vm363_vm14 = vcmp.gt.f32.partialorder %v350_v9, 0.0  ;;  %592 = vrot.lane.b32.xlu2 %v575_v62, %s1789_s9  ;;  %v376_v21 = vmul.f32 0.01, %v350_v9  ;;  %v541_v12 = vsel %vm532_vm11, %v538_v52, %v540_v5 }
  0x5d   : > { %vm364_vm15 = vcmp.gt.f32.partialorder %v351_v53, 0.0  ;;  %v377_v22 = vmul.f32 0.01, %v351_v53  ;;  %v497_v24 = vshrl.u32 %v2110_v1, 16  ;;  %v496_v30 = vsel %vm461_vm9, %v491_v47, %v2119_v16 }
  0x5e   : > { %v1084_v15 = vpack.c.b16 %v1077_v17, %v1076_v48  ;;  %v389_v31 = vsel %vm363_vm14, %v350_v9, %v376_v21  ;;  %v2132_v6 = vor.u32 %v1216_v23, %v1215_v13  ;;  %v974_v38 = vunpack.c.l.bf16 %v1677_v19  ;;  %v1707_v19 = vld [vmem:[%s2696_s1 + $0x30] sm:$0xff] }
  0x5f   : > { %v390_v35 = vsel %vm364_vm15, %v351_v53, %v377_v22  ;;  %v402_v37 = vpack.c.bf16 %v389_v31, %v389_v31  ;;  %v576_v40 = vrot.slane %v497_v24, 1  ;;  %v577_v41 = vrot.slane %v493_v3, 2 }
  0x60   : > { %v2134_v28 = vrot.slane %v1084_v15, 7  ;;  %v403_v34 = vpack.c.bf16 %v390_v35, %v390_v35  ;;  %v1218_v52 = vsel %vm560_vm10, %v2059_v56, %v2132_v6  ;;  %v320_v51 = vunpack.c.l.bf16 %v307_v26  ;;  %v1706_v15 = vld [vmem:[%s2696_s1 + $0x28] sm:$0xff] }
  0x61   : > { %v428_v45 = vunpack.c.l.b16 %v402_v37  ;;  %v987_v11 = vmul.f32 %v1850_v0, %v974_v38  ;;  %v1140_v60 = vor.u32 %v1138_v55, %v2091_v42  ;;  %v2156_v62 = vor.u32 %v577_v41, %v576_v40 }
  0x62   : > { %v2142_v36 = vsel %vm438_vm4, %v2068_v20, %v2134_v28  ;;  %v429_v7 = vunpack.c.l.b16 %v403_v34  ;;  %v336_v59 = vmul.f32 %v1850_v0, %v320_v51  ;;  %v1708_v20 = vld [vmem:[%s2696_s1 + $0x38] sm:$0xff]  ;;  %vm457_vm2 = vcmask 1042432  }
  0x63   : > { %552 = vrot.lane.b32.xlu1 %v541_v12, %s1790_s10  ;;  %v1142_v25 = vshll.u32 %v2142_v36, 16  ;;  %v1182_v50 = vrot.slane %v2142_v36, 1  ;;  %v1000_v58 = vadd.f32 %v1860_v4, %v987_v11  ;;  %1324 = vmatpush.bf16.msra.mxu2 %v1708_v20  ;;  %v1146_v42 = vshrl.u32 %v2142_v36, 16 }
  0x64   : > { %522 = vrot.lane.b32.xlu0 %v496_v30, %s1788_s8  ;;  %v436_v56 = vpack.c.b16 %v429_v7, %v428_v45  ;;  %1233 = vrot.lane.b32.xlu2 %v1218_v52, %s1789_s9  ;;  %v352_v2 = vadd.f32 %v1860_v4, %v336_v59  ;;  %v579_v47 = vsel %vm560_vm10, %v2089_v46, %v2156_v62  ;;  %vm458_vm3 = vsmask.f32 2304  ;;  %v1705_v45 = vld [vmem:[%s2696_s1 + $0x20] sm:$0xff] }
  0x65   : > { %v1144_v54 = vrot.slane %v1142_v25, 1  ;;  %vm1013_vm0 = vcmp.gt.f32.partialorder %v1000_v58, 0.0  ;;  %v1026_v18 = vmul.f32 0.01, %v1000_v58  ;;  %752 = vmatpush.bf16.msra.mxu0 %v1708_v20  ;;  %v1183_v0 = vsel %vm532_vm11, %v1180_v44, %v1182_v50  ;;  %vm2187_vm5 = vmand %vm457_vm2, %vm458_vm3 }
  0x66   : > { %v448_v61 = vrot.slane %v436_v56, 7  ;;  %vm365_vm1 = vcmp.gt.f32.partialorder %v352_v2, 0.0  ;;  %v378_v3 = vmul.f32 0.01, %v352_v2  ;;  %v1219_v44 = vrot.slane %v1146_v42, 1 }
  0x67   : > { %v1039_v32 = vsel %vm1013_vm0, %v1000_v58, %v1026_v18  ;;  %v1145_v8 = vsel %vm461_vm9, %v1140_v60, %v1144_v54  ;;  %v1220_v53 = vrot.slane %v1142_v25, 2  ;;  %v499_v21 = vor.u32 %v497_v24, %v2119_v16  ;;  %1325 = vmatpush.bf16.msra.mxu2 %v1707_v19  ;;  %v1704_v58 = vld [vmem:[%s2696_s1 + $0x18] sm:$0xff] }
  0x68   : > { %v2167_v55 = vsel %vm438_vm4, %v2099_v43, %v448_v61  ;;  %v1052_v9 = vpack.c.bf16 %v1039_v32, %v1039_v32  ;;  %v391_v48 = vsel %vm365_vm1, %v352_v2, %v378_v3  ;;  %v1148_v7 = vor.u32 %v1146_v42, %v1144_v54 }
  0x69   : > { %v501_v4 = vshll.u32 %v2167_v55, 16  ;;  %v404_v43 = vpack.c.bf16 %v391_v48, %v391_v48  ;;  %v542_v17 = vrot.slane %v2167_v55, 1  ;;  %v2182_v12 = vor.u32 %v1220_v53, %v1219_v44  ;;  %753 = vmatpush.bf16.msra.mxu0 %v1707_v19 }
  0x6a   : > { %v1078_v13 = vunpack.c.l.b16 %v1052_v9  ;;  %v505_v24 = vshrl.u32 %v2167_v55, 16  ;;  %vm602_vm6 = vcmask 1045504   ;;  %v1241_v3 = vrot.slane %v1895_v10, 2 }
  0x6b   : > { %1194 = vrot.lane.b32.xlu1 %v1183_v0, %s1790_s10  ;;  %v503_v46 = vrot.slane %v501_v4, 1  ;;  %v430_v23 = vunpack.c.l.b16 %v404_v43  ;;  %v543_v16 = vsel %vm532_vm11, %v540_v5, %v542_v17  ;;  %v1222_v52 = vsel %vm560_vm10, %v2132_v6, %v2182_v12  ;;  %1326 = vmatpush.bf16.msra.mxu2 %v1706_v15  ;;  %v1710_v6 = vld [vmem:[%s2696_s1 + $0x48] sm:$0xff]  ;;  %v1703_v0 = vld [vmem:[%s2696_s1 + $0x10] sm:$0xff] }
  0x6c   : > { %1165 = vrot.lane.b32.xlu0 %v1145_v8, %s1788_s8  ;;  %v1085_v22 = vpack.c.b16 %v1078_v13, %v1078_v13  ;;  %594 = vrot.lane.b32.xlu2 %v579_v47, %s1789_s9  ;;  %v580_v40 = vrot.slane %v505_v24, 1  ;;  %v581_v41 = vrot.slane %v501_v4, 2  ;;  %v1702_v4 = vld [vmem:[%s2696_s1 + $0x8] sm:$0xff]  ;;  %v1242_v9 = vrot.slane %v1901_v14, 2 }
  0x6d   : > { %v437_v31 = vpack.c.b16 %v430_v23, %v430_v23  ;;  %v504_v35 = vsel %vm461_vm9, %v499_v21, %v503_v46  ;;  %754 = vmatpush.bf16.msra.mxu0 %v1706_v15  ;;  %1373 = vmatpush.bf16.msra.mxu3 %v1710_v6  ;;  %v507_v42 = vor.u32 %v505_v24, %v503_v46  ;;  %vm616_vm7 = vcmask 261120   ;;  %v1701_v21 = vld [vmem:[%s2696_s1] sm:$0xff] }
  0x6e   : > { %v1097_v30 = vrot.slane %v1085_v22, 7  ;;  %v582_v56 = vor.u32 %v581_v41, %v580_v40  ;;  %801 = vmatpush.bf16.msra.mxu1 %v1710_v6  ;;  %v1243_v44 = vsel %vm602_vm6, %v1241_v3, %v1242_v9  ;;  %v603_v46 = vrot.slane %v1912_v33, 2 }
  0x6f   : > { %v450_v34 = vrot.slane %v437_v31, 7  ;;  %1327 = vmatpush.bf16.msra.mxu2 %v1705_v45  ;;  %v604_v22 = vrot.slane %v1922_v39, 2  ;;  %v1244_v31 = vrot.slane %v1962_v27, 2  ;;  %v606_v24 = vrot.slane %v1985_v29, 2 }
  0x70   : > { %v1098_v37 = vsel %vm438_vm4, %v2134_v28, %v1097_v30  ;;  %v583_v18 = vsel %vm560_vm10, %v2156_v62, %v582_v56  ;;  %v1709_v62 = vld [vmem:[%s2696_s1 + $0x40] sm:$0xff]  ;;  %v1246_v41 = vrot.slane %v2012_v57, 2  ;;  %vm861_vm8 = vcmask 518144  }
  0x71   : > { %v2202_v38 = vsel %vm2187_vm5, %v1098_v37, 0  ;;  %v451_v51 = vsel %vm438_vm4, %v448_v61, %v450_v34  ;;  %755 = vmatpush.bf16.msra.mxu0 %v1705_v45  ;;  %1374 = vmatpush.bf16.msra.mxu3 %v1709_v62  ;;  %v607_v37 = vsel %vm602_vm6, %v604_v22, %v606_v24  ;;  %vm942_vm12 = vcmask 517120  }
  0x72   : > { %v1150_v5 = vshll.u32 %v2202_v38, 16  ;;  %v1184_v28 = vrot.slane %v2202_v38, 1  ;;  %v2221_v25 = vsel %vm2187_vm5, %v451_v51, 0  ;;  %v1154_v20 = vshrl.u32 %v2202_v38, 16  ;;  %802 = vmatpush.bf16.msra.mxu1 %v1709_v62 }
  0x73   : > { %554 = vrot.lane.b32.xlu1 %v543_v16, %s1790_s10  ;;  %v509_v54 = vshll.u32 %v2221_v25, 16  ;;  %1328 = vmatpush.bf16.msra.mxu2 %v1704_v58  ;;  %v513_v48 = vshrl.u32 %v2221_v25, 16  ;;  %v1245_v16 = vsel %vm602_vm6, %v1242_v9, %v1244_v31  ;;  %v610_v62 = vrot.slane %v2110_v1, 2 }
  0x74   : > { %524 = vrot.lane.b32.xlu0 %v504_v35, %s1788_s8  ;;  %v1152_v11 = vrot.slane %v1150_v5, 1  ;;  %1235 = vrot.lane.b32.xlu2 %v1222_v52, %s1789_s9  ;;  %v1185_v59 = vsel %vm532_vm11, %v1182_v50, %v1184_v28  ;;  %v1223_v61 = vrot.slane %v1154_v20, 1  ;;  %v1224_v2 = vrot.slane %v1150_v5, 2 }
  0x75   : > { %756 = vmatpush.bf16.msra.mxu0 %v1704_v58  ;;  %v544_v50 = vrot.slane %v2221_v25, 1  ;;  %v511_v32 = vrot.slane %v509_v54, 1  ;;  %v584_v13 = vrot.slane %v513_v48, 1  ;;  %v585_v19 = vrot.slane %v509_v54, 2  ;;  %1678 = vmatmul.msk.bf16.vlgmr.msra.gmra.mxu3 %vm616_vm7, %v1243_v44 }
  0x76   : > { %v1153_v60 = vsel %vm461_vm9, %v1148_v7, %v1152_v11  ;;  %v1225_v8 = vor.u32 %v1224_v2, %v1223_v61  ;;  %v1156_v23 = vor.u32 %v1154_v20, %v1152_v11  ;;  %v1247_v5 = vsel %vm602_vm6, %v1244_v31, %v1246_v41 }
  0x77   : > { %1329 = vmatpush.bf16.msra.mxu2 %v1703_v0  ;;  %v545_v47 = vsel %vm532_vm11, %v542_v17, %v544_v50  ;;  %v512_v53 = vsel %vm461_vm9, %v507_v42, %v511_v32  ;;  %v586_v17 = vor.u32 %v585_v19, %v584_v13  ;;  %v515_v30 = vor.u32 %v513_v48, %v511_v32 }
  0x78   : > { %v1226_v43 = vsel %vm560_vm10, %v2182_v12, %v1225_v8  ;;  %v605_v12 = vsel %vm602_vm6, %v603_v46, %v604_v22  ;;  %vm631_vm9 = vcmask 523264   ;;  %v1250_v13 = vrot.slane %v2142_v36, 2 }
  0x79   : > { %757 = vmatpush.bf16.msra.mxu0 %v1703_v0  ;;  %1658 = vmatmul.msk.bf16.vlgmr.msra.gmra.mxu1 %vm616_vm7, %v605_v12  ;;  %v587_v15 = vsel %vm560_vm10, %v582_v56, %v586_v17  ;;  %vm646_vm10 = vcmask 785408   ;;  %v608_v56 = vrot.slane %v2049_v63, 2  ;;  %v612_v46 = vrot.slane %v2167_v55, 2 }
  0x7a   : > { %vm929_vm11 = vcmask 519168   ;;  %vm943_vm13 = vsmask.f32 1280 }
  0x7b   : > { %1196 = vrot.lane.b32.xlu1 %v1185_v59, %s1790_s10  ;;  %1330 = vmatpush.bf16.msra.mxu2 %v1702_v4  ;;  %vm2666_vm14 = vmand %vm942_vm12, %vm943_vm13 }
  0x7c   : > { %1167 = vrot.lane.b32.xlu0 %v1153_v60, %s1788_s8  ;;  %596 = vrot.lane.b32.xlu2 %v583_v18, %s1789_s9  ;;  %v609_v60 = vsel %vm602_vm6, %v606_v24, %v608_v56  ;;  %v1248_v18 = vrot.slane %v2079_v49, 2 }
  0x7d   : > { %758 = vmatpush.bf16.msra.mxu0 %v1702_v4  ;;  %v611_v4 = vsel %vm602_vm6, %v608_v56, %v610_v62 }
  0x7e   : > { %v1249_v2 = vsel %vm602_vm6, %v1246_v41, %v1248_v18 }
  0x7f   : > { %1331 = vmatpush.bf16.msra.mxu2 %v1701_v21 }
  0x81   : > { %759 = vmatpush.bf16.msra.mxu0 %v1701_v21 }
  0x83   : > { %556 = vrot.lane.b32.xlu1 %v545_v47, %s1790_s10 }
  0x84   : > { %526 = vrot.lane.b32.xlu0 %v512_v53, %s1788_s8  ;;  %1237 = vrot.lane.b32.xlu2 %v1226_v43, %s1789_s9 }
  0x85   : > { %1679 = vmatmul.msk.bf16.gmra.mxu3 %vm616_vm7, %v1245_v16  ;;  %v1252_v16 = vrot.slane %v2202_v38, 2 }
  0x89   : > { %1659 = vmatmul.msk.bf16.gmra.mxu1 %vm616_vm7, %v607_v37 }
  0x8b   : > { %1198 = vrot.lane.b32.xlu1 %v1184_v28, %s1790_s10 }
  0x8c   : > { %1169 = vrot.lane.b32.xlu0 %v1156_v23, %s1788_s8  ;;  %598 = vrot.lane.b32.xlu2 %v587_v15, %s1789_s9  ;;  %v547_v26 = vpop.permute.xlu2 %546  ;;  %v613_v23 = vsel %vm602_vm6, %v610_v62, %v612_v46 }
  0x93   : > { %558 = vrot.lane.b32.xlu1 %v544_v50, %s1790_s10 }
  0x94   : > { %528 = vrot.lane.b32.xlu0 %v515_v30, %s1788_s8  ;;  %1239 = vrot.lane.b32.xlu2 %v1225_v8, %s1789_s9 }
  0x95   : > { %1680 = vmatmul.msk.bf16.gmra.mxu3 %vm616_vm7, %v1247_v5 }
  0x96   : > { %v589_v35 = vpop.permute.xlu2 %588 }
  0x99   : > { %1660 = vmatmul.msk.bf16.gmra.mxu1 %vm616_vm7, %v609_v60 }
  0x9c   : > { %v1158_v34 = vpop.permute.xlu0 %1157  ;;  %600 = vrot.lane.b32.xlu2 %v586_v17, %s1789_s9 }
  0x9d   : > { %v1228_v52 = vpop.permute.xlu1 %1227  ;;  %v1255_v51 = vsel %vm616_vm7, %v1895_v10, %v1158_v34 }
  0x9e   : > { %v1230_v40 = vpop.permute.xlu2 %1229 }
  0xa4   : > { %v1187_v28 = vpop.permute.xlu0 %1186 }
  0xa5   : > { %v1269_v45 = vsel %vm631_vm9, %v1255_v51, %v1187_v28  ;;  %v517_v6 = vpop.permute.xlu1 %516  ;;  %1681 = vmatmul.msk.bf16.gmra.mxu3 %vm616_vm7, %v1249_v2 }
  0xa6   : > { %v618_v7 = vsel %vm616_vm7, %v1912_v33, %v517_v6  ;;  %v1283_v11 = vsel %vm646_vm10, %v1269_v45, %v1228_v52  ;;  %v591_v59 = vpop.permute.xlu2 %590 }
  0xa7   : > { %1332 = vmatmul.bf16.vlgmr.msra.gmra.mxu2 %v1283_v11  ;;  %v633_v58 = vsel %vm631_vm9, %v618_v7, %v547_v26 }
  0xa8   : > { %v648_v20 = vsel %vm646_vm10, %v633_v58, %v589_v35 }
  0xa9   : > { %760 = vmatmul.bf16.vlgmr.msra.gmra.mxu0 %v648_v20  ;;  %1661 = vmatmul.msk.bf16.gmra.mxu1 %vm616_vm7, %v611_v4 }
  0xad   : > { %v1189_v10 = vpop.permute.xlu1 %1188 }
  0xae   : > { %v1160_v54 = vpop.permute.xlu0 %1159  ;;  %v1232_v61 = vpop.permute.xlu2 %1231 }
  0xaf   : > { %v1257_v33 = vsel %vm616_vm7, %v1901_v14, %v1160_v54 }
  0xb0   : > { %v1271_v0 = vsel %vm631_vm9, %v1257_v33, %v1189_v10 }
  0xb1   : > { %v1286_v32 = vsel %vm646_vm10, %v1271_v0, %v1230_v40  ;;  %v614_v40 = vrot.slane %v2221_v25, 2 }
  0xb3   : > { %v615_v5 = vsel %vm602_vm6, %v612_v46, %v614_v40 }
  0xb5   : > { %v549_v50 = vpop.permute.xlu1 %548 }
  0xb6   : > { %v519_v42 = vpop.permute.xlu0 %518  ;;  %v593_v8 = vpop.permute.xlu2 %592 }
  0xb7   : > { %v620_v3 = vsel %vm616_vm7, %v1922_v39, %v519_v42  ;;  %1337 = vmatmul.bf16.gmra.mxu2 %v1286_v32  ;;  %v1251_v39 = vsel %vm602_vm6, %v1248_v18, %v1250_v13 }
  0xb8   : > { %v635_v14 = vsel %vm631_vm9, %v620_v3, %v549_v50  ;;  %1682 = vmatmul.msk.bf16.gmra.mxu3 %vm616_vm7, %v1251_v39 }
  0xb9   : > { %v651_v9 = vsel %vm646_vm10, %v635_v14, %v591_v59  ;;  %1662 = vmatmul.msk.bf16.gmra.mxu1 %vm616_vm7, %v613_v23 }
  0xba   : > { %765 = vmatmul.bf16.gmra.mxu0 %v651_v9 }
  0xbd   : > { %v1191_v47 = vpop.permute.xlu1 %1190 }
  0xbe   : > { %v1162_v48 = vpop.permute.xlu0 %1161  ;;  %v1234_v44 = vpop.permute.xlu2 %1233 }
  0xbf   : > { %v1259_v53 = vsel %vm616_vm7, %v1962_v27, %v1162_v48 }
  0xc0   : > { %v1273_v43 = vsel %vm631_vm9, %v1259_v53, %v1191_v47 }
  0xc1   : > { %v1289_v17 = vsel %vm646_vm10, %v1273_v43, %v1232_v61 }
  0xc5   : > { %v551_v19 = vpop.permute.xlu1 %550 }
  0xc6   : > { %v521_v21 = vpop.permute.xlu0 %520  ;;  %v595_v15 = vpop.permute.xlu2 %594 }
  0xc7   : > { %v622_v22 = vsel %vm616_vm7, %v1985_v29, %v521_v21  ;;  %1342 = vmatmul.bf16.gmra.mxu2 %v1289_v17  ;;  %v1253_v29 = vsel %vm602_vm6, %v1250_v13, %v1252_v16 }
  0xc8   : > { %v637_v27 = vsel %vm631_vm9, %v622_v22, %v551_v19  ;;  %1683 = vmatmul.msk.bf16.gmra.mxu3 %vm616_vm7, %v1253_v29 }
  0xc9   : > { %v654_v12 = vsel %vm646_vm10, %v637_v27, %v593_v8  ;;  %1663 = vmatmul.msk.bf16.gmra.mxu1 %vm616_vm7, %v615_v5 }
  0xca   : > { %770 = vmatmul.bf16.gmra.mxu0 %v654_v12 }
  0xcd   : > { %v1193_v26 = vpop.permute.xlu1 %1192 }
  0xce   : > { %v1164_v30 = vpop.permute.xlu0 %1163  ;;  %v1236_v35 = vpop.permute.xlu2 %1235 }
  0xcf   : > { %v1261_v31 = vsel %vm616_vm7, %v2012_v57, %v1164_v30 }
  0xd0   : > { %v1275_v24 = vsel %vm631_vm9, %v1261_v31, %v1193_v26 }
  0xd1   : > { %v1292_v52 = vsel %vm646_vm10, %v1275_v24, %v1234_v44 }
  0xd5   : > { %v553_v37 = vpop.permute.xlu1 %552 }
  0xd6   : > { %v523_v34 = vpop.permute.xlu0 %522  ;;  %v597_v45 = vpop.permute.xlu2 %596 }
  0xd7   : > { %v624_v41 = vsel %vm616_vm7, %v2049_v63, %v523_v34  ;;  %1347 = vmatmul.bf16.gmra.mxu2 %v1292_v52 }
  0xd8   : > { %v639_v57 = vsel %vm631_vm9, %v624_v41, %v553_v37  ;;  %1684 = vmatmul.msk.bf16.gmra.mxu3 %vm616_vm7, %v1252_v16 }
  0xd9   : > { %v657_v51 = vsel %vm646_vm10, %v639_v57, %v595_v15  ;;  %1664 = vmatmul.msk.bf16.gmra.mxu1 %vm616_vm7, %v614_v40 }
  0xda   : > { %775 = vmatmul.bf16.gmra.mxu0 %v657_v51 }
  0xdd   : > { %v1195_v28 = vpop.permute.xlu1 %1194 }
  0xde   : > { %v1166_v6 = vpop.permute.xlu0 %1165  ;;  %v1238_v20 = vpop.permute.xlu2 %1237 }
  0xdf   : > { %v1263_v7 = vsel %vm616_vm7, %v2079_v49, %v1166_v6 }
  0xe0   : > { %v1277_v11 = vsel %vm631_vm9, %v1263_v7, %v1195_v28 }
  0xe1   : > { %v1295_v58 = vsel %vm646_vm10, %v1277_v11, %v1236_v35 }
  0xe5   : > { %v555_v63 = vpop.permute.xlu1 %554 }
  0xe6   : > { %v525_v56 = vpop.permute.xlu0 %524  ;;  %v599_v33 = vpop.permute.xlu2 %598 }
  0xe7   : > { %v626_v59 = vsel %vm616_vm7, %v2110_v1, %v525_v56  ;;  %1352 = vmatmul.bf16.gmra.mxu2 %v1295_v58 }
  0xe8   : > { %v641_v60 = vsel %vm631_vm9, %v626_v59, %v555_v63 }
  0xe9   : > { %v660_v10 = vsel %vm646_vm10, %v641_v60, %v597_v45 }
  0xea   : > { %780 = vmatmul.bf16.gmra.mxu0 %v660_v10 }
  0xed   : > { %v1197_v49 = vpop.permute.xlu1 %1196 }
  0xee   : > { %v1168_v54 = vpop.permute.xlu0 %1167  ;;  %v1240_v62 = vpop.permute.xlu2 %1239 }
  0xef   : > { %v1265_v61 = vsel %vm616_vm7, %v2142_v36, %v1168_v54 }
  0xf0   : > { %v1279_v18 = vsel %vm631_vm9, %v1265_v61, %v1197_v49 }
  0xf1   : > { %v1298_v1 = vsel %vm646_vm10, %v1279_v18, %v1238_v20 }
  0xf5   : > { %v557_v2 = vpop.permute.xlu1 %556 }
  0xf6   : > { %v527_v0 = vpop.permute.xlu0 %526  ;;  %v601_v9 = vpop.permute.xlu2 %600 }
  0xf7   : > { %v628_v50 = vsel %vm616_vm7, %v2167_v55, %v527_v0  ;;  %1357 = vmatmul.bf16.gmra.mxu2 %v1298_v1  ;;  %v804_v55 = vpop.f32.mrf.mxu1 }
  0xf8   : > { %v643_v42 = vsel %vm631_vm9, %v628_v50, %v557_v2  ;;  %v1376_v53 = vpop.f32.mrf.mxu3 }
  0xf9   : > { %v663_v32 = vsel %vm646_vm10, %v643_v42, %v599_v33 }
  0xfa   : > { %785 = vmatmul.bf16.gmra.mxu0 %v663_v32 }
  0xfd   : > { %v1199_v3 = vpop.permute.xlu1 %1198 }
  0xfe   : > { %v1170_v8 = vpop.permute.xlu0 %1169 }
  0xff   : > { %v1267_v36 = vsel %vm616_vm7, %v2202_v38, %v1170_v8  ;;  %v806_v38 = vpop.f32.mrf.mxu1 }
 0x100   : > { %v1281_v14 = vsel %vm631_vm9, %v1267_v36, %v1199_v3  ;;  %v1378_v43 = vpop.f32.mrf.mxu3 }
 0x101   : > { %v1301_v48 = vsel %vm646_vm10, %v1281_v14, %v1240_v62 }
 0x105   : > { %v559_v4 = vpop.permute.xlu1 %558 }
 0x106   : > { %v529_v47 = vpop.permute.xlu0 %528 }
 0x107   : > { %v630_v44 = vsel %vm616_vm7, %v2221_v25, %v529_v47  ;;  %1362 = vmatmul.bf16.gmra.mxu2 %v1301_v48  ;;  %v809_v19 = vpop.f32.mrf.mxu1  ;;  %v2375_v25 = vld [vmem:[%s2697_s2] ss:$0 sm:$0xff] }
 0x108   : > { %v645_v13 = vsel %vm631_vm9, %v630_v44, %v559_v4  ;;  %v1381_v21 = vpop.f32.mrf.mxu3 }
 0x109   : > { %v666_v39 = vsel %vm646_vm10, %v645_v13, %v601_v9 }
 0x10a   : > { %790 = vmatmul.bf16.gmra.mxu0 %v666_v39 }
 0x10f   : > { %v2368_v17 = vpop.f32.mrf.mxu1 }
 0x110   : > { %v2370_v46 = vpop.f32.mrf.mxu3 }
 0x117   : > { %v2377_v27 = vpop.f32.mrf.mxu1 }
 0x118   : > { %v2380_v12 = vpop.f32.mrf.mxu3 }
 0x11f   : > { %v2392_v24 = vpop.f32.mrf.mxu1 }
 0x120   : > { %v2395_v34 = vpop.f32.mrf.mxu3 }
 0x126   : > { %v761_v22 = vpop.f32.mrf.mxu0 }
 0x127   : > { %v762_v23 = vadd.f32 %v2375_v25, %v761_v22  ;;  %v2406_v59 = vpop.f32.mrf.mxu1 }
 0x128   : > { %v2410_v61 = vpop.f32.mrf.mxu3 }
 0x129   : > { %v805_v15 = vadd.f32 %v804_v55, %v762_v23 }
 0x12a   : > { %v1333_v26 = vpop.f32.mrf.mxu2 }
 0x12b   : > { %v916_v30 = vpack.c.bf16 %v805_v15, %v805_v15  ;;  %v1334_v31 = vadd.f32 %v2375_v25, %v1333_v26  ;;  %v871_v52 = vmul.f32 %v805_v15, %v805_v15  ;;  %v838_v41 = vsel %vm631_vm9, %v805_v15, 0.0 }
 0x12d   : > { %930 = vst.msk [vmem:[%s2387_s15] sm:$0xf] %vm929_vm11, %v916_v30  ;;  %v1377_v16 = vadd.f32 %v1376_v53, %v1334_v31  ;;  %v884_v7 = vsel %vm631_vm9, %v871_v52, 0.0 }
 0x12e   : > { %v763_v29 = vpop.f32.mrf.mxu0 }
 0x12f   : > { %v1487_v35 = vpack.c.bf16 %v1377_v16, %v1377_v16  ;;  %v764_v37 = vadd.f32 %v2375_v25, %v763_v29  ;;  %v1442_v11 = vmul.f32 %v1377_v16, %v1377_v16  ;;  %v1410_v20 = vsel %vm631_vm9, %v1377_v16, 0.0  ;;  %v821_v9 = vpop.f32.mrf.mxu1 }
 0x130   : > { %v1393_v44 = vpop.f32.mrf.mxu3 }
 0x131   : > { %1685 = vst.msk [vmem:[%s2387_s15 + $0x34] sm:$0xf] %vm929_vm11, %v1487_v35  ;;  %v807_v40 = vadd.f32 %v806_v38, %v764_v37  ;;  %v1455_v2 = vsel %vm631_vm9, %v1442_v11, 0.0 }
 0x132   : > { %v1335_v57 = vpop.f32.mrf.mxu2 }
 0x133   : > { %v839_v5 = vsel %vm631_vm9, %v807_v40, 0.0  ;;  %v872_v51 = vmul.f32 %v807_v40, %v807_v40  ;;  %v917_v28 = vpack.c.bf16 %v807_v40, %v807_v40  ;;  %v1336_v45 = vadd.f32 %v2375_v25, %v1335_v57 }
 0x134   : > { %v840_v6 = vadd.f32 %v839_v5, %v838_v41 }
 0x135   : > { %v885_v63 = vsel %vm631_vm9, %v872_v51, 0.0  ;;  %931 = vst.msk [vmem:[%s2387_s15 + $0x4] sm:$0xf] %vm929_vm11, %v917_v28  ;;  %v1379_v56 = vadd.f32 %v1378_v43, %v1336_v45 }
 0x136   : > { %v886_v58 = vadd.f32 %v885_v63, %v884_v7 }
 0x137   : > { %v1411_v60 = vsel %vm631_vm9, %v1379_v56, 0.0  ;;  %v1443_v10 = vmul.f32 %v1379_v56, %v1379_v56  ;;  %v1488_v49 = vpack.c.bf16 %v1379_v56, %v1379_v56  ;;  %v766_v54 = vpop.f32.mrf.mxu0 }
 0x138   : > { %v2412_v33 = vadd.f32 %v1411_v60, %v1410_v20  ;;  %v767_v18 = vadd.f32 %v2375_v25, %v766_v54 }
 0x139   : > { %v1456_v0 = vsel %vm631_vm9, %v1443_v10, 0.0  ;;  %1686 = vst.msk [vmem:[%s2387_s15 + $0x38] sm:$0xf] %vm929_vm11, %v1488_v49 }
 0x13a   : > { %v2419_v1 = vadd.f32 %v1456_v0, %v1455_v2  ;;  %v810_v50 = vadd.f32 %v809_v19, %v767_v18  ;;  %v1338_v42 = vpop.f32.mrf.mxu2 }
 0x13b   : > { %v1339_v32 = vadd.f32 %v2375_v25, %v1338_v42 }
 0x13c   : > { %v841_v62 = vsel %vm631_vm9, %v810_v50, 0.0  ;;  %v873_v3 = vmul.f32 %v810_v50, %v810_v50  ;;  %v918_v8 = vpack.c.bf16 %v810_v50, %v810_v50 }
 0x13d   : > { %v2423_v36 = vadd.f32 %v841_v62, %v840_v6  ;;  %v2425_v14 = vadd.f32 %v1381_v21, %v1339_v32  ;;  %v824_v21 = vpop.f32.mrf.mxu1 }
 0x13e   : > { %v887_v4 = vsel %vm631_vm9, %v873_v3, 0.0  ;;  %932 = vst.msk [vmem:[%s2387_s15 + $0x8] sm:$0xf] %vm929_vm11, %v918_v8 }
 0x13f   : > { %v2430_v47 = vadd.f32 %v887_v4, %v886_v58  ;;  %v1489_v48 = vpack.c.bf16 %v2425_v14, %v2425_v14  ;;  %v768_v55 = vpop.f32.mrf.mxu0  ;;  %v1444_v4 = vmul.f32 %v2425_v14, %v2425_v14 }
 0x140   : > { %v769_v53 = vadd.f32 %v2375_v25, %v768_v55  ;;  %v1413_v55 = vsel %vm631_vm9, %v2425_v14, 0.0 }
 0x141   : > { %1687 = vst.msk [vmem:[%s2387_s15 + $0x3c] sm:$0xf] %vm929_vm11, %v1489_v48 }
 0x142   : > { %v2438_v13 = vadd.f32 %v2368_v17, %v769_v53  ;;  %v1340_v39 = vpop.f32.mrf.mxu2  ;;  %v1396_v17 = vpop.f32.mrf.mxu3 }
 0x143   : > { %v1341_v38 = vadd.f32 %v2375_v25, %v1340_v39 }
 0x144   : > { %v919_v43 = vpack.c.bf16 %v2438_v13, %v2438_v13 }
 0x145   : > { %v2444_v19 = vadd.f32 %v2370_v46, %v1341_v38  ;;  %v2464_v29 = vpop.f32.mrf.mxu1 }
 0x146   : > { %933 = vst.msk [vmem:[%s2387_s15 + $0xc] sm:$0xf] %vm929_vm11, %v919_v43  ;;  %v1458_v43 = vsel %vm631_vm9, %v1444_v4, 0.0 }
 0x147   : > { %v1490_v22 = vpack.c.bf16 %v2444_v19, %v2444_v19  ;;  %v771_v23 = vpop.f32.mrf.mxu0  ;;  %v1445_v53 = vmul.f32 %v2444_v19, %v2444_v19 }
 0x148   : > { %v772_v15 = vadd.f32 %v2375_v25, %v771_v23 }
 0x149   : > { %1688 = vst.msk [vmem:[%s2387_s15 + $0x40] sm:$0xf] %vm929_vm11, %v1490_v22 }
 0x14a   : > { %v2454_v26 = vadd.f32 %v2377_v27, %v772_v15  ;;  %v1343_v30 = vpop.f32.mrf.mxu2  ;;  %v2468_v37 = vpop.f32.mrf.mxu3  ;;  %v1414_v15 = vadd.f32 %v1413_v55, %v2412_v33 }
 0x14b   : > { %v1344_v46 = vadd.f32 %v2375_v25, %v1343_v30  ;;  %v843_v30 = vsel %vm631_vm9, %v2438_v13, 0.0 }
 0x14c   : > { %v920_v31 = vpack.c.bf16 %v2454_v26, %v2454_v26  ;;  %v845_v33 = vsel %vm631_vm9, %v2454_v26, 0.0 }
 0x14d   : > { %v2460_v16 = vadd.f32 %v2380_v12, %v1344_v46  ;;  %v2484_v51 = vpop.f32.mrf.mxu1 }
 0x14e   : > { %934 = vst.msk [vmem:[%s2387_s15 + $0x10] sm:$0xf] %vm929_vm11, %v920_v31  ;;  %v1415_v31 = vsel %vm631_vm9, %v2444_v19, 0.0  ;;  %v844_v19 = vadd.f32 %v843_v30, %v2423_v36 }
 0x14f   : > { %v1491_v35 = vpack.c.bf16 %v2460_v16, %v2460_v16  ;;  %v773_v27 = vpop.f32.mrf.mxu0 }
 0x150   : > { %v774_v52 = vadd.f32 %v2375_v25, %v773_v27  ;;  %v1446_v27 = vmul.f32 %v2460_v16, %v2460_v16 }
 0x151   : > { %1689 = vst.msk [vmem:[%s2387_s15 + $0x44] sm:$0xf] %vm929_vm11, %v1491_v35  ;;  %v1460_v35 = vsel %vm631_vm9, %v1445_v53, 0.0 }
 0x152   : > { %v2474_v40 = vadd.f32 %v2392_v24, %v774_v52  ;;  %v1345_v12 = vpop.f32.mrf.mxu2  ;;  %v2488_v45 = vpop.f32.mrf.mxu3  ;;  %v1459_v52 = vadd.f32 %v1458_v43, %v2419_v1  ;;  %v1462_v36 = vsel %vm631_vm9, %v1446_v27, 0.0 }
 0x153   : > { %v1346_v41 = vadd.f32 %v2375_v25, %v1345_v12 }
 0x154   : > { %v921_v57 = vpack.c.bf16 %v2474_v40, %v2474_v40 }
 0x155   : > { %v2480_v5 = vadd.f32 %v2395_v34, %v1346_v41  ;;  %v2504_v58 = vpop.f32.mrf.mxu1 }
 0x156   : > { %935 = vst.msk [vmem:[%s2387_s15 + $0x14] sm:$0xf] %vm929_vm11, %v921_v57 }
 0x157   : > { %v1492_v28 = vpack.c.bf16 %v2480_v5, %v2480_v5  ;;  %v776_v24 = vpop.f32.mrf.mxu0 }
 0x158   : > { %v777_v6 = vadd.f32 %v2375_v25, %v776_v24 }
 0x159   : > { %1690 = vst.msk [vmem:[%s2387_s15 + $0x48] sm:$0xf] %vm929_vm11, %v1492_v28  ;;  %v1447_v28 = vmul.f32 %v2480_v5, %v2480_v5 }
 0x15a   : > { %v2494_v7 = vadd.f32 %v2406_v59, %v777_v6  ;;  %v1348_v34 = vpop.f32.mrf.mxu2  ;;  %v2508_v60 = vpop.f32.mrf.mxu3  ;;  %v1461_v6 = vadd.f32 %v1460_v35, %v1459_v52 }
 0x15b   : > { %v1349_v11 = vadd.f32 %v2375_v25, %v1348_v34 }
 0x15c   : > { %v922_v63 = vpack.c.bf16 %v2494_v7, %v2494_v7 }
 0x15d   : > { %v2500_v56 = vadd.f32 %v2410_v61, %v1349_v11  ;;  %v2522_v0 = vpop.f32.mrf.mxu1  ;;  %v1417_v11 = vsel %vm631_vm9, %v2460_v16, 0.0  ;;  %v877_v16 = vmul.f32 %v2494_v7, %v2494_v7 }
 0x15e   : > { %936 = vst.msk [vmem:[%s2387_s15 + $0x18] sm:$0xf] %vm929_vm11, %v922_v63 }
 0x15f   : > { %v1493_v20 = vpack.c.bf16 %v2500_v56, %v2500_v56  ;;  %v778_v59 = vpop.f32.mrf.mxu0  ;;  %v1421_v43 = vsel %vm631_vm9, %v2500_v56, 0.0 }
 0x160   : > { %v779_v10 = vadd.f32 %v2375_v25, %v778_v59  ;;  %v847_v59 = vsel %vm631_vm9, %v2474_v40, 0.0 }
 0x161   : > { %1691 = vst.msk [vmem:[%s2387_s15 + $0x4c] sm:$0xf] %vm929_vm11, %v1493_v20 }
 0x162   : > { %v2513_v49 = vadd.f32 %v821_v9, %v779_v10  ;;  %v1350_v54 = vpop.f32.mrf.mxu2  ;;  %v2526_v32 = vpop.f32.mrf.mxu3  ;;  %v1419_v10 = vsel %vm631_vm9, %v2480_v5, 0.0 }
 0x163   : > { %v1351_v61 = vadd.f32 %v2375_v25, %v1350_v54  ;;  %v1464_v54 = vsel %vm631_vm9, %v1447_v28, 0.0 }
 0x164   : > { %v923_v18 = vpack.c.bf16 %v2513_v49, %v2513_v49 }
 0x165   : > { %v2518_v2 = vadd.f32 %v1393_v44, %v1351_v61  ;;  %v874_v44 = vmul.f32 %v2438_v13, %v2438_v13  ;;  %v836_v38 = vpop.f32.mrf.mxu1  ;;  %v876_v13 = vmul.f32 %v2474_v40, %v2474_v40 }
 0x166   : > { %937 = vst.msk [vmem:[%s2387_s15 + $0x1c] sm:$0xf] %vm929_vm11, %v923_v18  ;;  %v895_v38 = vsel %vm631_vm9, %v877_v16, 0.0 }
 0x167   : > { %v1494_v50 = vpack.c.bf16 %v2518_v2, %v2518_v2  ;;  %v781_v42 = vpop.f32.mrf.mxu0  ;;  %v889_v46 = vsel %vm631_vm9, %v874_v44, 0.0  ;;  %v1449_v4 = vmul.f32 %v2518_v2, %v2518_v2 }
 0x168   : > { %v782_v62 = vadd.f32 %v2375_v25, %v781_v42  ;;  %v890_v24 = vadd.f32 %v889_v46, %v2430_v47  ;;  %v893_v47 = vsel %vm631_vm9, %v876_v13, 0.0  ;;  %v878_v42 = vmul.f32 %v2513_v49, %v2513_v49 }
 0x169   : > { %1692 = vst.msk [vmem:[%s2387_s15 + $0x50] sm:$0xf] %vm929_vm11, %v1494_v50  ;;  %v1463_v50 = vadd.f32 %v1462_v36, %v1461_v6  ;;  %v1468_v30 = vsel %vm631_vm9, %v1449_v4, 0.0 }
 0x16a   : > { %v2531_v3 = vadd.f32 %v824_v21, %v782_v62  ;;  %v1353_v8 = vpop.f32.mrf.mxu2  ;;  %v875_v21 = vmul.f32 %v2454_v26, %v2454_v26  ;;  %v1408_v23 = vpop.f32.mrf.mxu3  ;;  %v1416_v26 = vadd.f32 %v1415_v31, %v1414_v15 }
 0x16b   : > { %v1354_v9 = vadd.f32 %v2375_v25, %v1353_v8  ;;  %v849_v8 = vsel %vm631_vm9, %v2494_v7, 0.0  ;;  %v1465_v55 = vadd.f32 %v1464_v54, %v1463_v50  ;;  %v897_v23 = vsel %vm631_vm9, %v878_v42, 0.0 }
 0x16c   : > { %v924_v48 = vpack.c.bf16 %v2531_v3, %v2531_v3  ;;  %v891_v57 = vsel %vm631_vm9, %v875_v21, 0.0  ;;  %v1418_v18 = vadd.f32 %v1417_v11, %v1416_v26 }
 0x16d   : > { %v2544_v39 = vadd.f32 %v1396_v17, %v1354_v9  ;;  %v892_v20 = vadd.f32 %v891_v57, %v890_v24 }
 0x16e   : > { %938 = vst.msk [vmem:[%s2387_s15 + $0x20] sm:$0xf] %vm929_vm11, %v924_v48  ;;  %v1420_v48 = vadd.f32 %v1419_v10, %v1418_v18 }
 0x16f   : > { %v1495_v14 = vpack.c.bf16 %v2544_v39, %v2544_v39  ;;  %v783_v22 = vpop.f32.mrf.mxu0  ;;  %v894_v9 = vadd.f32 %v893_v47, %v892_v20 }
 0x170   : > { %v784_v17 = vadd.f32 %v2375_v25, %v783_v22  ;;  %v851_v22 = vsel %vm631_vm9, %v2513_v49, 0.0  ;;  %v1422_v31 = vadd.f32 %v1421_v43, %v1420_v48 }
 0x171   : > { %1693 = vst.msk [vmem:[%s2387_s15 + $0x54] sm:$0xf] %vm929_vm11, %v1495_v14  ;;  %v896_v46 = vadd.f32 %v895_v38, %v894_v9 }
 0x172   : > { %v2571_v12 = vadd.f32 %v2464_v29, %v784_v17  ;;  %v1355_v41 = vpop.f32.mrf.mxu2  ;;  %v846_v29 = vadd.f32 %v845_v33, %v844_v19  ;;  %v879_v17 = vmul.f32 %v2531_v3, %v2531_v3  ;;  %v853_v19 = vsel %vm631_vm9, %v2531_v3, 0.0 }
 0x173   : > { %v1356_v1 = vadd.f32 %v2375_v25, %v1355_v41  ;;  %v898_v33 = vadd.f32 %v897_v23, %v896_v46 }
 0x174   : > { %v925_v34 = vpack.c.bf16 %v2571_v12, %v2571_v12  ;;  %v848_v62 = vadd.f32 %v847_v59, %v846_v29  ;;  %v899_v57 = vsel %vm631_vm9, %v879_v17, 0.0  ;;  %v880_v28 = vmul.f32 %v2571_v12, %v2571_v12 }
 0x175   : > { %v2585_v63 = vadd.f32 %v2468_v37, %v1356_v1  ;;  %v1448_v37 = vmul.f32 %v2500_v56, %v2500_v56  ;;  %v1425_v1 = vsel %vm631_vm9, %v2544_v39, 0.0  ;;  %v855_v3 = vsel %vm631_vm9, %v2571_v12, 0.0 }
 0x176   : > { %939 = vst.msk [vmem:[%s2387_s15 + $0x24] sm:$0xf] %vm929_vm11, %v925_v34  ;;  %v850_v14 = vadd.f32 %v849_v8, %v848_v62  ;;  %v900_v36 = vadd.f32 %v899_v57, %v898_v33  ;;  %v901_v59 = vsel %vm631_vm9, %v880_v28, 0.0 }
 0x177   : > { %v1496_v61 = vpack.c.bf16 %v2585_v63, %v2585_v63  ;;  %v786_v40 = vpop.f32.mrf.mxu0  ;;  %v1466_v21 = vsel %vm631_vm9, %v1448_v37, 0.0  ;;  %v1451_v6 = vmul.f32 %v2585_v63, %v2585_v63  ;;  %v1427_v12 = vsel %vm631_vm9, %v2585_v63, 0.0 }
 0x178   : > { %v787_v5 = vadd.f32 %v2375_v25, %v786_v40  ;;  %v1467_v35 = vadd.f32 %v1466_v21, %v1465_v55  ;;  %v852_v49 = vadd.f32 %v851_v22, %v850_v14  ;;  %v945_v22 = vld [vmem:[%s2387_s15 + $0x30] sm:$0x3] }
 0x179   : > { %1694 = vst.msk [vmem:[%s2387_s15 + $0x58] sm:$0xf] %vm929_vm11, %v1496_v61  ;;  %v1472_v37 = vsel %vm631_vm9, %v1451_v6, 0.0 }
 0x17a   : > { %v830_v44 = vadd.f32 %v2484_v51, %v787_v5  ;;  %v1358_v53 = vpop.f32.mrf.mxu2  ;;  %v1423_v51 = vsel %vm631_vm9, %v2518_v2, 0.0  ;;  %v1469_v41 = vadd.f32 %v1468_v30, %v1467_v35  ;;  %v854_v11 = vadd.f32 %v853_v19, %v852_v49 }
 0x17b   : > { %v1359_v7 = vadd.f32 %v2375_v25, %v1358_v53  ;;  %v1424_v13 = vadd.f32 %v1423_v51, %v1422_v31  ;;  %v902_v5 = vadd.f32 %v901_v59, %v900_v36  ;;  %v1697_v59 = vld [vmem:[%s2387_s15 + $0x64] sm:$0x3] }
 0x17c   : > { %v926_v15 = vpack.c.bf16 %v830_v44, %v830_v44  ;;  %v881_v34 = vmul.f32 %v830_v44, %v830_v44  ;;  %v856_v10 = vadd.f32 %v855_v3, %v854_v11  ;;  %v857_v54 = vsel %vm631_vm9, %v830_v44, 0.0 }
 0x17d   : > { %v1402_v56 = vadd.f32 %v2488_v45, %v1359_v7  ;;  %v1450_v45 = vmul.f32 %v2544_v39, %v2544_v39  ;;  %v1426_v39 = vadd.f32 %v1425_v1, %v1424_v13 }
 0x17e   : > { %940 = vst.msk [vmem:[%s2387_s15 + $0x28] sm:$0xf] %vm929_vm11, %v926_v15  ;;  %v903_v61 = vsel %vm631_vm9, %v881_v34, 0.0  ;;  %v858_v8 = vadd.f32 %v857_v54, %v856_v10 }
 0x17f   : > { %v1497_v27 = vpack.c.bf16 %v1402_v56, %v1402_v56  ;;  %v788_v52 = vpop.f32.mrf.mxu0  ;;  %v1452_v40 = vmul.f32 %v1402_v56, %v1402_v56  ;;  %v1428_v62 = vadd.f32 %v1427_v12, %v1426_v39  ;;  %v1429_v4 = vsel %vm631_vm9, %v1402_v56, 0.0 }
 0x180   : > { %v789_v2 = vadd.f32 %v2375_v25, %v788_v52  ;;  %v904_v55 = vadd.f32 %v903_v61, %v902_v5 }
 0x181   : > { %1695 = vst.msk [vmem:[%s2387_s15 + $0x5c] sm:$0xf] %vm929_vm11, %v1497_v27  ;;  %v1474_v43 = vsel %vm631_vm9, %v1452_v40, 0.0  ;;  %v1430_v15 = vadd.f32 %v1429_v4, %v1428_v62 }
 0x182   : > { %v832_v24 = vadd.f32 %v2504_v58, %v789_v2  ;;  %v1360_v26 = vpop.f32.mrf.mxu2  ;;  %v1470_v58 = vsel %vm631_vm9, %v1450_v45, 0.0 }
 0x183   : > { %v1361_v29 = vadd.f32 %v2375_v25, %v1360_v26  ;;  %v1471_v42 = vadd.f32 %v1470_v58, %v1469_v41 }
 0x184   : > { %v927_v20 = vpack.c.bf16 %v832_v24, %v832_v24  ;;  %v882_v16 = vmul.f32 %v832_v24, %v832_v24 }
 0x185   : > { %v1404_v47 = vadd.f32 %v2508_v60, %v1361_v29  ;;  %v859_v60 = vsel %vm631_vm9, %v832_v24, 0.0  ;;  %v1473_v48 = vadd.f32 %v1472_v37, %v1471_v42 }
 0x186   : > { %941 = vst.msk [vmem:[%s2387_s15 + $0x2c] sm:$0xf] %vm929_vm11, %v927_v20  ;;  %v905_v44 = vsel %vm631_vm9, %v882_v16, 0.0  ;;  %v860_v21 = vadd.f32 %v859_v60, %v858_v8 }
 0x187   : > { %v1498_v18 = vpack.c.bf16 %v1404_v47, %v1404_v47  ;;  %v791_v50 = vpop.f32.mrf.mxu0  ;;  %v1453_v9 = vmul.f32 %v1404_v47, %v1404_v47  ;;  %v1431_v7 = vsel %vm631_vm9, %v1404_v47, 0.0  ;;  %v906_v17 = vadd.f32 %v905_v44, %v904_v55 }
 0x188   : > { %v792_v63 = vadd.f32 %v2375_v25, %v791_v50  ;;  %v1475_v35 = vadd.f32 %v1474_v43, %v1473_v48  ;;  %v1432_v49 = vadd.f32 %v1431_v7, %v1430_v15 }
 0x189   : > { %1696 = vst.msk [vmem:[%s2387_s15 + $0x60] sm:$0xf] %vm929_vm11, %v1498_v18  ;;  %v1476_v56 = vsel %vm631_vm9, %v1453_v9, 0.0 }
 0x18a   : > { %v835_v53 = vadd.f32 %v2522_v0, %v792_v63  ;;  %v1363_v38 = vpop.f32.mrf.mxu2  ;;  %v1477_v19 = vadd.f32 %v1476_v56, %v1475_v35 }
 0x18b   : > { %v1364_v23 = vadd.f32 %v2375_v25, %v1363_v38 }
 0x18c   : > { %v862_v51 = vsel %vm861_vm8, %v835_v53, 0.0  ;;  %v883_v0 = vmul.f32 %v835_v53, %v835_v53  ;;  %v928_v30 = vpack.c.bf16 %v835_v53, %v835_v53 }
 0x18d   : > { %v863_v46 = vadd.f32 %v862_v51, %v860_v21  ;;  %v1407_v31 = vadd.f32 %v2526_v32, %v1364_v23 }
 0x18e   : > { %v907_v27 = vsel %vm861_vm8, %v883_v0, 0.0  ;;  %v946_v52 = vsel %vm2666_vm14, %v928_v30, %v945_v22 }
 0x18f   : > { %v864_v33 = vrot.slane %v863_v46, 4  ;;  %v908_v25 = vadd.f32 %v907_v27, %v906_v17  ;;  %947 = vst [vmem:[%s2387_s15 + $0x30] sm:$0x3] %v946_v52  ;;  %v1433_v13 = vsel %vm861_vm8, %v1407_v31, 0.0  ;;  %v1454_v41 = vmul.f32 %v1407_v31, %v1407_v31  ;;  %v793_v2 = vpop.f32.mrf.mxu0 }
 0x190   : > { %v1434_v57 = vadd.f32 %v1433_v13, %v1432_v49  ;;  %v1499_v20 = vpack.c.bf16 %v1407_v31, %v1407_v31 }
 0x191   : > { %v865_v45 = vadd.f32 %v864_v33, %v863_v46  ;;  %v909_v32 = vrot.slane %v908_v25, 4  ;;  %v1478_v28 = vsel %vm861_vm8, %v1454_v41, 0.0 }
 0x192   : > { %v1435_v1 = vrot.slane %v1434_v57, 4  ;;  %v1479_v24 = vadd.f32 %v1478_v28, %v1477_v19  ;;  %v1365_v26 = vpop.f32.mrf.mxu2  ;;  %v1514_v10 = vsel %vm2666_vm14, %v1499_v20, %v1697_v59 }
 0x193   : > { %v866_v3 = vrot.slane %v865_v45, 2  ;;  %v910_v6 = vadd.f32 %v909_v32, %v908_v25  ;;  %1698 = vst [vmem:[%s2387_s15 + $0x64] sm:$0x3] %v1514_v10 }
 0x194   : > { %v1436_v34 = vadd.f32 %v1435_v1, %v1434_v57  ;;  %v1480_v29 = vrot.slane %v1479_v24, 4 }
 0x195   : > { %v867_v11 = vadd.f32 %v866_v3, %v865_v45  ;;  %v911_v36 = vrot.slane %v910_v6, 2 }
 0x196   : > { %v1437_v39 = vrot.slane %v1436_v34, 2  ;;  %v1481_v58 = vadd.f32 %v1480_v29, %v1479_v24 }
 0x197   : > { %v912_v47 = vadd.f32 %v911_v36, %v910_v6  ;;  %v868_v12 = vrot.slane %v867_v11, 1 }
 0x198   : > { %v1438_v54 = vadd.f32 %v1437_v39, %v1436_v34  ;;  %v1482_v16 = vrot.slane %v1481_v58, 2 }
 0x199   : > { %v913_v37 = vrot.slane %v912_v47, 1  ;;  %v869_v18 = vadd.f32 %v868_v12, %v867_v11 }
 0x19a   : > { %v1439_v61 = vrot.slane %v1438_v54, 1  ;;  %v1483_v40 = vadd.f32 %v1482_v16, %v1481_v58 }
 0x19b   : > { %v914_v5 = vadd.f32 %v913_v37, %v912_v47 }
 0x19c   : > { %v1440_v50 = vadd.f32 %v1439_v61, %v1438_v54  ;;  %v1484_v42 = vrot.slane %v1483_v40, 1 }
 0x19e   : > { %v1441_v60 = vadd.f32 %v1440_v50, %v869_v18  ;;  %v1485_v63 = vadd.f32 %v1484_v42, %v1483_v40 }
 0x1a0   : > { %v1486_v62 = vadd.f32 %v1485_v63, %v914_v5 }
 0x1a2   : > { %v1516_v8 = vsel %vm438_vm4, %v1441_v60, %v1486_v62 }
 0x1a3   : > { %1518 = vst.msk [vmem:[%s270_s17] sm:$0x3] %vm942_vm12, %v1516_v8 }
 0x1a4 PF: > { %s17_s21 = sadd.s32 1, %s1786_s21  }
 0x1a5   : > { %p14_p5 = scmp.ge.s32.totalorder %s17_s21, 6  }
 0x1a7   :  { %16 = sbr.rel (!%p14_p5) target bundleno = 1 (0x1), region = 84 }

// kernel: gabor_nn_1d_forward.4
= control target key start
LH: loop header
LB: loop body
LE: loop exit
PB: predicated region body
PF: predicated region fallthrough
CT: control target
= control target key end

     0   :  { %s1865_s15 = smov 0   ;;  %s3147_s0 = inlined_call_operand.vmem [shape: f32[8,99,1], index: 0, kind: input, shape index: {}]   ;;  %s3148_s1 = inlined_call_operand.vmem [shape: f32[7,32], index: 1, kind: input, shape index: {}]   ;;  %s3149_s2 = inlined_call_operand.vmem [shape: f32[1,32], index: 2, kind: input, shape index: {}]   ;;  %s3150_s3 = inlined_call_operand.vmem [shape: bf16[8,99,32], index: 3, kind: output, shape index: {0}]   ;;  %s3151_s4 = inlined_call_operand.vmem [shape: f32[4,2,32], index: 4, kind: output, shape index: {1}]  }
   0x1 LB: > { %s1871_s16 = sadd.s32 4294967295, %s1837_s15   ;;  %p1780_p0 = scmp.ge.s32.totalorder %s1837_s15, 1  ;;  %s1837_s15 = sphi %s1865_s15, %s15_s15  }
   0x2   : > { %p167_p1 = scmp.lt.s32.totalorder %s1837_s15, 5 }
   0x4   : > { %p168_p2 = pnand %p1780_p0, %p167_p1 }
   0x6   : > { %171 = sbr.rel (%p168_p2) target bundleno = 371 (0x173), region = 32 }
   0xb   : > { %s1781_s17 = sshll.u32 %s1871_s16, 1  ;;  %v1839_v0 = vmov 0   ;;  %vm245_vm0 = vcmask 1042432   ;;  %vm274_vm1 = vcmask 1045504   ;;  %vm384_vm2 = vcmask 1046528   ;;  %p213_p4 = scmp.lt.s32.totalorder %s1871_s16, 3 }
   0xc   : > { %1828 = vset.pattern.permute.xlu2 %v1839_v0  ;;  %1827 = vset.pattern.permute.xlu1 %v1839_v0  ;;  %p200_p3 = scmp.lt.s32.totalorder %s1781_s17, 7  ;;  %vm541_vm3 = vcmask 1044480   ;;  %vm620_vm4 = vcmask 1043456   ;;  %vm784_vm5 = vcmask 1041408   ;;  %vm854_vm6 = vcmask 261120  }
   0xd   : > { %1826 = vset.pattern.permute.xlu0 %v1839_v0  ;;  %vm946_vm7 = vcmask 257024   ;;  %vm878_vm8 = vcmask 256000   ;;  %vm959_vm9 = vcmask 254976   ;;  %vm960_vm10 = vsmask.f32 1280  ;;  %s3336_s16 = smov (!%p213_p4, %s1871_s16), 3 }
   0xe   : > { %s3334_s17 = smov (!%p200_p3, %s1781_s17), 7  ;;  %vm3111_vm11 = vmand %vm959_vm9, %vm960_vm10  ;;  %s1785_s6 = sshll.u32 %s3336_s16, 1  ;;  %vm1683_vm12 = vcmask 1040384  }
   0xf   : > { %s1815_s18 = smul.u32 104, %s3334_s17  ;;  %s216_s9 = scalar_lea.vmem %s3151_s4, %s1785_s6 }
  0x10   : > { %s1816_s26 = smul.u32 52, %s3334_s17 }
  0x11   : > { %s1882_s21 = scalar_lea.vmem %s3147_s0, %s1815_s18 }
  0x12   : > { %v222_v1 = vld [vmem:[%s1882_s21 + $0x18] sm:$0xff]  ;;  %v223_v2 = vld [vmem:[%s1882_s21 + $0x20] sm:$0xff]  ;;  %v220_v3 = vld [vmem:[%s1882_s21 + $0x8] sm:$0xff]  ;;  %s2077_s29 = scalar_lea.vmem %s3150_s3, %s1816_s26 }
  0x13   : > { %v251_v4 = vrot.slane %v222_v1, 5  ;;  %v253_v5 = vrot.slane %v223_v2, 5  ;;  %v221_v6 = vld [vmem:[%s1882_s21 + $0x10] sm:$0xff]  ;;  %v247_v7 = vrot.slane %v220_v3, 5  ;;  %v219_v8 = vld [vmem:[%s1882_s21] sm:$0xff]  ;;  %v224_v11 = vld [vmem:[%s1882_s21 + $0x28] sm:$0xff] }
  0x14   : > { %v249_v9 = vrot.slane %v221_v6, 5  ;;  %v246_v10 = vrot.slane %v219_v8, 5  ;;  %v255_v15 = vrot.slane %v224_v11, 5  ;;  %v226_v19 = vld [vmem:[%s1882_s21 + $0x38] sm:$0xff]  ;;  %v227_v20 = vld [vmem:[%s1882_s21 + $0x40] sm:$0xff]  ;;  %v225_v21 = vld [vmem:[%s1882_s21 + $0x30] sm:$0xff] }
  0x15   : > { %v254_v12 = vsel %vm245_vm0, %v251_v4, %v253_v5  ;;  %v259_v22 = vrot.slane %v226_v19, 5  ;;  %v261_v23 = vrot.slane %v227_v20, 5  ;;  %v257_v24 = vrot.slane %v225_v21, 5  ;;  %v1786_v28 = vld [vmem:[%s1882_s21 + $0x68] sm:$0xff]  ;;  %v1787_v29 = vld [vmem:[%s1882_s21 + $0x70] sm:$0xff]  ;;  %v1789_v37 = vld [vmem:[%s1882_s21 + $0x80] sm:$0xff] }
  0x16   : > { %294 = vperm.xlu2 %1828, %v254_v12   ;;  %v250_v13 = vsel %vm245_vm0, %v247_v7, %v249_v9  ;;  %v273_v14 = vsel %vm245_vm0, 0.0, %v246_v10  ;;  %v256_v16 = vsel %vm245_vm0, %v253_v5, %v255_v15  ;;  %v252_v17 = vsel %vm245_vm0, %v249_v9, %v251_v4  ;;  %v228_v30 = vld [vmem:[%s1882_s21 + $0x48] sm:$0xff]  ;;  %v1788_v39 = vld [vmem:[%s1882_s21 + $0x78] sm:$0xff]  ;;  %v1793_v47 = vld [vmem:[%s1882_s21 + $0xa0] sm:$0xff] }
  0x17   : > { %286 = vperm.xlu1 %1827, %v250_v13   ;;  %278 = vperm.xlu0 %1826, %v273_v14   ;;  %v248_v18 = vsel %vm245_vm0, %v246_v10, %v247_v7  ;;  %v262_v25 = vsel %vm245_vm0, %v259_v22, %v261_v23  ;;  %v260_v26 = vsel %vm245_vm0, %v257_v24, %v259_v22  ;;  %v992_v31 = vrot.slane %v1786_v28, 5  ;;  %v1790_v38 = vld [vmem:[%s1882_s21 + $0x88] sm:$0xff]  ;;  %v1792_v46 = vld [vmem:[%s1882_s21 + $0x98] sm:$0xff]  ;;  %v1791_v48 = vld [vmem:[%s1882_s21 + $0x90] sm:$0xff] }
  0x18   : > { %v258_v27 = vsel %vm245_vm0, %v255_v15, %v257_v24  ;;  %v993_v32 = vrot.slane %v1787_v29, 5  ;;  %v263_v33 = vrot.slane %v228_v30, 5  ;;  %v997_v40 = vrot.slane %v1789_v37, 5  ;;  %v229_v55 = vld [vmem:[%s1882_s21 + $0x50] sm:$0xff]  ;;  %v1794_v56 = vld [vmem:[%s1882_s21 + $0xa8] sm:$0xff]  ;;  %v1796_v0 = vld [vmem:[%s1882_s21 + $0xb8] sm:$0xff] }
  0x19   : > { %v1019_v35 = vsel %vm245_vm0, 0.0, %v992_v31  ;;  %v999_v41 = vrot.slane %v1790_v38, 5  ;;  %v995_v42 = vrot.slane %v1788_v39, 5  ;;  %v1003_v49 = vrot.slane %v1792_v46, 5  ;;  %v1795_v57 = vld [vmem:[%s1882_s21 + $0xb0] sm:$0xff]  ;;  %v1797_v1 = vld [vmem:[%s1882_s21 + $0xc0] sm:$0xff] }
  0x1a   : > { %v994_v34 = vsel %vm245_vm0, %v992_v31, %v993_v32  ;;  %v264_v36 = vsel %vm245_vm0, %v261_v23, %v263_v33  ;;  %v1005_v50 = vrot.slane %v1793_v47, 5  ;;  %v1001_v51 = vrot.slane %v1791_v48, 5  ;;  %v230_v2 = vld [vmem:[%s1882_s21 + $0x58] sm:$0xff]  ;;  %v1798_v6 = vld [vmem:[%s1882_s21 + $0xc8] sm:$0x7] }
  0x1b   : > { %v1000_v43 = vsel %vm245_vm0, %v997_v40, %v999_v41  ;;  %v998_v44 = vsel %vm245_vm0, %v995_v42, %v997_v40  ;;  %v996_v45 = vsel %vm245_vm0, %v993_v32, %v995_v42  ;;  %v265_v58 = vrot.slane %v229_v55, 5  ;;  %v231_v7 = vld [vmem:[%s1882_s21 + $0x60] sm:$0x7] }
  0x1c   : > { %v1006_v52 = vsel %vm245_vm0, %v1003_v49, %v1005_v50  ;;  %v1004_v53 = vsel %vm245_vm0, %v1001_v51, %v1003_v49  ;;  %v1002_v54 = vsel %vm245_vm0, %v999_v41, %v1001_v51  ;;  %v1007_v59 = vrot.slane %v1794_v56, 5 }
  0x1d   : > { %v1009_v60 = vrot.slane %v1795_v57, 5  ;;  %v266_v61 = vsel %vm245_vm0, %v263_v33, %v265_v58  ;;  %v1011_v3 = vrot.slane %v1796_v0, 5  ;;  %v1013_v4 = vrot.slane %v1797_v1, 5 }
  0x1e   : > { %298 = vperm.xlu2 %1828, %v256_v16   ;;  %v1008_v63 = vsel %vm245_vm0, %v1005_v50, %v1007_v59  ;;  %v267_v5 = vrot.slane %v230_v2, 5  ;;  %v1015_v11 = vrot.slane %v1798_v6, 5  ;;  %v269_v12 = vrot.slane %v231_v7, 5 }
  0x1f   : > { %290 = vperm.xlu1 %1827, %v252_v17   ;;  %282 = vperm.xlu0 %1826, %v248_v18   ;;  %v1010_v62 = vsel %vm245_vm0, %v1007_v59, %v1009_v60  ;;  %v1014_v8 = vsel %vm245_vm0, %v1011_v3, %v1013_v4  ;;  %v1012_v10 = vsel %vm245_vm0, %v1009_v60, %v1011_v3  ;;  %v217_v17 = vld [vmem:[%s3148_s1] sm:$0x7f] }
  0x20   : > { %v268_v9 = vsel %vm245_vm0, %v265_v58, %v267_v5  ;;  %v1016_v13 = vsel %vm245_vm0, %v1013_v4, %v1015_v11  ;;  %v270_v14 = vsel %vm245_vm0, %v267_v5, %v269_v12  ;;  %v1941_v18 = vperm.slane %v217_v17, 1 }
  0x21   : > { %v1020_v15 = vsel %vm274_vm1, %v1016_v13, 0.0  ;;  %v275_v16 = vsel %vm274_vm1, %v270_v14, 0.0  ;;  %v1943_v20 = vperm.slane %v217_v17, 2  ;;  %v1945_v21 = vperm.slane %v217_v17, 3 }
  0x22   : > { %v1953_v24 = vperm.slane %v217_v17, 0  ;;  %v1962_v28 = vperm.slane %v217_v17, 6 }
  0x26   : > { %310 = vperm.xlu2 %1828, %v262_v25   ;;  %v1955_v25 = vperm.slane %v217_v17, 4 }
  0x27   : > { %306 = vperm.xlu1 %1827, %v260_v26   ;;  %302 = vperm.xlu0 %1826, %v258_v27   ;;  %v1960_v27 = vperm.slane %v217_v17, 5 }
  0x2e   : > { %1027 = vperm.xlu2 %1828, %v994_v34  }
  0x2f   : > { %1023 = vperm.xlu1 %1827, %v1019_v35   ;;  %314 = vperm.xlu0 %1826, %v264_v36  }
  0x36   : > { %1039 = vperm.xlu2 %1828, %v1000_v43  }
  0x37   : > { %1035 = vperm.xlu1 %1827, %v998_v44   ;;  %1031 = vperm.xlu0 %1826, %v996_v45  }
  0x3e   : > { %1051 = vperm.xlu2 %1828, %v1006_v52  }
  0x3f   : > { %1047 = vperm.xlu1 %1827, %v1004_v53   ;;  %1043 = vperm.xlu0 %1826, %v1002_v54  }
  0x46   : > { %318 = vperm.xlu2 %1828, %v266_v61  }
  0x47   : > { %1059 = vperm.xlu1 %1827, %v1010_v62   ;;  %1055 = vperm.xlu0 %1826, %v1008_v63   ;;  %v2037_v63 = vld [vmem:[%s3149_s2] ss:$0 sm:$0xff] }
  0x4e   : > { %1067 = vperm.xlu2 %1828, %v1014_v8  }
  0x4f   : > { %322 = vperm.xlu1 %1827, %v268_v9   ;;  %1063 = vperm.xlu0 %1826, %v1012_v10  }
  0x57   : > { %1072 = vperm.xlu1 %1827, %v1020_v15   ;;  %327 = vperm.xlu0 %1826, %v275_v16  }
  0x70   : > { %v295_v19 = vpop.permute.xlu2 %294 }
  0x71   : > { %v1948_v22 = vmul.f32 %v1941_v18, %v295_v19  ;;  %v1951_v23 = vmul.f32 %v1943_v20, %v295_v19  ;;  %v1958_v26 = vmul.f32 %v1945_v21, %v295_v19  ;;  %v1966_v30 = vmul.f32 %v1955_v25, %v295_v19 }
  0x72   : > { %v335_v36 = vmul.f32 %v1953_v24, %v295_v19  ;;  %v1981_v38 = vmul.f32 %v1960_v27, %v295_v19  ;;  %v1994_v45 = vmul.f32 %v1962_v28, %v295_v19 }
  0x73   : > { %v3163_v29 = vrot.slane %v1948_v22, 1  ;;  %v3162_v32 = vrot.slane %v1951_v23, 2  ;;  %v3161_v37 = vrot.slane %v1958_v26, 3  ;;  %v3160_v44 = vrot.slane %v1966_v30, 4 }
  0x74   : > { %v3159_v51 = vrot.slane %v1981_v38, 5  ;;  %v3158_v56 = vrot.slane %v1994_v45, 6 }
  0x78   : > { %v299_v31 = vpop.permute.xlu2 %298 }
  0x79   : > { %v1970_v33 = vmul.f32 %v1941_v18, %v299_v31  ;;  %v1973_v34 = vmul.f32 %v1943_v20, %v299_v31  ;;  %v1976_v35 = vmul.f32 %v1945_v21, %v299_v31  ;;  %v1984_v39 = vmul.f32 %v1955_v25, %v299_v31 }
  0x7a   : > { %v1990_v43 = vmul.f32 %v1960_v27, %v299_v31  ;;  %v2008_v49 = vmul.f32 %v1962_v28, %v299_v31  ;;  %v2056_v8 = vmul.f32 %v1953_v24, %v299_v31 }
  0x7b   : > { %3197 = vst [vmem:[#allocation2_spill] sm:$0xff] %v1973_v34  ;;  %v3157_v40 = vrot.slane %v1970_v33, 1  ;;  %v3156_v41 = vrot.slane %v1973_v34, 2  ;;  %v3155_v42 = vrot.slane %v1976_v35, 3  ;;  %v3154_v48 = vrot.slane %v1984_v39, 4 }
  0x7c   : > { %3198 = vst [vmem:[#allocation3_spill] sm:$0xff] %v1976_v35  ;;  %v3153_v53 = vrot.slane %v1990_v43, 5  ;;  %v3152_v58 = vrot.slane %v2008_v49, 6  ;;  %v3218_v34 = vrot.slane %v1966_v30, 4 }
  0x7d   : > { %3199 = vst [vmem:[#allocation4_spill] sm:$0xff] %v1984_v39  ;;  %v395_v46 = vsel %vm384_vm2, %v3163_v29, %v3157_v40  ;;  %v473_v47 = vsel %vm274_vm1, %v3162_v32, %v3156_v41  ;;  %v552_v52 = vsel %vm541_vm3, %v3161_v37, %v3155_v42  ;;  %v631_v57 = vsel %vm620_vm4, %v3160_v44, %v3154_v48 }
  0x7e   : > { %3200 = vst [vmem:[#allocation5_spill] sm:$0xff] %v1990_v43  ;;  %v427_v50 = vadd.f32 %v395_v46, %v335_v36  ;;  %v709_v60 = vsel %vm245_vm0, %v3159_v51, %v3153_v53  ;;  %v795_v62 = vsel %vm784_vm5, %v3158_v56, %v3152_v58  ;;  %v3214_v39 = vrot.slane %v1951_v23, 2 }
  0x7f   : > { %3201 = vst [vmem:[#allocation6_spill] sm:$0xff] %v2008_v49 }
  0x80   : > { %v505_v54 = vadd.f32 %v473_v47, %v427_v50  ;;  %v311_v55 = vpop.permute.xlu2 %310 }
  0x81   : > { %v2041_v1 = vmul.f32 %v1941_v18, %v311_v55  ;;  %v2044_v2 = vmul.f32 %v1943_v20, %v311_v55  ;;  %v2047_v3 = vmul.f32 %v1945_v21, %v311_v55  ;;  %v2050_v5 = vmul.f32 %v1955_v25, %v311_v55 }
  0x82   : > { %v584_v59 = vadd.f32 %v552_v52, %v505_v54  ;;  %v2053_v6 = vmul.f32 %v1960_v27, %v311_v55  ;;  %v2059_v9 = vmul.f32 %v1962_v28, %v311_v55  ;;  %v2066_v13 = vmul.f32 %v1953_v24, %v311_v55 }
  0x84   : > { %v663_v61 = vadd.f32 %v631_v57, %v584_v59  ;;  %3203 = vst [vmem:[#allocation8_spill] sm:$0xff] %v2066_v13 }
  0x86   : > { %v741_v0 = vadd.f32 %v709_v60, %v663_v61 }
  0x88   : > { %v829_v4 = vadd.f32 %v795_v62, %v741_v0  ;;  %v1028_v7 = vpop.permute.xlu2 %1027 }
  0x89   : > { %v2062_v10 = vmul.f32 %v1028_v7, %v1941_v18  ;;  %v287_v11 = vpop.permute.xlu1 %286  ;;  %v2069_v14 = vmul.f32 %v1028_v7, %v1943_v20  ;;  %v2072_v15 = vmul.f32 %v1028_v7, %v1945_v21  ;;  %v2083_v31 = vmul.f32 %v1028_v7, %v1955_v25  ;;  %v279_v52 = vpop.permute.xlu0 %278 }
  0x8a   : > { %v845_v12 = vadd.f32 %v2037_v63, %v829_v4  ;;  %v2088_v50 = vmul.f32 %v1028_v7, %v1960_v27  ;;  %v2092_v55 = vmul.f32 %v1028_v7, %v1953_v24  ;;  %v2096_v59 = vmul.f32 %v1028_v7, %v1962_v28 }
  0x8b   : > { %3202 = vst [vmem:[#allocation7_spill] sm:$0xff] %v2062_v10  ;;  %v333_v0 = vmul.f32 %v1953_v24, %v287_v11  ;;  %v2108_v53 = vmul.f32 %v1941_v18, %v287_v11  ;;  %v2111_v7 = vmul.f32 %v1943_v20, %v287_v11  ;;  %v2118_v62 = vmul.f32 %v1955_v25, %v287_v11 }
  0x8c   : > { %3204 = vst [vmem:[#allocation9_spill] sm:$0xff] %v2069_v14  ;;  %v937_v36 = vpack.c.bf16 %v845_v12, %v845_v12  ;;  %v892_v60 = vmul.f32 %v845_v12, %v845_v12  ;;  %v2104_v4 = vsel %vm854_vm6, %v845_v12, 0.0  ;;  %v2121_v61 = vmul.f32 %v1960_v27, %v287_v11 }
  0x8d   : > { %3205 = vst [vmem:[#allocation10_spill] sm:$0xff] %v2072_v15  ;;  %v2125_v58 = vmul.f32 %v1962_v28, %v287_v11  ;;  %v2128_v48 = vmul.f32 %v1941_v18, %v279_v52  ;;  %v2131_v42 = vmul.f32 %v1943_v20, %v279_v52  ;;  %v2139_v54 = vmul.f32 %v1945_v21, %v279_v52 }
  0x8e   : > { %3206 = vst [vmem:[#allocation11_spill] sm:$0xff] %v2083_v31  ;;  %v2136_v41 = vsel %vm854_vm6, %v892_v60, 0.0  ;;  %v2142_v40 = vmul.f32 %v1955_v25, %v279_v52  ;;  %v388_v12 = vrot.slane %v2108_v53, 1  ;;  %v331_v46 = vmul.f32 %v1953_v24, %v279_v52 }
  0x8f   : > { %3207 = vst [vmem:[#allocation12_spill] sm:$0xff] %v2088_v50  ;;  %v2151_v19 = vmul.f32 %v1962_v28, %v279_v52  ;;  %v385_v44 = vrot.slane %v2128_v48, 1  ;;  %v463_v37 = vrot.slane %v2131_v42, 2  ;;  %v3212_v31 = vrot.slane %v1948_v22, 1 }
  0x90   : > { %3208 = vst [vmem:[#allocation13_spill] sm:$0xff] %v2092_v55  ;;  %v2133_v57 = vpop.permute.xlu2 %1039  ;;  %v3213_v49 = vrot.slane %v2111_v7, 2 }
  0x91   : > { %3209 = vst [vmem:[#allocation14_spill] sm:$0xff] %v2096_v59  ;;  %v291_v60 = vpop.permute.xlu1 %290  ;;  %v2158_v51 = vmul.f32 %v2133_v57, %v1941_v18  ;;  %v283_v47 = vpop.permute.xlu0 %282  ;;  %v2174_v48 = vmul.f32 %v2133_v57, %v1943_v20  ;;  %v2178_v42 = vmul.f32 %v2133_v57, %v1945_v21 }
  0x92   : > { %951 = vst.msk [vmem:[%s2077_s29 + $0x10] sm:$0xf] %vm946_vm7, %v937_v36  ;;  %v2115_v36 = vmul.f32 %v1945_v21, %v287_v11  ;;  %v2145_v11 = vmul.f32 %v1960_v27, %v279_v52  ;;  %v2165_v52 = vmul.f32 %v2133_v57, %v1953_v24  ;;  %v361_v32 = vmul.f32 %v1941_v18, %v291_v60 }
  0x93   : > { %3210 = vst [vmem:[#allocation15_spill] sm:$0xff] %v2158_v51  ;;  %v440_v53 = vmul.f32 %v1943_v20, %v291_v60  ;;  %v518_v56 = vmul.f32 %v1945_v21, %v291_v60  ;;  %v334_v55 = vmul.f32 %v1953_v24, %v291_v60  ;;  %v676_v13 = vmul.f32 %v1960_v27, %v291_v60 }
  0x94   : > { %3211 = vst [vmem:[#allocation16_spill] sm:$0xff] %v2165_v52  ;;  %v390_v16 = vrot.slane %v361_v32, 1  ;;  %v597_v52 = vmul.f32 %v1955_v25, %v291_v60  ;;  %v359_v59 = vmul.f32 %v1941_v18, %v283_v47  ;;  %v2193_v32 = vmul.f32 %v2133_v57, %v1955_v25 }
  0x95   : > { %v468_v29 = vrot.slane %v440_v53, 2  ;;  %v547_v14 = vrot.slane %v518_v56, 3  ;;  %v759_v53 = vmul.f32 %v1962_v28, %v291_v60 }
  0x96   : > { %v391_v50 = vsel %vm384_vm2, %v388_v12, %v390_v16  ;;  %v393_v15 = vsel %vm384_vm2, %v390_v16, %v3212_v31  ;;  %v626_v17 = vrot.slane %v597_v52, 4  ;;  %v3215_v16 = vrot.slane %v2115_v36, 3 }
  0x97   : > { %v425_v51 = vadd.f32 %v391_v50, %v333_v0  ;;  %v426_v10 = vadd.f32 %v393_v15, %v334_v55  ;;  %v469_v43 = vsel %vm274_vm1, %v3213_v49, %v468_v29  ;;  %v471_v22 = vsel %vm274_vm1, %v468_v29, %v3214_v39 }
  0x98   : > { %v548_v56 = vsel %vm541_vm3, %v3215_v16, %v547_v14  ;;  %v332_v31 = vmul.f32 %v1953_v24, %v283_v47  ;;  %v3216_v15 = vrot.slane %v1958_v26, 3  ;;  %v704_v55 = vrot.slane %v676_v13, 5 }
  0x99   : > { %v503_v52 = vadd.f32 %v469_v43, %v425_v51  ;;  %v504_v35 = vadd.f32 %v471_v22, %v426_v10  ;;  %v3217_v0 = vrot.slane %v2118_v62, 4  ;;  %v386_v23 = vrot.slane %v359_v59, 1 }
  0x9a   : > { %v550_v50 = vsel %vm541_vm3, %v547_v14, %v3216_v15  ;;  %v438_v29 = vmul.f32 %v1943_v20, %v283_v47  ;;  %v516_v39 = vmul.f32 %v1945_v21, %v283_v47  ;;  %v629_v43 = vsel %vm620_vm4, %v626_v17, %v3218_v34 }
  0x9b   : > { %v627_v49 = vsel %vm620_vm4, %v3217_v0, %v626_v17  ;;  %v582_v60 = vadd.f32 %v548_v56, %v503_v52  ;;  %v583_v16 = vadd.f32 %v550_v50, %v504_v35  ;;  %v790_v51 = vrot.slane %v759_v53, 6 }
  0x9c   : > { %v3219_v26 = vrot.slane %v2121_v61, 5  ;;  %v387_v13 = vsel %vm384_vm2, %v385_v44, %v386_v23  ;;  %v389_v14 = vsel %vm384_vm2, %v386_v23, %v388_v12  ;;  %v595_v59 = vmul.f32 %v1955_v25, %v283_v47 }
  0x9d   : > { %v661_v22 = vadd.f32 %v627_v49, %v582_v60  ;;  %v662_v15 = vadd.f32 %v629_v43, %v583_v16  ;;  %v423_v0 = vadd.f32 %v387_v13, %v331_v46  ;;  %v424_v56 = vadd.f32 %v389_v14, %v332_v31 }
  0x9e   : > { %v705_v10 = vsel %vm245_vm0, %v3219_v26, %v704_v55  ;;  %v3220_v35 = vrot.slane %v1981_v38, 5  ;;  %v464_v34 = vrot.slane %v438_v29, 2  ;;  %v543_v17 = vrot.slane %v516_v39, 3 }
  0x9f   : > { %v674_v53 = vmul.f32 %v1960_v27, %v283_v47  ;;  %v739_v52 = vadd.f32 %v705_v10, %v661_v22  ;;  %v3221_v44 = vrot.slane %v2125_v58, 6  ;;  %v3222_v23 = vrot.slane %v1994_v45, 6 }
  0xa0   : > { %v707_v30 = vsel %vm245_vm0, %v704_v55, %v3220_v35  ;;  %v465_v46 = vsel %vm274_vm1, %v463_v37, %v464_v34  ;;  %v3223_v38 = vrot.slane %v2111_v7, 2  ;;  %v622_v55 = vrot.slane %v595_v59, 4 }
  0xa1   : > { %v740_v50 = vadd.f32 %v707_v30, %v662_v15  ;;  %v791_v12 = vsel %vm784_vm5, %v3221_v44, %v790_v51  ;;  %v793_v49 = vsel %vm784_vm5, %v790_v51, %v3222_v23  ;;  %v757_v29 = vmul.f32 %v1962_v28, %v283_v47 }
  0xa2   : > { %v467_v31 = vsel %vm274_vm1, %v464_v34, %v3223_v38  ;;  %v827_v39 = vadd.f32 %v791_v12, %v739_v52  ;;  %v501_v16 = vadd.f32 %v465_v46, %v423_v0  ;;  %v2240_v26 = vmul.f32 %v2133_v57, %v1960_v27 }
  0xa3   : > { %v828_v60 = vadd.f32 %v793_v49, %v740_v50  ;;  %v502_v43 = vadd.f32 %v467_v31, %v424_v56  ;;  %v3224_v45 = vrot.slane %v2139_v54, 3  ;;  %v3225_v37 = vrot.slane %v2115_v36, 3 }
  0xa4   : > { %v700_v10 = vrot.slane %v674_v53, 5  ;;  %v843_v13 = vadd.f32 %v2037_v63, %v827_v39  ;;  %v2254_v54 = vmul.f32 %v2133_v57, %v1962_v28  ;;  %v3226_v0 = vrot.slane %v2142_v40, 4  ;;  %v2262_v53 = vpop.permute.xlu2 %1051  ;;  %v307_v39 = vpop.permute.xlu1 %306 }
  0xa5   : > { %v544_v51 = vsel %vm541_vm3, %v3224_v45, %v543_v17  ;;  %v546_v7 = vsel %vm541_vm3, %v543_v17, %v3225_v37  ;;  %v844_v47 = vadd.f32 %v2037_v63, %v828_v60  ;;  %v3227_v30 = vrot.slane %v2118_v62, 4 }
  0xa6   : > { %v580_v14 = vadd.f32 %v544_v51, %v501_v16  ;;  %v581_v59 = vadd.f32 %v546_v7, %v502_v43  ;;  %v623_v36 = vsel %vm620_vm4, %v3226_v0, %v622_v55  ;;  %v890_v56 = vmul.f32 %v843_v13, %v843_v13 }
  0xa7   : > { %v891_v35 = vmul.f32 %v844_v47, %v844_v47  ;;  %v625_v34 = vsel %vm620_vm4, %v622_v55, %v3227_v30  ;;  %v786_v17 = vrot.slane %v757_v29, 6  ;;  %v935_v52 = vpack.c.bf16 %v843_v13, %v843_v13 }
  0xa8   : > { %v936_v50 = vpack.c.bf16 %v844_v47, %v844_v47  ;;  %v659_v44 = vadd.f32 %v623_v36, %v580_v14  ;;  %v660_v57 = vadd.f32 %v625_v34, %v581_v59  ;;  %v3228_v23 = vrot.slane %v2145_v11, 5 }
  0xa9   : > { %v3229_v62 = vrot.slane %v2121_v61, 5  ;;  %949 = vst.msk [vmem:[%s2077_s29 + $0x8] sm:$0xf] %vm946_vm7, %v935_v52  ;;  %v2277_v29 = vmul.f32 %v2262_v53, %v1953_v24  ;;  %v858_v60 = vsel %vm854_vm6, %v843_v13, 0.0  ;;  %v860_v11 = vsel %vm854_vm6, %v844_v47, 0.0 }
  0xaa   : > { %v701_v49 = vsel %vm245_vm0, %v3228_v23, %v700_v10  ;;  %950 = vst.msk [vmem:[%s2077_s29 + $0xc] sm:$0xf] %vm946_vm7, %v936_v50  ;;  %v3230_v61 = vrot.slane %v2151_v19, 6  ;;  %v3231_v43 = vrot.slane %v2125_v58, 6  ;;  %v904_v51 = vsel %vm854_vm6, %v890_v56, 0.0 }
  0xab   : > { %v703_v46 = vsel %vm245_vm0, %v700_v10, %v3229_v62  ;;  %v737_v31 = vadd.f32 %v701_v49, %v659_v44  ;;  %v906_v37 = vsel %vm854_vm6, %v891_v35, 0.0  ;;  %v2293_v13 = vmul.f32 %v2262_v53, %v1941_v18 }
  0xac   : > { %v738_v55 = vadd.f32 %v703_v46, %v660_v57  ;;  %v787_v16 = vsel %vm784_vm5, %v3230_v61, %v786_v17  ;;  %v789_v45 = vsel %vm784_vm5, %v786_v17, %v3231_v43  ;;  %v2297_v47 = vmul.f32 %v2262_v53, %v1943_v20 }
  0xad   : > { %v825_v7 = vadd.f32 %v787_v16, %v737_v31  ;;  %v338_v19 = vmul.f32 %v1953_v24, %v307_v39  ;;  %v365_v58 = vmul.f32 %v1941_v18, %v307_v39  ;;  %v444_v0 = vmul.f32 %v1943_v20, %v307_v39 }
  0xae   : > { %v826_v10 = vadd.f32 %v789_v45, %v738_v55  ;;  %v2305_v36 = vmul.f32 %v1945_v21, %v307_v39  ;;  %v2308_v35 = vmul.f32 %v1955_v25, %v307_v39  ;;  %v2311_v30 = vmul.f32 %v1960_v27, %v307_v39 }
  0xaf   : > { %v841_v14 = vadd.f32 %v2037_v63, %v825_v7  ;;  %v398_v56 = vrot.slane %v365_v58, 1  ;;  %v2314_v34 = vmul.f32 %v1962_v28, %v307_v39  ;;  %v3232_v62 = vrot.slane %v2041_v1, 1 }
  0xb0   : > { %v842_v59 = vadd.f32 %v2037_v63, %v826_v10  ;;  %v476_v61 = vrot.slane %v444_v0, 2  ;;  %v2327_v45 = vmul.f32 %v2262_v53, %v1945_v21  ;;  %v555_v7 = vrot.slane %v2305_v36, 3  ;;  %v303_v10 = vpop.permute.xlu0 %302 }
  0xb1   : > { %v855_v17 = vsel %vm854_vm6, %v841_v14, 0.0  ;;  %v888_v50 = vmul.f32 %v841_v14, %v841_v14  ;;  %v933_v23 = vpack.c.bf16 %v841_v14, %v841_v14  ;;  %v401_v46 = vsel %vm384_vm2, %v398_v56, %v3232_v62 }
  0xb2   : > { %v856_v52 = vsel %vm854_vm6, %v842_v59, 0.0  ;;  %v889_v44 = vmul.f32 %v842_v59, %v842_v59  ;;  %v934_v49 = vpack.c.bf16 %v842_v59, %v842_v59  ;;  %v430_v39 = vadd.f32 %v401_v46, %v338_v19 }
  0xb3   : > { %v857_v57 = vadd.f32 %v856_v52, %v855_v17  ;;  %v901_v31 = vsel %vm854_vm6, %v888_v50, 0.0  ;;  %947 = vst.msk [vmem:[%s2077_s29] sm:$0xf] %vm946_vm7, %v933_v23  ;;  %v2335_v14 = vmul.f32 %v2262_v53, %v1955_v25  ;;  %v634_v59 = vrot.slane %v2308_v35, 4 }
  0xb4   : > { %v902_v55 = vsel %vm854_vm6, %v889_v44, 0.0  ;;  %948 = vst.msk [vmem:[%s2077_s29 + $0x4] sm:$0xf] %vm946_vm7, %v934_v49  ;;  %v712_v52 = vrot.slane %v2311_v30, 5  ;;  %v798_v36 = vrot.slane %v2314_v34, 6  ;;  %v3234_v50 = vrot.slane %v2047_v3, 3 }
  0xb5   : > { %v859_v16 = vadd.f32 %v858_v60, %v857_v57  ;;  %v903_v43 = vadd.f32 %v902_v55, %v901_v31  ;;  %v3233_v60 = vrot.slane %v2044_v2, 2  ;;  %v337_v23 = vmul.f32 %v1953_v24, %v303_v10 }
  0xb6   : > { %v558_v44 = vsel %vm541_vm3, %v555_v7, %v3234_v50  ;;  %v364_v49 = vmul.f32 %v1941_v18, %v303_v10  ;;  %v443_v31 = vmul.f32 %v1943_v20, %v303_v10  ;;  %v3235_v35 = vrot.slane %v2050_v5, 4 }
  0xb7   : > { %v479_v19 = vsel %vm274_vm1, %v476_v61, %v3233_v60  ;;  %v905_v0 = vadd.f32 %v904_v51, %v903_v43  ;;  %v861_v57 = vadd.f32 %v860_v11, %v859_v16  ;;  %v521_v51 = vmul.f32 %v1945_v21, %v303_v10 }
  0xb8   : > { %v508_v17 = vadd.f32 %v479_v19, %v430_v39  ;;  %v637_v30 = vsel %vm620_vm4, %v634_v59, %v3235_v35  ;;  %v396_v39 = vrot.slane %v364_v49, 1  ;;  %v600_v11 = vmul.f32 %v1955_v25, %v303_v10  ;;  %v315_v22 = vpop.permute.xlu0 %314 }
  0xb9   : > { %v907_v46 = vadd.f32 %v906_v37, %v905_v0  ;;  %v2354_v55 = vadd.f32 %v2104_v4, %v861_v57  ;;  %v3236_v43 = vrot.slane %v2053_v6, 5  ;;  %v474_v19 = vrot.slane %v443_v31, 2 }
  0xba   : > { %v587_v62 = vadd.f32 %v558_v44, %v508_v17  ;;  %v3237_v0 = vrot.slane %v1970_v33, 1  ;;  %v399_v50 = vsel %vm384_vm2, %v396_v39, %v398_v56  ;;  %v553_v4 = vrot.slane %v521_v51, 3  ;;  %v3239_v33 = vld [vmem:[#allocation2_spill] sm:$0xff] }
  0xbb   : > { %v715_v60 = vsel %vm245_vm0, %v712_v52, %v3236_v43  ;;  %v2361_v37 = vadd.f32 %v2136_v41, %v907_v46  ;;  %v679_v44 = vmul.f32 %v1960_v27, %v303_v10  ;;  %v429_v35 = vadd.f32 %v399_v50, %v337_v23  ;;  %v2383_v43 = vpop.permute.xlu2 %318 }
  0xbc   : > { %v666_v16 = vadd.f32 %v637_v30, %v587_v62  ;;  %v397_v17 = vsel %vm384_vm2, %v3237_v0, %v396_v39  ;;  %v3238_v30 = vrot.slane %v2059_v9, 6  ;;  %v3240_v46 = vrot.slane %v3239_v33, 2 }
  0xbd   : > { %v428_v62 = vadd.f32 %v397_v17, %v2056_v8  ;;  %v477_v56 = vsel %vm274_vm1, %v474_v19, %v476_v61  ;;  %v632_v51 = vrot.slane %v600_v11, 4  ;;  %v2381_v39 = vmul.f32 %v2262_v53, %v1960_v27 }
  0xbe   : > { %v744_v49 = vadd.f32 %v715_v60, %v666_v16  ;;  %v801_v41 = vsel %vm784_vm5, %v798_v36, %v3238_v30  ;;  %v475_v31 = vsel %vm274_vm1, %v3240_v46, %v474_v19  ;;  %v507_v23 = vadd.f32 %v477_v56, %v429_v35  ;;  %v3241_v60 = vld [vmem:[#allocation3_spill] sm:$0xff] }
  0xbf   : > { %v506_v8 = vadd.f32 %v475_v31, %v428_v62  ;;  %v3242_v0 = vrot.slane %v3241_v60, 3  ;;  %v556_v50 = vsel %vm541_vm3, %v553_v4, %v555_v7  ;;  %v710_v30 = vrot.slane %v679_v44, 5  ;;  %v3243_v62 = vld [vmem:[#allocation4_spill] sm:$0xff]  ;;  %v1024_v60 = vpop.permute.xlu1 %1023 }
  0xc0   : > { %v832_v16 = vadd.f32 %v801_v41, %v744_v49  ;;  %v762_v33 = vmul.f32 %v1962_v28, %v303_v10  ;;  %v2392_v61 = vmul.f32 %v2262_v53, %v1962_v28  ;;  %v586_v49 = vadd.f32 %v556_v50, %v507_v23 }
  0xc1   : > { %v554_v17 = vsel %vm541_vm3, %v3242_v0, %v553_v4  ;;  %v3244_v35 = vrot.slane %v3243_v62, 4  ;;  %v635_v46 = vsel %vm620_vm4, %v632_v51, %v634_v59  ;;  %v2401_v7 = vmul.f32 %v1941_v18, %v2383_v43 }
  0xc2   : > { %v848_v11 = vadd.f32 %v2037_v63, %v832_v16  ;;  %v585_v19 = vadd.f32 %v554_v17, %v506_v8  ;;  %v796_v31 = vrot.slane %v762_v33, 6  ;;  %v2405_v44 = vmul.f32 %v1943_v20, %v2383_v43  ;;  %v3247_v16 = vld [vmem:[#allocation5_spill] sm:$0xff]  ;;  %v3251_v33 = vld [vmem:[#allocation6_spill] sm:$0xff] }
  0xc3   : > { %v633_v41 = vsel %vm620_vm4, %v3244_v35, %v632_v51  ;;  %3245 = vst [vmem:[#allocation2_spill] sm:$0xff] %v2401_v7  ;;  %v665_v56 = vadd.f32 %v635_v46, %v586_v49  ;;  %v3248_v8 = vrot.slane %v3247_v16, 5  ;;  %v2412_v59 = vmul.f32 %v1945_v21, %v2383_v43 }
  0xc4   : > { %v895_v10 = vmul.f32 %v848_v11, %v848_v11  ;;  %v940_v4 = vpack.c.bf16 %v848_v11, %v848_v11  ;;  %v664_v53 = vadd.f32 %v633_v41, %v585_v19  ;;  %3246 = vst [vmem:[#allocation3_spill] sm:$0xff] %v2405_v44  ;;  %v2416_v51 = vmul.f32 %v1955_v25, %v2383_v43 }
  0xc5   : > { %v711_v23 = vsel %vm245_vm0, %v3248_v8, %v710_v30  ;;  %3249 = vst [vmem:[#allocation4_spill] sm:$0xff] %v2412_v59  ;;  %v868_v0 = vsel %vm854_vm6, %v848_v11, 0.0  ;;  %v713_v17 = vsel %vm245_vm0, %v710_v30, %v712_v52  ;;  %v3252_v19 = vrot.slane %v3251_v33, 6 }
  0xc6   : > { %3250 = vst [vmem:[#allocation5_spill] sm:$0xff] %v2416_v51  ;;  %v742_v50 = vadd.f32 %v711_v23, %v664_v53  ;;  %v914_v62 = vsel %vm854_vm6, %v895_v10, 0.0  ;;  %v743_v35 = vadd.f32 %v713_v17, %v665_v56  ;;  %v799_v41 = vsel %vm784_vm5, %v796_v31, %v798_v36 }
  0xc7   : > { %954 = vst.msk [vmem:[%s2077_s29 + $0x1c] sm:$0xf] %vm946_vm7, %v940_v4  ;;  %v797_v49 = vsel %vm784_vm5, %v3252_v19, %v796_v31  ;;  %v3183_v46 = vrot.slane %v2401_v7, 1  ;;  %v3187_v11 = vrot.slane %v2405_v44, 2  ;;  %v1101_v4 = vmul.f32 %v1024_v60, %v1941_v18 }
  0xc8   : > { %v830_v16 = vadd.f32 %v797_v49, %v742_v50  ;;  %v1178_v52 = vmul.f32 %v1024_v60, %v1943_v20  ;;  %v831_v30 = vadd.f32 %v799_v41, %v743_v35  ;;  %v1255_v10 = vmul.f32 %v1024_v60, %v1945_v21  ;;  %v3254_v41 = vld [vmem:[#allocation7_spill] sm:$0xff] }
  0xc9   : > { %v2439_v36 = vmul.f32 %v1960_v27, %v2383_v43  ;;  %v1075_v31 = vmul.f32 %v1024_v60, %v1953_v24  ;;  %v1127_v56 = vrot.slane %v1101_v4, 1  ;;  %v1332_v50 = vmul.f32 %v1024_v60, %v1955_v25 }
  0xca   : > { %v846_v34 = vadd.f32 %v2037_v63, %v830_v16  ;;  %v847_v23 = vadd.f32 %v2037_v63, %v831_v30  ;;  %v1204_v17 = vrot.slane %v1178_v52, 2  ;;  %v1409_v33 = vmul.f32 %v1024_v60, %v1960_v27 }
  0xcb   : > { %3253 = vst [vmem:[#allocation6_spill] sm:$0xff] %v2439_v36  ;;  %v3255_v16 = vrot.slane %v3254_v41, 1  ;;  %v1281_v40 = vrot.slane %v1255_v10, 3  ;;  %v1486_v15 = vmul.f32 %v1024_v60, %v1962_v28  ;;  %v1358_v10 = vrot.slane %v1332_v50, 4 }
  0xcc   : > { %v864_v19 = vsel %vm854_vm6, %v846_v34, 0.0  ;;  %v893_v49 = vmul.f32 %v846_v34, %v846_v34  ;;  %v938_v35 = vpack.c.bf16 %v846_v34, %v846_v34  ;;  %v894_v38 = vmul.f32 %v847_v23, %v847_v23 }
  0xcd   : > { %v1129_v57 = vsel %vm384_vm2, %v1127_v56, %v3255_v16  ;;  %v865_v58 = vadd.f32 %v864_v19, %v2354_v55  ;;  %v939_v4 = vpack.c.bf16 %v847_v23, %v847_v23  ;;  %v866_v52 = vsel %vm854_vm6, %v847_v23, 0.0  ;;  %v3256_v56 = vld [vmem:[#allocation9_spill] sm:$0xff] }
  0xce   : > { %v910_v30 = vsel %vm854_vm6, %v893_v49, 0.0  ;;  %952 = vst.msk [vmem:[%s2077_s29 + $0x14] sm:$0xf] %vm946_vm7, %v938_v35  ;;  %v1165_v12 = vadd.f32 %v1129_v57, %v1075_v31  ;;  %v3257_v55 = vrot.slane %v3256_v56, 2  ;;  %v912_v23 = vsel %vm854_vm6, %v894_v38, 0.0  ;;  %v3259_v35 = vld [vmem:[#allocation10_spill] sm:$0xff] }
  0xcf   : > { %v867_v34 = vadd.f32 %v866_v52, %v865_v58  ;;  %v911_v8 = vadd.f32 %v910_v30, %v2361_v37  ;;  %953 = vst.msk [vmem:[%s2077_s29 + $0x18] sm:$0xf] %vm946_vm7, %v939_v4  ;;  %v2464_v49 = vmul.f32 %v1962_v28, %v2383_v43  ;;  %v1435_v31 = vrot.slane %v1409_v33, 5 }
  0xd0   : > { %v1206_v19 = vsel %vm274_vm1, %v1204_v17, %v3257_v55  ;;  %v3260_v58 = vrot.slane %v3259_v35, 3  ;;  %v367_v4 = vmul.f32 %v1941_v18, %v315_v22  ;;  %v3261_v17 = vld [vmem:[#allocation11_spill] sm:$0xff]  ;;  %v1512_v30 = vrot.slane %v1486_v15, 6 }
  0xd1   : > { %3258 = vst [vmem:[#allocation7_spill] sm:$0xff] %v2464_v49  ;;  %v1242_v57 = vadd.f32 %v1206_v19, %v1165_v12  ;;  %v913_v60 = vadd.f32 %v912_v23, %v911_v8  ;;  %v2469_v16 = vadd.f32 %v868_v0, %v867_v34  ;;  %v3262_v50 = vrot.slane %v3261_v17, 4  ;;  %v3263_v0 = vld [vmem:[#allocation12_spill] sm:$0xff] }
  0xd2   : > { %v1283_v37 = vsel %vm541_vm3, %v1281_v40, %v3260_v58  ;;  %v446_v55 = vmul.f32 %v1943_v20, %v315_v22  ;;  %v402_v12 = vrot.slane %v367_v4, 1  ;;  %v524_v8 = vmul.f32 %v1945_v21, %v315_v22  ;;  %v3266_v4 = vld [vmem:[#allocation14_spill] sm:$0xff] }
  0xd3   : > { %v1319_v52 = vadd.f32 %v1283_v37, %v1242_v57  ;;  %v1360_v38 = vsel %vm620_vm4, %v1358_v10, %v3262_v50  ;;  %v2476_v53 = vadd.f32 %v914_v62, %v913_v60  ;;  %v603_v33 = vmul.f32 %v1955_v25, %v315_v22 }
  0xd4   : > { %v3264_v34 = vrot.slane %v3263_v0, 5  ;;  %v340_v23 = vmul.f32 %v1953_v24, %v315_v22  ;;  %v480_v57 = vrot.slane %v446_v55, 2  ;;  %v3265_v10 = vrot.slane %v2041_v1, 1 }
  0xd5   : > { %v1396_v40 = vadd.f32 %v1360_v38, %v1319_v52  ;;  %v405_v62 = vsel %vm384_vm2, %v402_v12, %v3183_v46  ;;  %v559_v60 = vrot.slane %v524_v8, 3  ;;  %v682_v58 = vmul.f32 %v1960_v27, %v315_v22 }
  0xd6   : > { %v1437_v19 = vsel %vm245_vm0, %v1435_v31, %v3264_v34  ;;  %v403_v15 = vsel %vm384_vm2, %v3265_v10, %v402_v12  ;;  %v3267_v52 = vrot.slane %v3266_v4, 6  ;;  %v3268_v31 = vld [vmem:[#allocation8_spill] sm:$0xff]  ;;  %v432_v34 = vadd.f32 %v405_v62, %v340_v23 }
  0xd7   : > { %v1473_v37 = vadd.f32 %v1437_v19, %v1396_v40  ;;  %v431_v38 = vadd.f32 %v403_v15, %v3268_v31  ;;  %v3269_v55 = vrot.slane %v2044_v2, 2  ;;  %v483_v10 = vsel %vm274_vm1, %v480_v57, %v3187_v11 }
  0xd8   : > { %v1514_v50 = vsel %vm784_vm5, %v1512_v30, %v3267_v52  ;;  %v638_v12 = vrot.slane %v603_v33, 4  ;;  %v765_v8 = vmul.f32 %v1962_v28, %v315_v22  ;;  %v510_v7 = vadd.f32 %v483_v10, %v432_v34 }
  0xd9   : > { %v481_v1 = vsel %vm274_vm1, %v3269_v55, %v480_v57  ;;  %v1551_v19 = vadd.f32 %v1514_v50, %v1473_v37  ;;  %v3270_v23 = vrot.slane %v2047_v3, 3  ;;  %v3271_v15 = vrot.slane %v2412_v59, 3  ;;  %v2510_v57 = vpop.permute.xlu2 %1067 }
  0xda   : > { %v509_v46 = vadd.f32 %v481_v1, %v431_v38  ;;  %v716_v52 = vrot.slane %v682_v58, 5  ;;  %v3186_v22 = vrot.slane %v2439_v36, 5  ;;  %v3185_v31 = vrot.slane %v2464_v49, 6 }
  0xdb   : > { %v560_v2 = vsel %vm541_vm3, %v3270_v23, %v559_v60  ;;  %v562_v62 = vsel %vm541_vm3, %v559_v60, %v3271_v15  ;;  %v1564_v33 = vadd.f32 %v2037_v63, %v1551_v19  ;;  %v3272_v3 = vrot.slane %v2050_v5, 4  ;;  %v1036_v15 = vpop.permute.xlu1 %1035 }
  0xdc   : > { %v588_v37 = vadd.f32 %v560_v2, %v509_v46  ;;  %v589_v50 = vadd.f32 %v562_v62, %v510_v7  ;;  %v3273_v34 = vrot.slane %v2416_v51, 4  ;;  %v802_v58 = vrot.slane %v765_v8, 6  ;;  %v3288_v51 = vld [vmem:[#allocation13_spill] sm:$0xff] }
  0xdd   : > { %v639_v38 = vsel %vm620_vm4, %v3272_v3, %v638_v12  ;;  %v1609_v55 = vmul.f32 %v1564_v33, %v1564_v33  ;;  %v1654_v1 = vpack.c.bf16 %v1564_v33, %v1564_v33  ;;  %v2523_v19 = vmul.f32 %v2510_v57, %v1941_v18 }
  0xde   : > { %v641_v60 = vsel %vm620_vm4, %v638_v12, %v3273_v34  ;;  %v667_v10 = vadd.f32 %v639_v38, %v588_v37  ;;  %v3275_v5 = vrot.slane %v2053_v6, 5  ;;  %v2532_v12 = vmul.f32 %v1953_v24, %v2383_v43 }
  0xdf   : > { %3274 = vst [vmem:[#allocation9_spill] sm:$0xff] %v2523_v19  ;;  %v668_v23 = vadd.f32 %v641_v60, %v589_v50  ;;  %v719_v8 = vsel %vm245_vm0, %v716_v52, %v3186_v22  ;;  %v2541_v37 = vmul.f32 %v2510_v57, %v1943_v20  ;;  %v2544_v6 = vsel %vm854_vm6, %v1564_v33, 0.0 }
  0xe0   : > { %v717_v2 = vsel %vm245_vm0, %v3275_v5, %v716_v52  ;;  %1799 = vst.msk [vmem:[%s2077_s29 + $0x34] sm:$0xf] %vm946_vm7, %v1654_v1  ;;  %v3276_v3 = vrot.slane %v2059_v9, 6  ;;  %v805_v38 = vsel %vm784_vm5, %v802_v58, %v3185_v31  ;;  %v2553_v34 = vsel %vm854_vm6, %v1609_v55, 0.0 }
  0xe1   : > { %v745_v62 = vadd.f32 %v717_v2, %v667_v10  ;;  %v746_v50 = vadd.f32 %v719_v8, %v668_v23  ;;  %v1104_v1 = vmul.f32 %v1036_v15, %v1941_v18  ;;  %v1078_v33 = vmul.f32 %v1036_v15, %v1953_v24 }
  0xe2   : > { %v803_v43 = vsel %vm784_vm5, %v3276_v3, %v802_v58  ;;  %v1181_v23 = vmul.f32 %v1036_v15, %v1943_v20  ;;  %v1258_v9 = vmul.f32 %v1036_v15, %v1945_v21  ;;  %v2562_v58 = vmul.f32 %v1036_v15, %v1955_v25 }
  0xe3   : > { %v833_v52 = vadd.f32 %v803_v43, %v745_v62  ;;  %v834_v10 = vadd.f32 %v805_v38, %v746_v50  ;;  %v1132_v2 = vrot.slane %v1104_v1, 1  ;;  %v2565_v55 = vmul.f32 %v1036_v15, %v1960_v27  ;;  %v3277_v1 = vld [vmem:[#allocation15_spill] sm:$0xff] }
  0xe4   : > { %v1209_v62 = vrot.slane %v1181_v23, 2  ;;  %v1286_v50 = vrot.slane %v1258_v9, 3  ;;  %v2569_v3 = vmul.f32 %v1036_v15, %v1962_v28  ;;  %v3278_v60 = vrot.slane %v3277_v1, 1  ;;  %v1032_v23 = vpop.permute.xlu0 %1031 }
  0xe5   : > { %v849_v5 = vadd.f32 %v2037_v63, %v833_v52  ;;  %v850_v8 = vadd.f32 %v2037_v63, %v834_v10  ;;  %v3279_v7 = vrot.slane %v2174_v48, 2  ;;  %v3280_v30 = vrot.slane %v2178_v42, 3 }
  0xe6   : > { %v1135_v31 = vsel %vm384_vm2, %v1132_v2, %v3278_v60  ;;  %v3287_v49 = vrot.slane %v3256_v56, 2 }
  0xe7   : > { %v870_v43 = vsel %vm854_vm6, %v849_v5, 0.0  ;;  %v896_v38 = vmul.f32 %v849_v5, %v849_v5  ;;  %v941_v52 = vpack.c.bf16 %v849_v5, %v849_v5  ;;  %v872_v11 = vsel %vm854_vm6, %v850_v8, 0.0 }
  0xe8   : > { %v871_v22 = vadd.f32 %v870_v43, %v2469_v16  ;;  %v897_v46 = vmul.f32 %v850_v8, %v850_v8  ;;  %v942_v10 = vpack.c.bf16 %v850_v8, %v850_v8  ;;  %v1168_v15 = vadd.f32 %v1135_v31, %v1078_v33 }
  0xe9   : > { %v916_v9 = vsel %vm854_vm6, %v896_v38, 0.0  ;;  %955 = vst.msk [vmem:[%s2077_s29 + $0x20] sm:$0xf] %vm946_vm7, %v941_v52  ;;  %v1212_v5 = vsel %vm274_vm1, %v1209_v62, %v3279_v7  ;;  %v1289_v60 = vsel %vm541_vm3, %v1286_v50, %v3280_v30  ;;  %v1363_v43 = vrot.slane %v2562_v58, 4 }
  0xea   : > { %v2586_v40 = vadd.f32 %v872_v11, %v871_v22  ;;  %v917_v16 = vadd.f32 %v916_v9, %v2476_v53  ;;  %v918_v8 = vsel %vm854_vm6, %v897_v46, 0.0  ;;  %956 = vst.msk [vmem:[%s2077_s29 + $0x24] sm:$0xf] %vm946_vm7, %v942_v10  ;;  %v1245_v38 = vadd.f32 %v1212_v5, %v1168_v15  ;;  %v1048_v46 = vpop.permute.xlu1 %1047 }
  0xeb   : > { %v1440_v31 = vrot.slane %v2565_v55, 5  ;;  %v1517_v33 = vrot.slane %v2569_v3, 6  ;;  %v1077_v7 = vmul.f32 %v1032_v23, %v1953_v24  ;;  %v3283_v11 = vrot.slane %v2193_v32, 4 }
  0xec   : > { %3281 = vst [vmem:[#allocation10_spill] sm:$0xff] %v2586_v40  ;;  %v2596_v52 = vadd.f32 %v918_v8, %v917_v16  ;;  %v1103_v53 = vmul.f32 %v1032_v23, %v1941_v18  ;;  %v1180_v22 = vmul.f32 %v1032_v23, %v1943_v20  ;;  %v1322_v10 = vadd.f32 %v1289_v60, %v1245_v38 }
  0xed   : > { %v1366_v30 = vsel %vm620_vm4, %v1363_v43, %v3283_v11  ;;  %v3284_v58 = vrot.slane %v2240_v26, 5  ;;  %v3285_v3 = vrot.slane %v2254_v54, 6  ;;  %v1257_v15 = vmul.f32 %v1032_v23, %v1945_v21 }
  0xee   : > { %3282 = vst [vmem:[#allocation11_spill] sm:$0xff] %v2596_v52  ;;  %v1130_v5 = vrot.slane %v1103_v53, 1  ;;  %v1207_v16 = vrot.slane %v1180_v22, 2  ;;  %v1334_v8 = vmul.f32 %v1032_v23, %v1955_v25  ;;  %v1411_v11 = vmul.f32 %v1032_v23, %v1960_v27 }
  0xef   : > { %v1443_v55 = vsel %vm245_vm0, %v1440_v31, %v3284_v58  ;;  %v1520_v9 = vsel %vm784_vm5, %v1517_v33, %v3285_v3  ;;  %v1399_v52 = vadd.f32 %v1366_v30, %v1322_v10  ;;  %v1284_v40 = vrot.slane %v1257_v15, 3 }
  0xf0   : > { %v1488_v60 = vmul.f32 %v1032_v23, %v1962_v28  ;;  %v1081_v38 = vmul.f32 %v1048_v46, %v1953_v24  ;;  %v3286_v58 = vrot.slane %v3254_v41, 1  ;;  %v1133_v3 = vsel %vm384_vm2, %v1130_v5, %v1132_v2 }
  0xf1   : > { %v1208_v53 = vsel %vm274_vm1, %v3287_v49, %v1207_v16  ;;  %v1210_v22 = vsel %vm274_vm1, %v1207_v16, %v1209_v62  ;;  %v1476_v36 = vadd.f32 %v1443_v55, %v1399_v52  ;;  %v1167_v10 = vadd.f32 %v1133_v3, %v1077_v7 }
  0xf2   : > { %v1131_v19 = vsel %vm384_vm2, %v3286_v58, %v1130_v5  ;;  %v3289_v23 = vrot.slane %v3259_v35, 3  ;;  %v1287_v41 = vsel %vm541_vm3, %v1284_v40, %v1286_v50  ;;  %v1361_v59 = vrot.slane %v1334_v8, 4 }
  0xf3   : > { %v1166_v30 = vadd.f32 %v1131_v19, %v3288_v51  ;;  %v1438_v58 = vrot.slane %v1411_v11, 5  ;;  %v1515_v44 = vrot.slane %v1488_v60, 6  ;;  %v1554_v2 = vadd.f32 %v1520_v9, %v1476_v36 }
  0xf4   : > { %v1285_v15 = vsel %vm541_vm3, %v3289_v23, %v1284_v40  ;;  %v1244_v56 = vadd.f32 %v1210_v22, %v1167_v10  ;;  %v2628_v49 = vmul.f32 %v1048_v46, %v1941_v18  ;;  %v3290_v62 = vrot.slane %v3261_v17, 4  ;;  %v2662_v23 = vpop.permute.xlu0 %1043 }
  0xf5   : > { %v1243_v5 = vadd.f32 %v1208_v53, %v1166_v30  ;;  %v1364_v19 = vsel %vm620_vm4, %v1361_v59, %v1363_v43  ;;  %v3291_v35 = vrot.slane %v3263_v0, 5  ;;  %v1441_v40 = vsel %vm245_vm0, %v1438_v58, %v1440_v31 }
  0xf6   : > { %v1362_v51 = vsel %vm620_vm4, %v3290_v62, %v1361_v59  ;;  %v1567_v50 = vadd.f32 %v2037_v63, %v1554_v2  ;;  %v1321_v52 = vadd.f32 %v1287_v41, %v1244_v56  ;;  %v3292_v55 = vrot.slane %v3266_v4, 6 }
  0xf7   : > { %v1439_v7 = vsel %vm245_vm0, %v3291_v35, %v1438_v58  ;;  %v1320_v36 = vadd.f32 %v1285_v15, %v1243_v5  ;;  %v1518_v17 = vsel %vm784_vm5, %v1515_v44, %v1517_v33  ;;  %v1138_v16 = vrot.slane %v2628_v49, 1 }
  0xf8   : > { %v1516_v9 = vsel %vm784_vm5, %v3292_v55, %v1515_v44  ;;  %v2645_v59 = vmul.f32 %v1048_v46, %v1943_v20  ;;  %v2648_v0 = vmul.f32 %v1048_v46, %v1945_v21  ;;  %v1582_v43 = vsel %vm854_vm6, %v1567_v50, 0.0 }
  0xf9   : > { %v1612_v31 = vmul.f32 %v1567_v50, %v1567_v50  ;;  %v1657_v8 = vpack.c.bf16 %v1567_v50, %v1567_v50  ;;  %v1397_v11 = vadd.f32 %v1362_v51, %v1320_v36  ;;  %v1398_v60 = vadd.f32 %v1364_v19, %v1321_v52 }
  0xfa   : > { %v3293_v4 = vrot.slane %v2293_v13, 1  ;;  %v1215_v44 = vrot.slane %v2645_v59, 2  ;;  %v1292_v33 = vrot.slane %v2648_v0, 3  ;;  %v2660_v10 = vmul.f32 %v1048_v46, %v1955_v25 }
  0xfb   : > { %v1627_v53 = vsel %vm854_vm6, %v1612_v31, 0.0  ;;  %1802 = vst.msk [vmem:[%s2077_s29 + $0x40] sm:$0xf] %vm946_vm7, %v1657_v8  ;;  %v1474_v22 = vadd.f32 %v1439_v7, %v1397_v11  ;;  %v1475_v15 = vadd.f32 %v1441_v40, %v1398_v60  ;;  %v3294_v41 = vrot.slane %v2297_v47, 2 }
  0xfc   : > { %v1141_v3 = vsel %vm384_vm2, %v1138_v16, %v3293_v4  ;;  %v3295_v2 = vrot.slane %v2327_v45, 3  ;;  %v2673_v56 = vmul.f32 %v1048_v46, %v1960_v27  ;;  %v1369_v62 = vrot.slane %v2660_v10, 4 }
  0xfd   : > { %v1171_v30 = vadd.f32 %v1141_v3, %v1081_v38  ;;  %v1218_v58 = vsel %vm274_vm1, %v1215_v44, %v3294_v41  ;;  %v1552_v38 = vadd.f32 %v1516_v9, %v1474_v22  ;;  %v2677_v51 = vmul.f32 %v1048_v46, %v1962_v28 }
  0xfe   : > { %v1295_v5 = vsel %vm541_vm3, %v1292_v33, %v3295_v2  ;;  %v1553_v19 = vadd.f32 %v1518_v17, %v1475_v15  ;;  %v1446_v35 = vrot.slane %v2673_v56, 5  ;;  %v1080_v7 = vmul.f32 %v2662_v23, %v1953_v24  ;;  %v1056_v56 = vpop.permute.xlu0 %1055 }
  0xff   : > { %v1248_v49 = vadd.f32 %v1218_v58, %v1171_v30  ;;  %v1106_v40 = vmul.f32 %v2662_v23, %v1941_v18  ;;  %v1565_v50 = vadd.f32 %v2037_v63, %v1552_v38  ;;  %v3296_v52 = vrot.slane %v2335_v14, 4 }
 0x100   : > { %v1523_v55 = vrot.slane %v2677_v51, 6  ;;  %v1566_v9 = vadd.f32 %v2037_v63, %v1553_v19  ;;  %v3297_v17 = vrot.slane %v2381_v39, 5  ;;  %v1183_v8 = vmul.f32 %v2662_v23, %v1943_v20 }
 0x101   : > { %v1325_v36 = vadd.f32 %v1295_v5, %v1248_v49  ;;  %v1372_v46 = vsel %vm620_vm4, %v1369_v62, %v3296_v52  ;;  %v1136_v31 = vrot.slane %v1106_v40, 1  ;;  %v1578_v11 = vsel %vm854_vm6, %v1565_v50, 0.0  ;;  %v3300_v52 = vld [vmem:[#allocation16_spill] sm:$0xff] }
 0x102   : > { %v1449_v59 = vsel %vm245_vm0, %v1446_v35, %v3297_v17  ;;  %v1610_v60 = vmul.f32 %v1565_v50, %v1565_v50  ;;  %v1655_v4 = vpack.c.bf16 %v1565_v50, %v1565_v50  ;;  %v1579_v22 = vadd.f32 %v1578_v11, %v2544_v6 }
 0x103   : > { %v1402_v3 = vadd.f32 %v1372_v46, %v1325_v36  ;;  %v1580_v63 = vsel %vm854_vm6, %v1566_v9, 0.0  ;;  %v1611_v30 = vmul.f32 %v1566_v9, %v1566_v9  ;;  %v1656_v15 = vpack.c.bf16 %v1566_v9, %v1566_v9 }
 0x104   : > { %v1623_v41 = vsel %vm854_vm6, %v1610_v60, 0.0  ;;  %1800 = vst.msk [vmem:[%s2077_s29 + $0x38] sm:$0xf] %vm946_vm7, %v1655_v4  ;;  %v3298_v2 = vrot.slane %v2392_v61, 6  ;;  %v3299_v38 = vrot.slane %v3277_v1, 1  ;;  %v1581_v6 = vadd.f32 %v1580_v63, %v1579_v22 }
 0x105   : > { %v1479_v58 = vadd.f32 %v1449_v59, %v1402_v3  ;;  %v1624_v19 = vadd.f32 %v1623_v41, %v2553_v34  ;;  %v1625_v40 = vsel %vm854_vm6, %v1611_v30, 0.0  ;;  %1801 = vst.msk [vmem:[%s2077_s29 + $0x3c] sm:$0xf] %vm946_vm7, %v1656_v15  ;;  %v1139_v50 = vsel %vm384_vm2, %v1136_v31, %v1138_v16  ;;  %v2728_v60 = vld [vmem:[%s3149_s2] ss:$0 sm:$0xff] }
 0x106   : > { %v1526_v5 = vsel %vm784_vm5, %v1523_v55, %v3298_v2  ;;  %v1137_v49 = vsel %vm384_vm2, %v3299_v38, %v1136_v31  ;;  %v1170_v9 = vadd.f32 %v1139_v50, %v1080_v7  ;;  %v1213_v17 = vrot.slane %v1183_v8, 2  ;;  %v2748_v38 = vpop.permute.xlu1 %1059 }
 0x107   : > { %v1557_v36 = vadd.f32 %v1526_v5, %v1479_v58  ;;  %v1169_v46 = vadd.f32 %v1137_v49, %v3300_v52  ;;  %v1626_v59 = vadd.f32 %v1625_v40, %v1624_v19  ;;  %v2719_v11 = vadd.f32 %v1582_v43, %v1581_v6 }
 0x108   : > { %v1260_v1 = vmul.f32 %v2662_v23, %v1945_v21  ;;  %v1337_v34 = vmul.f32 %v2662_v23, %v1955_v25  ;;  %v3301_v31 = vrot.slane %v2174_v48, 2  ;;  %v1216_v43 = vsel %vm274_vm1, %v1213_v17, %v1215_v44 }
 0x109   : > { %v1570_v16 = vadd.f32 %v2728_v60, %v1557_v36  ;;  %v1414_v8 = vmul.f32 %v2662_v23, %v1960_v27  ;;  %v2737_v4 = vadd.f32 %v1627_v53, %v1626_v59  ;;  %v1247_v22 = vadd.f32 %v1216_v43, %v1170_v9 }
 0x10a   : > { %v1214_v7 = vsel %vm274_vm1, %v3301_v31, %v1213_v17  ;;  %v1290_v63 = vrot.slane %v1260_v1, 3  ;;  %v1225_v30 = vrot.slane %v2541_v37, 2  ;;  %v1367_v58 = vrot.slane %v1337_v34, 4 }
 0x10b   : > { %v1246_v3 = vadd.f32 %v1214_v7, %v1169_v46  ;;  %v1615_v15 = vmul.f32 %v1570_v16, %v1570_v16  ;;  %v1660_v41 = vpack.c.bf16 %v1570_v16, %v1570_v16  ;;  %v3302_v48 = vrot.slane %v2178_v42, 3 }
 0x10c   : > { %v1293_v44 = vsel %vm541_vm3, %v1290_v63, %v1292_v33  ;;  %v1444_v5 = vrot.slane %v1414_v8, 5  ;;  %v1491_v53 = vmul.f32 %v2662_v23, %v1962_v28  ;;  %v2752_v49 = vmul.f32 %v2510_v57, %v1945_v21 }
 0x10d   : > { %v1291_v2 = vsel %vm541_vm3, %v3302_v48, %v1290_v63  ;;  %v2756_v6 = vmul.f32 %v2510_v57, %v1955_v25  ;;  %1805 = vst.msk [vmem:[%s2077_s29 + $0x4c] sm:$0xf] %vm946_vm7, %v1660_v41  ;;  %v1324_v0 = vadd.f32 %v1293_v44, %v1247_v22  ;;  %v1588_v33 = vsel %vm854_vm6, %v1570_v16, 0.0 }
 0x10e   : > { %v1323_v42 = vadd.f32 %v1291_v2, %v1246_v3  ;;  %v3303_v19 = vrot.slane %v2193_v32, 4  ;;  %v1370_v40 = vsel %vm620_vm4, %v1367_v58, %v1369_v62  ;;  %v1521_v50 = vrot.slane %v1491_v53, 6 }
 0x10f   : > { %v2768_v36 = vsel %vm854_vm6, %v1615_v15, 0.0  ;;  %v1401_v46 = vadd.f32 %v1370_v40, %v1324_v0  ;;  %v2772_v9 = vmul.f32 %v2748_v38, %v1941_v18  ;;  %v3304_v17 = vrot.slane %v2240_v26, 5 }
 0x110   : > { %v1368_v23 = vsel %vm620_vm4, %v3303_v19, %v1367_v58  ;;  %v1447_v10 = vsel %vm245_vm0, %v1444_v5, %v1446_v35  ;;  %v2782_v62 = vmul.f32 %v2748_v38, %v1943_v20  ;;  %v2786_v59 = vmul.f32 %v2748_v38, %v1945_v21 }
 0x111   : > { %v1400_v52 = vadd.f32 %v1368_v23, %v1323_v42  ;;  %v1445_v32 = vsel %vm245_vm0, %v3304_v17, %v1444_v5  ;;  %v1478_v34 = vadd.f32 %v1447_v10, %v1401_v46  ;;  %v3305_v16 = vrot.slane %v2254_v54, 6 }
 0x112   : > { %v2793_v31 = vmul.f32 %v2748_v38, %v1955_v25  ;;  %v1524_v35 = vsel %vm784_vm5, %v1521_v50, %v1523_v55  ;;  %v1144_v7 = vrot.slane %v2772_v9, 1  ;;  %v1221_v43 = vrot.slane %v2782_v62, 2 }
 0x113   : > { %v1477_v1 = vadd.f32 %v1445_v32, %v1400_v52  ;;  %v1522_v26 = vsel %vm784_vm5, %v3305_v16, %v1521_v50  ;;  %v1298_v8 = vrot.slane %v2786_v59, 3  ;;  %v1556_v22 = vadd.f32 %v1524_v35, %v1478_v34 }
 0x114   : > { %v2803_v54 = vmul.f32 %v2748_v38, %v1960_v27  ;;  %v2807_v63 = vmul.f32 %v2748_v38, %v1962_v28  ;;  %v1375_v51 = vrot.slane %v2793_v31, 4  ;;  %v1083_v55 = vmul.f32 %v1056_v56, %v1953_v24 }
 0x115   : > { %v1555_v3 = vadd.f32 %v1522_v26, %v1477_v1  ;;  %v1109_v15 = vmul.f32 %v1056_v56, %v1941_v18  ;;  %v1186_v41 = vmul.f32 %v1056_v56, %v1943_v20  ;;  %v1569_v48 = vadd.f32 %v2728_v60, %v1556_v22 }
 0x116   : > { %v1263_v2 = vmul.f32 %v1056_v56, %v1945_v21  ;;  %v1340_v44 = vmul.f32 %v1056_v56, %v1955_v25  ;;  %v1417_v42 = vmul.f32 %v1056_v56, %v1960_v27  ;;  %v1494_v0 = vmul.f32 %v1056_v56, %v1962_v28 }
 0x117   : > { %v1568_v58 = vadd.f32 %v2728_v60, %v1555_v3  ;;  %v1142_v5 = vrot.slane %v1109_v15, 1  ;;  %v1219_v53 = vrot.slane %v1186_v41, 2  ;;  %v1586_v23 = vsel %vm854_vm6, %v1569_v48, 0.0 }
 0x118   : > { %v1614_v50 = vmul.f32 %v1569_v48, %v1569_v48  ;;  %v1659_v17 = vpack.c.bf16 %v1569_v48, %v1569_v48  ;;  %v3306_v32 = vrot.slane %v2293_v13, 1  ;;  %v3307_v13 = vrot.slane %v2297_v47, 2 }
 0x119   : > { %v1584_v19 = vsel %vm854_vm6, %v1568_v58, 0.0  ;;  %v1613_v40 = vmul.f32 %v1568_v58, %v1568_v58  ;;  %v1658_v46 = vpack.c.bf16 %v1568_v58, %v1568_v58  ;;  %v1145_v16 = vsel %vm384_vm2, %v1142_v5, %v1144_v7 }
 0x11a   : > { %v1585_v52 = vadd.f32 %v1584_v19, %v2719_v11  ;;  %v1143_v10 = vsel %vm384_vm2, %v3306_v32, %v1142_v5  ;;  %v1631_v34 = vsel %vm854_vm6, %v1614_v50, 0.0  ;;  %v1173_v11 = vadd.f32 %v1145_v16, %v1083_v55  ;;  %1804 = vst.msk [vmem:[%s2077_s29 + $0x48] sm:$0xf] %vm946_vm7, %v1659_v17  ;;  %v2842_v19 = vpop.permute.xlu1 %322 }
 0x11b   : > { %v1629_v1 = vsel %vm854_vm6, %v1613_v40, 0.0  ;;  %v1172_v26 = vadd.f32 %v1143_v10, %v2277_v29  ;;  %1803 = vst.msk [vmem:[%s2077_s29 + $0x44] sm:$0xf] %vm946_vm7, %v1658_v46  ;;  %v1220_v3 = vsel %vm274_vm1, %v3307_v13, %v1219_v53  ;;  %v1222_v22 = vsel %vm274_vm1, %v1219_v53, %v1221_v43 }
 0x11c   : > { %v1587_v56 = vadd.f32 %v1586_v23, %v1585_v52  ;;  %v1630_v35 = vadd.f32 %v1629_v1, %v2737_v4  ;;  %v1296_v41 = vrot.slane %v1263_v2, 3  ;;  %v1373_v58 = vrot.slane %v1340_v44, 4 }
 0x11d   : > { %v1249_v15 = vadd.f32 %v1220_v3, %v1172_v26  ;;  %v1250_v5 = vadd.f32 %v1222_v22, %v1173_v11  ;;  %v1450_v4 = vrot.slane %v1417_v42, 5  ;;  %v1452_v55 = vrot.slane %v2803_v54, 5  ;;  %v3312_v3 = vld [vmem:[#allocation2_spill] sm:$0xff] }
 0x11e   : > { %v1632_v29 = vadd.f32 %v1631_v34, %v1630_v35  ;;  %v1589_v48 = vadd.f32 %v1588_v33, %v1587_v56  ;;  %v1529_v47 = vrot.slane %v2807_v63, 6  ;;  %v3308_v23 = vrot.slane %v2327_v45, 3 }
 0x11f   : > { %v1299_v53 = vsel %vm541_vm3, %v1296_v41, %v1298_v8  ;;  %v3309_v42 = vrot.slane %v2335_v14, 4  ;;  %v1376_v52 = vsel %vm620_vm4, %v1373_v58, %v1375_v51  ;;  %v3310_v45 = vrot.slane %v2381_v39, 5 }
 0x120   : > { %v1297_v40 = vsel %vm541_vm3, %v3308_v23, %v1296_v41  ;;  %v1634_v2 = vadd.f32 %v2768_v36, %v1632_v29  ;;  %v1327_v33 = vadd.f32 %v1299_v53, %v1250_v5  ;;  %v1527_v17 = vrot.slane %v1494_v0, 6 }
 0x121   : > { %v1326_v44 = vadd.f32 %v1297_v40, %v1249_v15  ;;  %v1374_v50 = vsel %vm620_vm4, %v3309_v42, %v1373_v58  ;;  %v1451_v46 = vsel %vm245_vm0, %v3310_v45, %v1450_v4  ;;  %v2864_v32 = vmul.f32 %v1941_v18, %v2842_v19  ;;  %v1064_v40 = vpop.permute.xlu0 %1063  ;;  %v3314_v42 = vld [vmem:[#allocation3_spill] sm:$0xff] }
 0x122   : > { %v1404_v10 = vadd.f32 %v1376_v52, %v1327_v33  ;;  %v2868_v14 = vmul.f32 %v1943_v20, %v2842_v19  ;;  %v2872_v1 = vmul.f32 %v1945_v21, %v2842_v19  ;;  %v1453_v39 = vsel %vm245_vm0, %v1450_v4, %v1452_v55 }
 0x123   : > { %v1403_v36 = vadd.f32 %v1374_v50, %v1326_v44  ;;  %v3311_v0 = vrot.slane %v2392_v61, 6  ;;  %v406_v16 = vrot.slane %v2864_v32, 1  ;;  %v2883_v26 = vmul.f32 %v1955_v25, %v2842_v19 }
 0x124   : > { %v1481_v35 = vadd.f32 %v1453_v39, %v1404_v10  ;;  %v1530_v11 = vsel %vm784_vm5, %v1527_v17, %v1529_v47  ;;  %v484_v13 = vrot.slane %v2868_v14, 2  ;;  %v3313_v61 = vrot.slane %v3312_v3, 1 }
 0x125   : > { %v1528_v34 = vsel %vm784_vm5, %v3311_v0, %v1527_v17  ;;  %v1480_v56 = vadd.f32 %v1451_v46, %v1403_v36  ;;  %v3195_v15 = vrot.slane %v2872_v1, 3  ;;  %v3196_v41 = vrot.slane %v2883_v26, 4  ;;  %v3316_v36 = vld [vmem:[#allocation4_spill] sm:$0xff] }
 0x126   : > { %v407_v22 = vsel %vm384_vm2, %v3313_v61, %v406_v16  ;;  %v2898_v58 = vmul.f32 %v1960_v27, %v2842_v19  ;;  %v1559_v5 = vadd.f32 %v1530_v11, %v1481_v35  ;;  %v2903_v23 = vmul.f32 %v1962_v28, %v2842_v19  ;;  %v3318_v11 = vld [vmem:[#allocation5_spill] sm:$0xff] }
 0x127   : > { %v1558_v29 = vadd.f32 %v1528_v34, %v1480_v56  ;;  %v433_v4 = vadd.f32 %v407_v22, %v2532_v12  ;;  %v1302_v53 = vrot.slane %v2752_v49, 3  ;;  %v2908_v44 = vmul.f32 %v2510_v57, %v1960_v27 }
 0x128   : > { %v2912_v33 = vmul.f32 %v2510_v57, %v1962_v28  ;;  %v3315_v50 = vrot.slane %v3314_v42, 2  ;;  %v1084_v52 = vmul.f32 %v2748_v38, %v1953_v24  ;;  %v1572_v46 = vadd.f32 %v2728_v60, %v1559_v5 }
 0x129   : > { %v1571_v45 = vadd.f32 %v2728_v60, %v1558_v29  ;;  %v3317_v10 = vrot.slane %v3316_v36, 3  ;;  %v720_v0 = vrot.slane %v2898_v58, 5  ;;  %v1111_v34 = vmul.f32 %v1064_v40, %v1941_v18 }
 0x12a   : > { %v485_v12 = vsel %vm274_vm1, %v3315_v50, %v484_v13  ;;  %v1188_v56 = vmul.f32 %v1064_v40, %v1943_v20  ;;  %v3319_v3 = vrot.slane %v3318_v11, 4  ;;  %v806_v22 = vrot.slane %v2903_v23, 6 }
 0x12b   : > { %v511_v17 = vadd.f32 %v485_v12, %v433_v4  ;;  %v564_v39 = vsel %vm541_vm3, %v3317_v10, %v3195_v15  ;;  %v1590_v38 = vsel %vm854_vm6, %v1571_v45, 0.0  ;;  %v1616_v35 = vmul.f32 %v1571_v45, %v1571_v45 }
 0x12c   : > { %v643_v61 = vsel %vm620_vm4, %v3319_v3, %v3196_v41  ;;  %v2938_v29 = vadd.f32 %v1590_v38, %v1589_v48  ;;  %v1661_v5 = vpack.c.bf16 %v1571_v45, %v1571_v45  ;;  %v1662_v4 = vpack.c.bf16 %v1572_v46, %v1572_v46  ;;  %v3320_v3 = vld [vmem:[#allocation6_spill] sm:$0xff] }
 0x12d   : > { %v590_v42 = vadd.f32 %v564_v39, %v511_v17  ;;  %v1635_v50 = vsel %vm854_vm6, %v1616_v35, 0.0  ;;  %v1085_v12 = vmul.f32 %v1064_v40, %v1953_v24  ;;  %v1146_v36 = vrot.slane %v1111_v34, 1  ;;  %v3322_v17 = vld [vmem:[#allocation7_spill] sm:$0xff] }
 0x12e   : > { %v1223_v10 = vrot.slane %v1188_v56, 2  ;;  %v2942_v15 = vadd.f32 %v1635_v50, %v1634_v2  ;;  %1806 = vst.msk [vmem:[%s2077_s29 + $0x50] sm:$0xf] %vm946_vm7, %v1661_v5  ;;  %v3321_v41 = vrot.slane %v3320_v3, 5  ;;  %v1265_v45 = vmul.f32 %v1064_v40, %v1945_v21  ;;  %v3324_v56 = vld [vmem:[#allocation9_spill] sm:$0xff] }
 0x12f   : > { %v669_v11 = vadd.f32 %v643_v61, %v590_v42  ;;  %1807 = vst.msk [vmem:[%s2077_s29 + $0x54] sm:$0xf] %vm946_vm7, %v1662_v4  ;;  %v3323_v39 = vrot.slane %v3322_v17, 6  ;;  %v1147_v34 = vsel %vm384_vm2, %v1144_v7, %v1146_v36  ;;  %v3325_v38 = vrot.slane %v3324_v56, 1 }
 0x130   : > { %v721_v48 = vsel %vm245_vm0, %v3321_v41, %v720_v0  ;;  %v1224_v41 = vsel %vm274_vm1, %v1221_v43, %v1223_v10  ;;  %v1174_v5 = vadd.f32 %v1147_v34, %v1084_v52  ;;  %v1226_v42 = vsel %vm274_vm1, %v1223_v10, %v1225_v30 }
 0x131   : > { %v807_v2 = vsel %vm784_vm5, %v3323_v39, %v806_v22  ;;  %v1149_v35 = vsel %vm384_vm2, %v1146_v36, %v3325_v38  ;;  %v747_v61 = vadd.f32 %v721_v48, %v669_v11  ;;  %v1300_v50 = vrot.slane %v1265_v45, 3 }
 0x132   : > { %v1175_v4 = vadd.f32 %v1149_v35, %v1085_v12  ;;  %v1342_v9 = vmul.f32 %v1064_v40, %v1955_v25  ;;  %v1419_v7 = vmul.f32 %v1064_v40, %v1960_v27  ;;  %v1496_v3 = vmul.f32 %v1064_v40, %v1962_v28 }
 0x133   : > { %v1379_v36 = vrot.slane %v2756_v6, 4  ;;  %v835_v17 = vadd.f32 %v807_v2, %v747_v61  ;;  %v1251_v62 = vadd.f32 %v1224_v41, %v1174_v5  ;;  %v1301_v43 = vsel %vm541_vm3, %v1298_v8, %v1300_v50  ;;  %v1073_v61 = vpop.permute.xlu1 %1072 }
 0x134   : > { %v1252_v39 = vadd.f32 %v1226_v42, %v1175_v4  ;;  %v1303_v52 = vsel %vm541_vm3, %v1300_v50, %v1302_v53  ;;  %v1377_v12 = vrot.slane %v1342_v9, 4  ;;  %v1454_v10 = vrot.slane %v1419_v7, 5 }
 0x135   : > { %v851_v11 = vadd.f32 %v2728_v60, %v835_v17  ;;  %v1328_v48 = vadd.f32 %v1301_v43, %v1251_v62  ;;  %v1531_v45 = vrot.slane %v1496_v3, 6  ;;  %v1086_v2 = vmul.f32 %v2510_v57, %v1953_v24 }
 0x136   : > { %v1329_v40 = vadd.f32 %v1303_v52, %v1252_v39  ;;  %v1456_v34 = vrot.slane %v2908_v44, 5  ;;  %v1378_v59 = vsel %vm620_vm4, %v1375_v51, %v1377_v12  ;;  %v1617_v8 = vmul.f32 %v1572_v46, %v1572_v46 }
 0x137   : > { %v943_v38 = vpack.c.bf16 %v851_v11, %v851_v11  ;;  %v1380_v35 = vsel %vm620_vm4, %v1377_v12, %v1379_v36  ;;  %v1405_v41 = vadd.f32 %v1378_v59, %v1328_v48  ;;  %v1533_v5 = vrot.slane %v2912_v33, 6 }
 0x138   : > { %v2994_v4 = vmul.f32 %v1953_v24, %v2842_v19  ;;  %v1406_v57 = vadd.f32 %v1380_v35, %v1329_v40  ;;  %v1455_v31 = vsel %vm245_vm0, %v1452_v55, %v1454_v10  ;;  %v1592_v51 = vsel %vm854_vm6, %v1572_v46, 0.0 }
 0x139   : > { %957 = vst.msk [vmem:[%s2077_s29 + $0x28] sm:$0xf] %vm946_vm7, %v943_v38  ;;  %v1457_v42 = vsel %vm245_vm0, %v1454_v10, %v1456_v34  ;;  %v1482_v50 = vadd.f32 %v1455_v31, %v1405_v41  ;;  %v1532_v9 = vsel %vm784_vm5, %v1529_v47, %v1531_v45  ;;  %v1113_v7 = vmul.f32 %v1073_v61, %v1941_v18 }
 0x13a   : > { %v1483_v19 = vadd.f32 %v1457_v42, %v1406_v57  ;;  %v1190_v54 = vmul.f32 %v1073_v61, %v1943_v20  ;;  %v1267_v55 = vmul.f32 %v1073_v61, %v1945_v21  ;;  %v1637_v46 = vsel %vm854_vm6, %v1617_v8, 0.0 }
 0x13b   : > { %v1534_v3 = vsel %vm784_vm5, %v1531_v45, %v1533_v5  ;;  %v1560_v17 = vadd.f32 %v1532_v9, %v1482_v50  ;;  %v1087_v62 = vmul.f32 %v1073_v61, %v1953_v24  ;;  %v1150_v63 = vrot.slane %v1113_v7, 1 }
 0x13c   : > { %v1561_v39 = vadd.f32 %v1534_v3, %v1483_v19  ;;  %v1227_v43 = vrot.slane %v1190_v54, 2  ;;  %v1344_v47 = vmul.f32 %v1073_v61, %v1955_v25  ;;  %v1593_v52 = vadd.f32 %v1592_v51, %v2938_v29 }
 0x13d   : > { %v898_v12 = vmul.f32 %v851_v11, %v851_v11  ;;  %v1573_v10 = vadd.f32 %v2728_v60, %v1560_v17  ;;  %v1421_v48 = vmul.f32 %v1073_v61, %v1960_v27  ;;  %v3326_v45 = vrot.slane %v3324_v56, 1  ;;  %v328_v17 = vpop.permute.xlu0 %327 }
 0x13e   : > { %v1574_v40 = vadd.f32 %v2728_v60, %v1561_v39  ;;  %v1177_v8 = vadd.f32 %v1150_v63, %v1087_v62  ;;  %v1304_v38 = vrot.slane %v1267_v55, 3  ;;  %v3025_v41 = vmul.f32 0.0, %v1962_v28 }
 0x13f   : > { %v1151_v59 = vsel %vm384_vm2, %v3326_v45, %v1150_v63  ;;  %v1663_v35 = vpack.c.bf16 %v1573_v10, %v1573_v10  ;;  %v1498_v57 = vmul.f32 %v1073_v61, %v1962_v28  ;;  %v874_v31 = vsel %vm854_vm6, %v851_v11, 0.0  ;;  %v3328_v63 = vld [vmem:[#allocation11_spill] sm:$0xff] }
 0x140   : > { %v1176_v29 = vadd.f32 %v1151_v59, %v1086_v2  ;;  %v1664_v51 = vpack.c.bf16 %v1574_v40, %v1574_v40  ;;  %v1228_v42 = vsel %vm274_vm1, %v1225_v30, %v1227_v43  ;;  %v1381_v56 = vrot.slane %v1344_v47, 4 }
 0x141   : > { %v920_v50 = vsel %vm854_vm6, %v898_v12, 0.0  ;;  %v1594_v9 = vsel %vm854_vm6, %v1573_v10, 0.0  ;;  %1808 = vst.msk [vmem:[%s2077_s29 + $0x58] sm:$0xf] %vm946_vm7, %v1663_v35  ;;  %v1254_v7 = vadd.f32 %v1227_v43, %v1177_v8  ;;  %v1638_v2 = vadd.f32 %v1637_v46, %v2942_v15  ;;  %v3327_v46 = vld [vmem:[#allocation10_spill] sm:$0xff] }
 0x142   : > { %v1253_v19 = vadd.f32 %v1228_v42, %v1176_v29  ;;  %v1618_v54 = vmul.f32 %v1573_v10, %v1573_v10  ;;  %1809 = vst.msk [vmem:[%s2077_s29 + $0x5c] sm:$0xf] %vm946_vm7, %v1664_v51  ;;  %v1305_v37 = vsel %vm541_vm3, %v1302_v53, %v1304_v38  ;;  %v1458_v11 = vrot.slane %v1421_v48, 5 }
 0x143   : > { %v810_v30 = vrot.slane %v3025_v41, 6  ;;  %v1331_v55 = vadd.f32 %v1304_v38, %v1254_v7  ;;  %v1535_v3 = vrot.slane %v1498_v57, 6  ;;  %v1595_v62 = vadd.f32 %v1594_v9, %v1593_v52  ;;  %v962_v41 = vld [vmem:[%s2077_s29 + $0x30] sm:$0x3] }
 0x144   : > { %v1330_v61 = vadd.f32 %v1305_v37, %v1253_v19  ;;  %v1382_v15 = vsel %vm620_vm4, %v1379_v36, %v1381_v56  ;;  %v3047_v39 = vadd.f32 %v874_v31, %v3327_v46  ;;  %v3050_v49 = vadd.f32 %v920_v50, %v3328_v63 }
 0x145   : > { %v1596_v53 = vsel %vm854_vm6, %v1574_v40, 0.0  ;;  %v1619_v43 = vmul.f32 %v1574_v40, %v1574_v40  ;;  %v1408_v12 = vadd.f32 %v1381_v56, %v1331_v55  ;;  %v1639_v10 = vsel %vm854_vm6, %v1618_v54, 0.0 }
 0x146   : > { %v1407_v47 = vadd.f32 %v1382_v15, %v1330_v61  ;;  %v1459_v52 = vsel %vm245_vm0, %v1456_v34, %v1458_v11  ;;  %v370_v6 = vmul.f32 %v1941_v18, %v328_v17  ;;  %v449_v36 = vmul.f32 %v1943_v20, %v328_v17 }
 0x147   : > { %v1485_v45 = vadd.f32 %v1458_v11, %v1408_v12  ;;  %v1536_v59 = vsel %vm784_vm5, %v1533_v5, %v1535_v3  ;;  %v527_v40 = vmul.f32 %v1945_v21, %v328_v17  ;;  %v1537_v8 = vsel %vm784_vm5, %v1535_v3, %v810_v30 }
 0x148   : > { %v1484_v48 = vadd.f32 %v1459_v52, %v1407_v47  ;;  %v343_v44 = vmul.f32 %v1953_v24, %v328_v17  ;;  %v408_v38 = vrot.slane %v370_v6, 1  ;;  %v606_v34 = vmul.f32 %v1955_v25, %v328_v17 }
 0x149   : > { %v1640_v18 = vadd.f32 %v1639_v10, %v1638_v2  ;;  %v1563_v20 = vadd.f32 %v1537_v8, %v1485_v45  ;;  %v486_v29 = vrot.slane %v449_v36, 2  ;;  %v1641_v57 = vsel %vm854_vm6, %v1619_v43, 0.0 }
 0x14a   : > { %v1562_v35 = vadd.f32 %v1536_v59, %v1484_v48  ;;  %v409_v33 = vsel %vm384_vm2, %v406_v16, %v408_v38  ;;  %v435_v21 = vadd.f32 %v408_v38, %v343_v44  ;;  %v685_v5 = vmul.f32 %v1960_v27, %v328_v17 }
 0x14b   : > { %v3077_v24 = vadd.f32 %v2728_v60, %v1563_v20  ;;  %v434_v25 = vadd.f32 %v409_v33, %v2994_v4  ;;  %v565_v51 = vrot.slane %v527_v40, 3  ;;  %v1597_v42 = vadd.f32 %v1596_v53, %v1595_v62 }
 0x14c   : > { %v3074_v31 = vadd.f32 %v2728_v60, %v1562_v35  ;;  %v513_v56 = vadd.f32 %v486_v29, %v435_v21  ;;  %v644_v50 = vrot.slane %v606_v34, 4  ;;  %v768_v9 = vmul.f32 %v1962_v28, %v328_v17 }
 0x14d   : > { %v1621_v16 = vmul.f32 %v3077_v24, %v3077_v24  ;;  %v487_v19 = vsel %vm274_vm1, %v484_v13, %v486_v29  ;;  %v1642_v7 = vadd.f32 %v1641_v57, %v1640_v18  ;;  %v722_v54 = vrot.slane %v685_v5, 5 }
 0x14e   : > { %v1598_v32 = vsel %vm854_vm6, %v3074_v31, 0.0  ;;  %v1620_v27 = vmul.f32 %v3074_v31, %v3074_v31  ;;  %v512_v2 = vadd.f32 %v487_v19, %v434_v25  ;;  %v1600_v28 = vsel %vm878_vm8, %v3077_v24, 0.0 }
 0x14f   : > { %v1599_v4 = vadd.f32 %v1598_v32, %v1597_v42  ;;  %v3329_v11 = vrot.slane %v2872_v1, 3  ;;  %v592_v55 = vadd.f32 %v565_v51, %v513_v56  ;;  %v808_v14 = vrot.slane %v768_v9, 6  ;;  %v1811_v32 = vld [vmem:[%s2077_s29 + $0x64] sm:$0x3] }
 0x150   : > { %v1643_v37 = vsel %vm854_vm6, %v1620_v27, 0.0  ;;  %v1645_v13 = vsel %vm878_vm8, %v1621_v16, 0.0  ;;  %v3330_v15 = vrot.slane %v2883_v26, 4  ;;  %v723_v1 = vsel %vm245_vm0, %v720_v0, %v722_v54 }
 0x151   : > { %v566_v61 = vsel %vm541_vm3, %v3329_v11, %v565_v51  ;;  %v1601_v3 = vadd.f32 %v1600_v28, %v1599_v4  ;;  %v1644_v17 = vadd.f32 %v1643_v37, %v1642_v7  ;;  %v671_v63 = vadd.f32 %v644_v50, %v592_v55 }
 0x152   : > { %v591_v62 = vadd.f32 %v566_v61, %v512_v2  ;;  %v645_v46 = vsel %vm620_vm4, %v3330_v15, %v644_v50  ;;  %v811_v52 = vsel %vm784_vm5, %v808_v14, %v810_v30  ;;  %v809_v26 = vsel %vm784_vm5, %v806_v22, %v808_v14 }
 0x153   : > { %v1646_v53 = vadd.f32 %v1645_v13, %v1644_v17  ;;  %v1602_v47 = vrot.slane %v1601_v3, 4  ;;  %v749_v12 = vadd.f32 %v722_v54, %v671_v63  ;;  %v1665_v23 = vpack.c.bf16 %v3074_v31, %v3074_v31 }
 0x154   : > { %v670_v43 = vadd.f32 %v645_v46, %v591_v62  ;;  %v1666_v56 = vpack.c.bf16 %v3077_v24, %v3077_v24 }
 0x155   : > { %v1647_v6 = vrot.slane %v1646_v53, 4  ;;  %v837_v36 = vadd.f32 %v811_v52, %v749_v12  ;;  %v1603_v45 = vadd.f32 %v1602_v47, %v1601_v3  ;;  %1810 = vst.msk [vmem:[%s2077_s29 + $0x60] sm:$0xf] %vm946_vm7, %v1665_v23 }
 0x156   : > { %v748_v10 = vadd.f32 %v723_v1, %v670_v43  ;;  %v1681_v27 = vsel %vm3111_vm11, %v1666_v56, %v1811_v32 }
 0x157   : > { %v853_v58 = vadd.f32 %v2728_v60, %v837_v36  ;;  %v1648_v59 = vadd.f32 %v1647_v6, %v1646_v53  ;;  %v1604_v38 = vrot.slane %v1603_v45, 2  ;;  %1812 = vst [vmem:[%s2077_s29 + $0x64] sm:$0x3] %v1681_v27 }
 0x158   : > { %v836_v48 = vadd.f32 %v809_v26, %v748_v10 }
 0x159   : > { %v945_v40 = vpack.c.bf16 %v853_v58, %v853_v58  ;;  %v900_v44 = vmul.f32 %v853_v58, %v853_v58  ;;  %v1649_v29 = vrot.slane %v1648_v59, 2 }
 0x15a   : > { %v852_v30 = vadd.f32 %v2728_v60, %v836_v48  ;;  %v879_v60 = vsel %vm878_vm8, %v853_v58, 0.0 }
 0x15b   : > { %v963_v35 = vsel %vm3111_vm11, %v945_v40, %v962_v41  ;;  %v924_v21 = vsel %vm878_vm8, %v900_v44, 0.0  ;;  %v1650_v25 = vadd.f32 %v1649_v29, %v1648_v59 }
 0x15c   : > { %v876_v22 = vsel %vm854_vm6, %v852_v30, 0.0  ;;  %v899_v8 = vmul.f32 %v852_v30, %v852_v30  ;;  %v944_v18 = vpack.c.bf16 %v852_v30, %v852_v30  ;;  %964 = vst [vmem:[%s2077_s29 + $0x30] sm:$0x3] %v963_v35 }
 0x15d   : > { %v877_v34 = vadd.f32 %v876_v22, %v3047_v39  ;;  %v1605_v39 = vadd.f32 %v1604_v38, %v1603_v45  ;;  %v1651_v16 = vrot.slane %v1650_v25, 1 }
 0x15e   : > { %v922_v20 = vsel %vm854_vm6, %v899_v8, 0.0  ;;  %958 = vst.msk [vmem:[%s2077_s29 + $0x2c] sm:$0xf] %vm946_vm7, %v944_v18 }
 0x15f   : > { %v880_v57 = vadd.f32 %v879_v60, %v877_v34  ;;  %v923_v33 = vadd.f32 %v922_v20, %v3050_v49  ;;  %v1606_v50 = vrot.slane %v1605_v39, 1  ;;  %v1652_v28 = vadd.f32 %v1651_v16, %v1650_v25 }
 0x161   : > { %v881_v5 = vrot.slane %v880_v57, 4  ;;  %v925_v31 = vadd.f32 %v924_v21, %v923_v33  ;;  %v1607_v7 = vadd.f32 %v1606_v50, %v1605_v39 }
 0x163   : > { %v882_v51 = vadd.f32 %v881_v5, %v880_v57  ;;  %v926_v42 = vrot.slane %v925_v31, 4 }
 0x165   : > { %v883_v49 = vrot.slane %v882_v51, 2  ;;  %v927_v9 = vadd.f32 %v926_v42, %v925_v31 }
 0x167   : > { %v884_v19 = vadd.f32 %v883_v49, %v882_v51  ;;  %v928_v4 = vrot.slane %v927_v9, 2 }
 0x169   : > { %v885_v2 = vrot.slane %v884_v19, 1  ;;  %v929_v54 = vadd.f32 %v928_v4, %v927_v9 }
 0x16b   : > { %v886_v37 = vadd.f32 %v885_v2, %v884_v19  ;;  %v930_v11 = vrot.slane %v929_v54, 1 }
 0x16d   : > { %v931_v24 = vadd.f32 %v930_v11, %v929_v54  ;;  %v1608_v61 = vadd.f32 %v1607_v7, %v886_v37 }
 0x16f   : > { %v1653_v55 = vadd.f32 %v1652_v28, %v931_v24 }
 0x171   : > { %v1684_v3 = vsel %vm1683_vm12, %v1608_v61, %v1653_v55 }
 0x172   : > { %1686 = vst.msk [vmem:[%s216_s9] sm:$0x3] %vm959_vm9, %v1684_v3 }
 0x173 PF: > { %s15_s15 = sadd.s32 1, %s1837_s15  }
 0x174   : > { %p12_p5 = scmp.ge.s32.totalorder %s15_s15, 6  }
 0x176   :  { %14 = sbr.rel (!%p12_p5) target bundleno = 1 (0x1), region = 76 }

</bundles_post_ra>
